<compile_context>
chip_gen: v7x
topology: tpu7x:2x2x1
jax: 0.10.0
libtpu: 0.0.40
codegen_flags: <defaults>
</compile_context>

<pallas_src>
import functools

import jax
import jax.numpy as jnp
from jax.experimental import pallas as pl
from jax.experimental.pallas import tpu as pltpu

LANE = 128  # the final output (n_action) is padded to a full 128-lane width


def _round_up(x, m):
    return (x + m - 1) // m * m


# ----------------------------------------------------------------------------
# Pallas kernel: one conv layer for one image, expressed as a tap-sum of
# KH/stride contiguous row-slice matmuls over a VMEM-resident block.
#   x_ref : [1, ROWS, CIN_EFF] bf16   (ROWS = (H/stride)*OW, CIN_EFF = stride*K*C)
#   w_ref : [TAPS, CIN_EFF, OC] bf16
#   b_ref : [1, OC] f32
#   o_ref : [1, OH*OW, OC] bf16
# ----------------------------------------------------------------------------
def _conv_tap_kernel(x_ref, w_ref, b_ref, o_ref, *, ow, ohow, taps):
    acc = jnp.dot(x_ref[0, 0:ohow, :], w_ref[0],
                  preferred_element_type=jnp.float32)
    for p in range(1, taps):
        acc = acc + jnp.dot(x_ref[0, p * ow: p * ow + ohow, :], w_ref[p],
                            preferred_element_type=jnp.float32)
    y = jnp.maximum(acc + b_ref[...], 0.0)
    o_ref[0, :, :] = y.astype(o_ref.dtype)


def conv_layer(x_nhwc, w_taps, b_row, ksize, stride):
    """Conv2d(VALID) + ReLU.

    x_nhwc : [N, H, W, C] bf16
    w_taps : [K//stride, stride*K*C, OC] bf16  (built once in prepare_params)
    b_row  : [1, OC] f32
    returns [N, OH, OW, OC] bf16
    """
    n, h, wd, c = x_nhwc.shape
    assert ksize % stride == 0 and h % stride == 0
    oh = (h - ksize) // stride + 1
    ow = (wd - ksize) // stride + 1
    taps = ksize // stride
    cin_eff = stride * ksize * c
    rows = (h // stride) * ow
    oc = w_taps.shape[-1]

    # --- XLA-side layout prep (no KH*KW duplication; only ~K/stride along W) ---
    # W-tap extraction: xw[n, h, ow, kj*C + c] = x[n, h, stride*ow + kj, c]
    slabs = [x_nhwc[:, :, j: j + stride * ow: stride, :] for j in range(ksize)]
    xw = jnp.concatenate(slabs, axis=-1)                       # [N, H, OW, K*C]
    # H space-to-depth by `stride`: channel order becomes (a, kj, c)
    xh = xw.reshape(n, h // stride, stride, ow, ksize * c)
    xh = jnp.transpose(xh, (0, 1, 3, 2, 4))                    # [N, H/S, OW, S, K*C]
    xflat = xh.reshape(n, rows, cin_eff)                       # [N, ROWS, CIN_EFF]

    kern = functools.partial(_conv_tap_kernel, ow=ow, ohow=oh * ow, taps=taps)
    y = pl.pallas_call(
        kern,
        out_shape=jax.ShapeDtypeStruct((n, oh * ow, oc), jnp.bfloat16),
        grid_spec=pltpu.PrefetchScalarGridSpec(
            num_scalar_prefetch=0,
            grid=(n,),
            in_specs=[
                pl.BlockSpec((1, rows, cin_eff), lambda i: (i, 0, 0)),
                pl.BlockSpec(w_taps.shape, lambda i: (0, 0, 0)),   # resident weights
                pl.BlockSpec((1, oc), lambda i: (0, 0)),           # resident bias
            ],
            out_specs=pl.BlockSpec((1, oh * ow, oc), lambda i: (i, 0, 0)),
        ),
        compiler_params=pltpu.CompilerParams(
            dimension_semantics=("parallel",)),
    )(xflat, w_taps, b_row)
    return y.reshape(n, oh, ow, oc)


# ----------------------------------------------------------------------------
# Pallas kernel: fused head  out = relu(Xflat @ Wfc + bfc) @ Wout + bout
# Single K step: fc weight (~3.2 MB bf16) and out weight are fully VMEM-resident;
# the [TM, 512] hidden never leaves VMEM.  M (batch) grid is "parallel".
# ----------------------------------------------------------------------------
def _head_kernel(x_ref, fcw_ref, fcb_ref, outw_ref, outb_ref, o_ref):
    h = jnp.dot(x_ref[...], fcw_ref[...], preferred_element_type=jnp.float32)
    h = jnp.maximum(h + fcb_ref[...], 0.0).astype(jnp.bfloat16)
    out = jnp.dot(h, outw_ref[...], preferred_element_type=jnp.float32)
    o_ref[...] = out + outb_ref[...]


def pallas_fc_out(xflat, fc_w, fc_b, out_w, out_b, tm=256):
    """xflat: [N, 3136] bf16, fc_w: [3136, 512] bf16, fc_b: [1, 512] f32,
    out_w: [512, 128] bf16, out_b: [1, 128] f32  ->  [N, 128] f32."""
    n, k = xflat.shape
    _, hdim = fc_w.shape
    _, nout = out_w.shape
    tm = min(tm, _round_up(n, 8))
    np_rows = _round_up(n, tm)
    if np_rows != n:
        xflat = jnp.pad(xflat, ((0, np_rows - n), (0, 0)))
    out = pl.pallas_call(
        _head_kernel,
        out_shape=jax.ShapeDtypeStruct((np_rows, nout), jnp.float32),
        grid_spec=pltpu.PrefetchScalarGridSpec(
            num_scalar_prefetch=0,
            grid=(np_rows // tm,),
            in_specs=[
                pl.BlockSpec((tm, k), lambda m: (m, 0)),        # activation M-slice
                pl.BlockSpec((k, hdim), lambda m: (0, 0)),      # fc weight (resident)
                pl.BlockSpec((1, hdim), lambda m: (0, 0)),      # fc bias (resident)
                pl.BlockSpec((hdim, nout), lambda m: (0, 0)),   # out weight (resident)
                pl.BlockSpec((1, nout), lambda m: (0, 0)),      # out bias (resident)
            ],
            out_specs=pl.BlockSpec((tm, nout), lambda m: (m, 0)),
        ),
        compiler_params=pltpu.CompilerParams(
            dimension_semantics=("parallel",)),
    )(xflat, fc_w, fc_b, out_w, out_b)
    return out[:n]


# ----------------------------------------------------------------------------
# Deterministic parameter init (PyTorch-style uniform, PyTorch layouts)
# ----------------------------------------------------------------------------
def init_params(key, n_channel, n_action):
    def uinit(k, shape, fan_in):
        bound = 1.0 / (fan_in ** 0.5)
        return jax.random.uniform(k, shape, jnp.float32, -bound, bound)

    ks = jax.random.split(key, 10)
    p = {}
    p["conv1_w"] = uinit(ks[0], (32, n_channel, 8, 8), n_channel * 8 * 8)
    p["conv1_b"] = uinit(ks[1], (32,), n_channel * 8 * 8)
    p["conv2_w"] = uinit(ks[2], (64, 32, 4, 4), 32 * 4 * 4)
    p["conv2_b"] = uinit(ks[3], (64,), 32 * 4 * 4)
    p["conv3_w"] = uinit(ks[4], (64, 64, 3, 3), 64 * 3 * 3)
    p["conv3_b"] = uinit(ks[5], (64,), 64 * 3 * 3)
    p["fc_w"]    = uinit(ks[6], (512, 7 * 7 * 64), 7 * 7 * 64)   # torch Linear: [out, in]
    p["fc_b"]    = uinit(ks[7], (512,), 7 * 7 * 64)
    p["out_w"]   = uinit(ks[8], (n_action, 512), 512)
    p["out_b"]   = uinit(ks[9], (n_action,), 512)
    return p


def prepare_params(p, n_action):
    """One-time conversion of PyTorch-layout params into matmul-ready bf16 matrices.
    Conv weights become [K//S, S*K*C, OC] tap matrices with channel order (a, kj, c),
    matching the W-tap + H space-to-depth layout produced in conv_layer.
    No zero-padding of intermediate channels (true K everywhere)."""
    def conv_w(w, stride):
        oc, c, k, _ = w.shape
        taps = k // stride
        wt = jnp.transpose(w, (2, 3, 1, 0))            # [ki, kj, c, oc]
        wt = wt.reshape(taps, stride, k, c, oc)        # ki = stride*p + a -> [p, a, kj, c, oc]
        return wt.reshape(taps, stride * k * c, oc).astype(jnp.bfloat16)

    def bias_row(b):
        return b.reshape(1, -1).astype(jnp.float32)

    prep = {
        "w1": conv_w(p["conv1_w"], 4), "b1": bias_row(p["conv1_b"]),   # [2, 128, 32]
        "w2": conv_w(p["conv2_w"], 2), "b2": bias_row(p["conv2_b"]),   # [2, 256, 64]
        "w3": conv_w(p["conv3_w"], 1), "b3": bias_row(p["conv3_b"]),   # [3, 192, 64]
    }
    # fc: permute columns from torch's NCHW flatten order (c*49 + h*7 + w) to our
    # NHWC flatten order ((h*7 + w)*64 + c).  True K = 3136 (no padding).
    fc_w = p["fc_w"].reshape(512, 64, 7, 7)            # [out, c, h, w]
    fc_w = jnp.transpose(fc_w, (2, 3, 1, 0))           # [h, w, c, out]
    prep["fc_w"] = fc_w.reshape(7 * 7 * 64, 512).astype(jnp.bfloat16)
    prep["fc_b"] = p["fc_b"].reshape(1, 512).astype(jnp.float32)

    out_w = jnp.transpose(p["out_w"], (1, 0))          # [512, n_action]
    prep["out_w"] = jnp.pad(out_w, ((0, 0), (0, LANE - n_action))).astype(jnp.bfloat16)
    prep["out_b"] = jnp.pad(p["out_b"], (0, LANE - n_action)).reshape(1, LANE).astype(jnp.float32)
    return prep


# ----------------------------------------------------------------------------
# Forward passes
# ----------------------------------------------------------------------------
@functools.partial(jax.jit, static_argnames=("n_action",))
def cnn_forward(prep, x_nchw, *, n_action):
    x = jnp.transpose(x_nchw, (0, 2, 3, 1)).astype(jnp.bfloat16)   # NHWC, bf16, once
    x = conv_layer(x, prep["w1"], prep["b1"], 8, 4)                # [N, 20, 20, 32]
    x = conv_layer(x, prep["w2"], prep["b2"], 4, 2)                # [N,  9,  9, 64]
    x = conv_layer(x, prep["w3"], prep["b3"], 3, 1)                # [N,  7,  7, 64]
    n = x.shape[0]
    xflat = x.reshape(n, 7 * 7 * 64)                               # [N, 3136] bf16
    out = pallas_fc_out(xflat, prep["fc_w"], prep["fc_b"],
                        prep["out_w"], prep["out_b"])              # [N, 128] f32
    return out[:, :n_action]


def cnn_forward_ref(params, x):
    """Pure-JAX reference (XLA conv, f32, PyTorch layouts) for correctness checking."""
    def conv(x, w, b, s):
        y = jax.lax.conv_general_dilated(
            x, w, (s, s), "VALID", dimension_numbers=("NCHW", "OIHW", "NCHW"))
        return jax.nn.relu(y + b[None, :, None, None])

    x = conv(x, params["conv1_w"], params["conv1_b"], 4)
    x = conv(x, params["conv2_w"], params["conv2_b"], 2)
    x = conv(x, params["conv3_w"], params["conv3_b"], 1)
    x = x.reshape(x.shape[0], -1)
    x = jax.nn.relu(x @ params["fc_w"].T + params["fc_b"])
    return x @ params["out_w"].T + params["out_b"]


if __name__ == "__main__":
    key = jax.random.PRNGKey(0)
    k_param, k_x = jax.random.split(key)

    n_channel, n_action, batch = 4, 6, 2
    # 84x84 spatial is required by the module (fc expects 7*7*64 features).
    x = jax.random.normal(k_x, (batch, n_channel, 84, 84), dtype=jnp.float32)
    params = init_params(k_param, n_channel, n_action)
    prep = prepare_params(params, n_action)

    out = jax.block_until_ready(cnn_forward(prep, x, n_action=n_action))
    ref = jax.block_until_ready(cnn_forward_ref(params, x))

    assert out.shape == (batch, n_action), out.shape
    max_err = float(jnp.max(jnp.abs(out - ref)))
    assert jnp.allclose(out, ref, rtol=3e-2, atol=3e-2), max_err
    print("KERNEL_OK")
</pallas_src>

<mosaic_0001>
module attributes {stable_mosaic.version = 11 : i64} {
  func.func @_conv_tap_kernel(%arg0: i32, %arg1: memref<1x420x128xbf16, #tpu.memory_space<vmem>>, %arg2: memref<2x128x32xbf16, #tpu.memory_space<vmem>>, %arg3: memref<1x32xf32, #tpu.memory_space<vmem>>, %arg4: memref<1x400x32xbf16, #tpu.memory_space<vmem>>) attributes {dimension_semantics = [#tpu.dimension_semantics<parallel>], iteration_bounds = array<i64: 2>, scalar_prefetch = 0 : i64, scratch_operands = 0 : i64, tpu.core_type = #tpu.core_type<tc>, window_params = [{transform_indices = @transform_0, window_bounds = array<i64: 1, 420, 128>}, {pipeline_mode = #tpu.pipeline_mode<synchronous>, transform_indices = @transform_1, window_bounds = array<i64: 2, 128, 32>}, {pipeline_mode = #tpu.pipeline_mode<synchronous>, transform_indices = @transform_2, window_bounds = array<i64: 1, 32>}, {transform_indices = @transform_3, window_bounds = array<i64: 1, 400, 32>}]} {
    %c0 = arith.constant 0 : index
    %c0_0 = arith.constant 0 : index
    %c0_1 = arith.constant 0 : index
    %0 = vector.load %arg1[%c0, %c0_0, %c0_1] : memref<1x420x128xbf16, #tpu.memory_space<vmem>>, vector<1x400x128xbf16>
    %1 = vector.shape_cast %0 : vector<1x400x128xbf16> to vector<400x128xbf16>
    %c0_2 = arith.constant 0 : index
    %c0_3 = arith.constant 0 : index
    %c0_4 = arith.constant 0 : index
    %2 = vector.load %arg2[%c0_2, %c0_3, %c0_4] : memref<2x128x32xbf16, #tpu.memory_space<vmem>>, vector<1x128x32xbf16>
    %3 = vector.shape_cast %2 : vector<1x128x32xbf16> to vector<128x32xbf16>
    %cst = arith.constant dense<0.000000e+00> : vector<400x32xf32>
    %4 = tpu.matmul %1, %3, %cst {dimension_numbers = #tpu.dot_dimension_numbers<[1], [0], [0], [1], [0, 0, 1, 1], [], []>} : vector<400x128xbf16>, vector<128x32xbf16>, vector<400x32xf32> -> vector<400x32xf32>
    %c0_5 = arith.constant 0 : index
    %c20 = arith.constant 20 : index
    %c0_6 = arith.constant 0 : index
    %5 = vector.load %arg1[%c0_5, %c20, %c0_6] : memref<1x420x128xbf16, #tpu.memory_space<vmem>>, vector<1x400x128xbf16>
    %6 = vector.shape_cast %5 : vector<1x400x128xbf16> to vector<400x128xbf16>
    %c1 = arith.constant 1 : index
    %c0_7 = arith.constant 0 : index
    %c0_8 = arith.constant 0 : index
    %7 = vector.load %arg2[%c1, %c0_7, %c0_8] : memref<2x128x32xbf16, #tpu.memory_space<vmem>>, vector<1x128x32xbf16>
    %8 = vector.shape_cast %7 : vector<1x128x32xbf16> to vector<128x32xbf16>
    %cst_9 = arith.constant dense<0.000000e+00> : vector<400x32xf32>
    %9 = tpu.matmul %6, %8, %cst_9 {dimension_numbers = #tpu.dot_dimension_numbers<[1], [0], [0], [1], [0, 0, 1, 1], [], []>} : vector<400x128xbf16>, vector<128x32xbf16>, vector<400x32xf32> -> vector<400x32xf32>
    %10 = arith.addf %4, %9 : vector<400x32xf32>
    %c0_10 = arith.constant 0 : index
    %c0_11 = arith.constant 0 : index
    %11 = vector.load %arg3[%c0_10, %c0_11] : memref<1x32xf32, #tpu.memory_space<vmem>>, vector<1x32xf32>
    %12 = vector.broadcast %11 : vector<1x32xf32> to vector<400x32xf32>
    %13 = arith.addf %10, %12 : vector<400x32xf32>
    %cst_12 = arith.constant 0.000000e+00 : f32
    %14 = vector.broadcast %cst_12 : f32 to vector<400x32xf32>
    %15 = arith.maximumf %13, %14 : vector<400x32xf32>
    %16 = arith.truncf %15 : vector<400x32xf32> to vector<400x32xbf16>
    %c0_13 = arith.constant 0 : index
    %c0_14 = arith.constant 0 : index
    %c0_15 = arith.constant 0 : index
    %17 = vector.load %arg4[%c0_13, %c0_14, %c0_15] : memref<1x400x32xbf16, #tpu.memory_space<vmem>>, vector<1x400x32xbf16>
    %18 = vector.shape_cast %17 : vector<1x400x32xbf16> to vector<400x32xbf16>
    %19 = vector.shape_cast %16 : vector<400x32xbf16> to vector<1x400x32xbf16>
    tpu.vector_store %arg4[%c0_13, %c0_14, %c0_15], %19 {strides = array<i32>} : memref<1x400x32xbf16, #tpu.memory_space<vmem>>, vector<1x400x32xbf16>,
    return
  }
  func.func @transform_0(%arg0: i32) -> (i32, i32, i32) {
    %c0_i32 = arith.constant 0 : i32
    %c0_i32_0 = arith.constant 0 : i32
    %c0_i32_1 = arith.constant 0 : i32
    return %arg0, %c0_i32, %c0_i32_0 : i32, i32, i32
  }
  func.func @transform_1(%arg0: i32) -> (i32, i32, i32) {
    %c0_i32 = arith.constant 0 : i32
    %c0_i32_0 = arith.constant 0 : i32
    %c0_i32_1 = arith.constant 0 : i32
    %c0_i32_2 = arith.constant 0 : i32
    return %c0_i32, %c0_i32_0, %c0_i32_1 : i32, i32, i32
  }
  func.func @transform_2(%arg0: i32) -> (i32, i32) {
    %c0_i32 = arith.constant 0 : i32
    %c0_i32_0 = arith.constant 0 : i32
    %c0_i32_1 = arith.constant 0 : i32
    return %c0_i32, %c0_i32_0 : i32, i32
  }
  func.func @transform_3(%arg0: i32) -> (i32, i32, i32) {
    %c0_i32 = arith.constant 0 : i32
    %c0_i32_0 = arith.constant 0 : i32
    %c0_i32_1 = arith.constant 0 : i32
    return %arg0, %c0_i32, %c0_i32_0 : i32, i32, i32
  }
}

module attributes {stable_mosaic.version = 11 : i64} {
  func.func @_conv_tap_kernel(%arg0: i32, %arg1: memref<1x90x256xbf16, #tpu.memory_space<vmem>>, %arg2: memref<2x256x64xbf16, #tpu.memory_space<vmem>>, %arg3: memref<1x64xf32, #tpu.memory_space<vmem>>, %arg4: memref<1x81x64xbf16, #tpu.memory_space<vmem>>) attributes {dimension_semantics = [#tpu.dimension_semantics<parallel>], iteration_bounds = array<i64: 2>, scalar_prefetch = 0 : i64, scratch_operands = 0 : i64, tpu.core_type = #tpu.core_type<tc>, window_params = [{transform_indices = @transform_0, window_bounds = array<i64: 1, 90, 256>}, {pipeline_mode = #tpu.pipeline_mode<synchronous>, transform_indices = @transform_1, window_bounds = array<i64: 2, 256, 64>}, {pipeline_mode = #tpu.pipeline_mode<synchronous>, transform_indices = @transform_2, window_bounds = array<i64: 1, 64>}, {transform_indices = @transform_3, window_bounds = array<i64: 1, 81, 64>}]} {
    %c0 = arith.constant 0 : index
    %c0_0 = arith.constant 0 : index
    %c0_1 = arith.constant 0 : index
    %0 = vector.load %arg1[%c0, %c0_0, %c0_1] : memref<1x90x256xbf16, #tpu.memory_space<vmem>>, vector<1x81x256xbf16>
    %1 = vector.shape_cast %0 : vector<1x81x256xbf16> to vector<81x256xbf16>
    %c0_2 = arith.constant 0 : index
    %c0_3 = arith.constant 0 : index
    %c0_4 = arith.constant 0 : index
    %2 = vector.load %arg2[%c0_2, %c0_3, %c0_4] : memref<2x256x64xbf16, #tpu.memory_space<vmem>>, vector<1x256x64xbf16>
    %3 = vector.shape_cast %2 : vector<1x256x64xbf16> to vector<256x64xbf16>
    %cst = arith.constant dense<0.000000e+00> : vector<81x64xf32>
    %4 = tpu.matmul %1, %3, %cst {dimension_numbers = #tpu.dot_dimension_numbers<[1], [0], [0], [1], [0, 0, 1, 1], [], []>} : vector<81x256xbf16>, vector<256x64xbf16>, vector<81x64xf32> -> vector<81x64xf32>
    %c0_5 = arith.constant 0 : index
    %c9 = arith.constant 9 : index
    %c0_6 = arith.constant 0 : index
    %5 = vector.load %arg1[%c0_5, %c9, %c0_6] : memref<1x90x256xbf16, #tpu.memory_space<vmem>>, vector<1x81x256xbf16>
    %6 = vector.shape_cast %5 : vector<1x81x256xbf16> to vector<81x256xbf16>
    %c1 = arith.constant 1 : index
    %c0_7 = arith.constant 0 : index
    %c0_8 = arith.constant 0 : index
    %7 = vector.load %arg2[%c1, %c0_7, %c0_8] : memref<2x256x64xbf16, #tpu.memory_space<vmem>>, vector<1x256x64xbf16>
    %8 = vector.shape_cast %7 : vector<1x256x64xbf16> to vector<256x64xbf16>
    %cst_9 = arith.constant dense<0.000000e+00> : vector<81x64xf32>
    %9 = tpu.matmul %6, %8, %cst_9 {dimension_numbers = #tpu.dot_dimension_numbers<[1], [0], [0], [1], [0, 0, 1, 1], [], []>} : vector<81x256xbf16>, vector<256x64xbf16>, vector<81x64xf32> -> vector<81x64xf32>
    %10 = arith.addf %4, %9 : vector<81x64xf32>
    %c0_10 = arith.constant 0 : index
    %c0_11 = arith.constant 0 : index
    %11 = vector.load %arg3[%c0_10, %c0_11] : memref<1x64xf32, #tpu.memory_space<vmem>>, vector<1x64xf32>
    %12 = vector.broadcast %11 : vector<1x64xf32> to vector<81x64xf32>
    %13 = arith.addf %10, %12 : vector<81x64xf32>
    %cst_12 = arith.constant 0.000000e+00 : f32
    %14 = vector.broadcast %cst_12 : f32 to vector<81x64xf32>
    %15 = arith.maximumf %13, %14 : vector<81x64xf32>
    %16 = arith.truncf %15 : vector<81x64xf32> to vector<81x64xbf16>
    %c0_13 = arith.constant 0 : index
    %c0_14 = arith.constant 0 : index
    %c0_15 = arith.constant 0 : index
    %17 = vector.load %arg4[%c0_13, %c0_14, %c0_15] : memref<1x81x64xbf16, #tpu.memory_space<vmem>>, vector<1x81x64xbf16>
    %18 = vector.shape_cast %17 : vector<1x81x64xbf16> to vector<81x64xbf16>
    %19 = vector.shape_cast %16 : vector<81x64xbf16> to vector<1x81x64xbf16>
    tpu.vector_store %arg4[%c0_13, %c0_14, %c0_15], %19 {strides = array<i32>} : memref<1x81x64xbf16, #tpu.memory_space<vmem>>, vector<1x81x64xbf16>,
    return
  }
  func.func @transform_0(%arg0: i32) -> (i32, i32, i32) {
    %c0_i32 = arith.constant 0 : i32
    %c0_i32_0 = arith.constant 0 : i32
    %c0_i32_1 = arith.constant 0 : i32
    return %arg0, %c0_i32, %c0_i32_0 : i32, i32, i32
  }
  func.func @transform_1(%arg0: i32) -> (i32, i32, i32) {
    %c0_i32 = arith.constant 0 : i32
    %c0_i32_0 = arith.constant 0 : i32
    %c0_i32_1 = arith.constant 0 : i32
    %c0_i32_2 = arith.constant 0 : i32
    return %c0_i32, %c0_i32_0, %c0_i32_1 : i32, i32, i32
  }
  func.func @transform_2(%arg0: i32) -> (i32, i32) {
    %c0_i32 = arith.constant 0 : i32
    %c0_i32_0 = arith.constant 0 : i32
    %c0_i32_1 = arith.constant 0 : i32
    return %c0_i32, %c0_i32_0 : i32, i32
  }
  func.func @transform_3(%arg0: i32) -> (i32, i32, i32) {
    %c0_i32 = arith.constant 0 : i32
    %c0_i32_0 = arith.constant 0 : i32
    %c0_i32_1 = arith.constant 0 : i32
    return %arg0, %c0_i32, %c0_i32_0 : i32, i32, i32
  }
}

module attributes {stable_mosaic.version = 11 : i64} {
  func.func @_conv_tap_kernel(%arg0: i32, %arg1: memref<1x63x192xbf16, #tpu.memory_space<vmem>>, %arg2: memref<3x192x64xbf16, #tpu.memory_space<vmem>>, %arg3: memref<1x64xf32, #tpu.memory_space<vmem>>, %arg4: memref<1x49x64xbf16, #tpu.memory_space<vmem>>) attributes {dimension_semantics = [#tpu.dimension_semantics<parallel>], iteration_bounds = array<i64: 2>, scalar_prefetch = 0 : i64, scratch_operands = 0 : i64, tpu.core_type = #tpu.core_type<tc>, window_params = [{transform_indices = @transform_0, window_bounds = array<i64: 1, 63, 192>}, {pipeline_mode = #tpu.pipeline_mode<synchronous>, transform_indices = @transform_1, window_bounds = array<i64: 3, 192, 64>}, {pipeline_mode = #tpu.pipeline_mode<synchronous>, transform_indices = @transform_2, window_bounds = array<i64: 1, 64>}, {transform_indices = @transform_3, window_bounds = array<i64: 1, 49, 64>}]} {
    %c0 = arith.constant 0 : index
    %c0_0 = arith.constant 0 : index
    %c0_1 = arith.constant 0 : index
    %0 = vector.load %arg1[%c0, %c0_0, %c0_1] : memref<1x63x192xbf16, #tpu.memory_space<vmem>>, vector<1x49x192xbf16>
    %1 = vector.shape_cast %0 : vector<1x49x192xbf16> to vector<49x192xbf16>
    %c0_2 = arith.constant 0 : index
    %c0_3 = arith.constant 0 : index
    %c0_4 = arith.constant 0 : index
    %2 = vector.load %arg2[%c0_2, %c0_3, %c0_4] : memref<3x192x64xbf16, #tpu.memory_space<vmem>>, vector<1x192x64xbf16>
    %3 = vector.shape_cast %2 : vector<1x192x64xbf16> to vector<192x64xbf16>
    %cst = arith.constant dense<0.000000e+00> : vector<49x64xf32>
    %4 = tpu.matmul %1, %3, %cst {dimension_numbers = #tpu.dot_dimension_numbers<[1], [0], [0], [1], [0, 0, 1, 1], [], []>} : vector<49x192xbf16>, vector<192x64xbf16>, vector<49x64xf32> -> vector<49x64xf32>
    %c0_5 = arith.constant 0 : index
    %c7 = arith.constant 7 : index
    %c0_6 = arith.constant 0 : index
    %5 = vector.load %arg1[%c0_5, %c7, %c0_6] : memref<1x63x192xbf16, #tpu.memory_space<vmem>>, vector<1x49x192xbf16>
    %6 = vector.shape_cast %5 : vector<1x49x192xbf16> to vector<49x192xbf16>
    %c1 = arith.constant 1 : index
    %c0_7 = arith.constant 0 : index
    %c0_8 = arith.constant 0 : index
    %7 = vector.load %arg2[%c1, %c0_7, %c0_8] : memref<3x192x64xbf16, #tpu.memory_space<vmem>>, vector<1x192x64xbf16>
    %8 = vector.shape_cast %7 : vector<1x192x64xbf16> to vector<192x64xbf16>
    %cst_9 = arith.constant dense<0.000000e+00> : vector<49x64xf32>
    %9 = tpu.matmul %6, %8, %cst_9 {dimension_numbers = #tpu.dot_dimension_numbers<[1], [0], [0], [1], [0, 0, 1, 1], [], []>} : vector<49x192xbf16>, vector<192x64xbf16>, vector<49x64xf32> -> vector<49x64xf32>
    %10 = arith.addf %4, %9 : vector<49x64xf32>
    %c0_10 = arith.constant 0 : index
    %c14 = arith.constant 14 : index
    %c0_11 = arith.constant 0 : index
    %11 = vector.load %arg1[%c0_10, %c14, %c0_11] : memref<1x63x192xbf16, #tpu.memory_space<vmem>>, vector<1x49x192xbf16>
    %12 = vector.shape_cast %11 : vector<1x49x192xbf16> to vector<49x192xbf16>
    %c2 = arith.constant 2 : index
    %c0_12 = arith.constant 0 : index
    %c0_13 = arith.constant 0 : index
    %13 = vector.load %arg2[%c2, %c0_12, %c0_13] : memref<3x192x64xbf16, #tpu.memory_space<vmem>>, vector<1x192x64xbf16>
    %14 = vector.shape_cast %13 : vector<1x192x64xbf16> to vector<192x64xbf16>
    %cst_14 = arith.constant dense<0.000000e+00> : vector<49x64xf32>
    %15 = tpu.matmul %12, %14, %cst_14 {dimension_numbers = #tpu.dot_dimension_numbers<[1], [0], [0], [1], [0, 0, 1, 1], [], []>} : vector<49x192xbf16>, vector<192x64xbf16>, vector<49x64xf32> -> vector<49x64xf32>
    %16 = arith.addf %10, %15 : vector<49x64xf32>
    %c0_15 = arith.constant 0 : index
    %c0_16 = arith.constant 0 : index
    %17 = vector.load %arg3[%c0_15, %c0_16] : memref<1x64xf32, #tpu.memory_space<vmem>>, vector<1x64xf32>
    %18 = vector.broadcast %17 : vector<1x64xf32> to vector<49x64xf32>
    %19 = arith.addf %16, %18 : vector<49x64xf32>
    %cst_17 = arith.constant 0.000000e+00 : f32
    %20 = vector.broadcast %cst_17 : f32 to vector<49x64xf32>
    %21 = arith.maximumf %19, %20 : vector<49x64xf32>
    %22 = arith.truncf %21 : vector<49x64xf32> to vector<49x64xbf16>
    %c0_18 = arith.constant 0 : index
    %c0_19 = arith.constant 0 : index
    %c0_20 = arith.constant 0 : index
    %23 = vector.load %arg4[%c0_18, %c0_19, %c0_20] : memref<1x49x64xbf16, #tpu.memory_space<vmem>>, vector<1x49x64xbf16>
    %24 = vector.shape_cast %23 : vector<1x49x64xbf16> to vector<49x64xbf16>
    %25 = vector.shape_cast %22 : vector<49x64xbf16> to vector<1x49x64xbf16>
    tpu.vector_store %arg4[%c0_18, %c0_19, %c0_20], %25 {strides = array<i32>} : memref<1x49x64xbf16, #tpu.memory_space<vmem>>, vector<1x49x64xbf16>,
    return
  }
  func.func @transform_0(%arg0: i32) -> (i32, i32, i32) {
    %c0_i32 = arith.constant 0 : i32
    %c0_i32_0 = arith.constant 0 : i32
    %c0_i32_1 = arith.constant 0 : i32
    return %arg0, %c0_i32, %c0_i32_0 : i32, i32, i32
  }
  func.func @transform_1(%arg0: i32) -> (i32, i32, i32) {
    %c0_i32 = arith.constant 0 : i32
    %c0_i32_0 = arith.constant 0 : i32
    %c0_i32_1 = arith.constant 0 : i32
    %c0_i32_2 = arith.constant 0 : i32
    return %c0_i32, %c0_i32_0, %c0_i32_1 : i32, i32, i32
  }
  func.func @transform_2(%arg0: i32) -> (i32, i32) {
    %c0_i32 = arith.constant 0 : i32
    %c0_i32_0 = arith.constant 0 : i32
    %c0_i32_1 = arith.constant 0 : i32
    return %c0_i32, %c0_i32_0 : i32, i32
  }
  func.func @transform_3(%arg0: i32) -> (i32, i32, i32) {
    %c0_i32 = arith.constant 0 : i32
    %c0_i32_0 = arith.constant 0 : i32
    %c0_i32_1 = arith.constant 0 : i32
    return %arg0, %c0_i32, %c0_i32_0 : i32, i32, i32
  }
}

module attributes {stable_mosaic.version = 11 : i64} {
  func.func @_head_kernel(%arg0: i32, %arg1: memref<8x3136xbf16, #tpu.memory_space<vmem>>, %arg2: memref<3136x512xbf16, #tpu.memory_space<vmem>>, %arg3: memref<1x512xf32, #tpu.memory_space<vmem>>, %arg4: memref<512x128xbf16, #tpu.memory_space<vmem>>, %arg5: memref<1x128xf32, #tpu.memory_space<vmem>>, %arg6: memref<8x128xf32, #tpu.memory_space<vmem>>) attributes {dimension_semantics = [#tpu.dimension_semantics<parallel>], iteration_bounds = array<i64: 1>, scalar_prefetch = 0 : i64, scratch_operands = 0 : i64, tpu.core_type = #tpu.core_type<tc>, window_params = [{transform_indices = @transform_0, window_bounds = array<i64: 8, 3136>}, {pipeline_mode = #tpu.pipeline_mode<synchronous>, transform_indices = @transform_1, window_bounds = array<i64: 3136, 512>}, {pipeline_mode = #tpu.pipeline_mode<synchronous>, transform_indices = @transform_2, window_bounds = array<i64: 1, 512>}, {pipeline_mode = #tpu.pipeline_mode<synchronous>, transform_indices = @transform_3, window_bounds = array<i64: 512, 128>}, {pipeline_mode = #tpu.pipeline_mode<synchronous>, transform_indices = @transform_4, window_bounds = array<i64: 1, 128>}, {transform_indices = @transform_5, window_bounds = array<i64: 8, 128>}]} {
    %c0 = arith.constant 0 : index
    %c0_0 = arith.constant 0 : index
    %0 = vector.load %arg1[%c0, %c0_0] : memref<8x3136xbf16, #tpu.memory_space<vmem>>, vector<8x3136xbf16>
    %c0_1 = arith.constant 0 : index
    %c0_2 = arith.constant 0 : index
    %1 = vector.load %arg2[%c0_1, %c0_2] : memref<3136x512xbf16, #tpu.memory_space<vmem>>, vector<3136x512xbf16>
    %cst = arith.constant dense<0.000000e+00> : vector<8x512xf32>
    %2 = tpu.matmul %0, %1, %cst {dimension_numbers = #tpu.dot_dimension_numbers<[1], [0], [0], [1], [0, 0, 1, 1], [], []>} : vector<8x3136xbf16>, vector<3136x512xbf16>, vector<8x512xf32> -> vector<8x512xf32>
    %c0_3 = arith.constant 0 : index
    %c0_4 = arith.constant 0 : index
    %3 = vector.load %arg3[%c0_3, %c0_4] : memref<1x512xf32, #tpu.memory_space<vmem>>, vector<1x512xf32>
    %4 = vector.broadcast %3 : vector<1x512xf32> to vector<8x512xf32>
    %5 = arith.addf %2, %4 : vector<8x512xf32>
    %cst_5 = arith.constant 0.000000e+00 : f32
    %6 = vector.broadcast %cst_5 : f32 to vector<8x512xf32>
    %7 = arith.maximumf %5, %6 : vector<8x512xf32>
    %8 = arith.truncf %7 : vector<8x512xf32> to vector<8x512xbf16>
    %c0_6 = arith.constant 0 : index
    %c0_7 = arith.constant 0 : index
    %9 = vector.load %arg4[%c0_6, %c0_7] : memref<512x128xbf16, #tpu.memory_space<vmem>>, vector<512x128xbf16>
    %cst_8 = arith.constant dense<0.000000e+00> : vector<8x128xf32>
    %10 = tpu.matmul %8, %9, %cst_8 {dimension_numbers = #tpu.dot_dimension_numbers<[1], [0], [0], [1], [0, 0, 1, 1], [], []>} : vector<8x512xbf16>, vector<512x128xbf16>, vector<8x128xf32> -> vector<8x128xf32>
    %c0_9 = arith.constant 0 : index
    %c0_10 = arith.constant 0 : index
    %11 = vector.load %arg5[%c0_9, %c0_10] : memref<1x128xf32, #tpu.memory_space<vmem>>, vector<1x128xf32>
    %12 = vector.broadcast %11 : vector<1x128xf32> to vector<8x128xf32>
    %13 = arith.addf %10, %12 : vector<8x128xf32>
    %c0_11 = arith.constant 0 : index
    %c0_12 = arith.constant 0 : index
    %14 = vector.load %arg6[%c0_11, %c0_12] : memref<8x128xf32, #tpu.memory_space<vmem>>, vector<8x128xf32>
    tpu.vector_store %arg6[%c0_11, %c0_12], %13 {strides = array<i32>} : memref<8x128xf32, #tpu.memory_space<vmem>>, vector<8x128xf32>,
    return
  }
  func.func @transform_0(%arg0: i32) -> (i32, i32) {
    %c0_i32 = arith.constant 0 : i32
    %c0_i32_0 = arith.constant 0 : i32
    return %arg0, %c0_i32 : i32, i32
  }
  func.func @transform_1(%arg0: i32) -> (i32, i32) {
    %c0_i32 = arith.constant 0 : i32
    %c0_i32_0 = arith.constant 0 : i32
    %c0_i32_1 = arith.constant 0 : i32
    return %c0_i32, %c0_i32_0 : i32, i32
  }
  func.func @transform_2(%arg0: i32) -> (i32, i32) {
    %c0_i32 = arith.constant 0 : i32
    %c0_i32_0 = arith.constant 0 : i32
    %c0_i32_1 = arith.constant 0 : i32
    return %c0_i32, %c0_i32_0 : i32, i32
  }
  func.func @transform_3(%arg0: i32) -> (i32, i32) {
    %c0_i32 = arith.constant 0 : i32
    %c0_i32_0 = arith.constant 0 : i32
    %c0_i32_1 = arith.constant 0 : i32
    return %c0_i32, %c0_i32_0 : i32, i32
  }
  func.func @transform_4(%arg0: i32) -> (i32, i32) {
    %c0_i32 = arith.constant 0 : i32
    %c0_i32_0 = arith.constant 0 : i32
    %c0_i32_1 = arith.constant 0 : i32
    return %c0_i32, %c0_i32_0 : i32, i32
  }
  func.func @transform_5(%arg0: i32) -> (i32, i32) {
    %c0_i32 = arith.constant 0 : i32
    %c0_i32_0 = arith.constant 0 : i32
    return %arg0, %c0_i32 : i32, i32
  }
}

</mosaic_0001>

<bundles_post_ra>
// kernel: cnn_forward.4
= control target key start
LH: loop header
LB: loop body
LE: loop exit
PB: predicated region body
PF: predicated region fallthrough
CT: control target
= control target key end

     0   :  { %s2026_s12 = smov 0   ;;  %s2424_s0 = inlined_call_operand.vmem [shape: bf16[2,420,128], index: 0, kind: input, shape index: {}]   ;;  %s2425_s1 = inlined_call_operand.vmem [shape: bf16[2,128,32], index: 1, kind: input, shape index: {}]   ;;  %s2426_s2 = inlined_call_operand.vmem [shape: f32[1,32], index: 2, kind: input, shape index: {}]   ;;  %s2427_s3 = inlined_call_operand.vmem [shape: bf16[2,400,32], index: 3, kind: output, shape index: {}]  }
   0x1 LB: > { %s1472_s13 = sadd.s32 4294967295, %s2002_s12   ;;  %p1476_p0 = scmp.ge.s32.totalorder %s2002_s12, 1  ;;  %s2002_s12 = sphi %s2026_s12, %s13_s12  }
   0x2   : > { %p137_p1 = scmp.lt.s32.totalorder %s2002_s12, 3 }
   0x4   : > { %p138_p2 = pnand %p1476_p0, %p137_p1 }
   0x5   : > { %v1952_v0 = vld [vmem:[%s2425_s1 + $0x40] sm:$0xff] (!%p138_p2)   ;;  %v2004_v1 = vmov (!%p138_p2), 0.0   ;;  %v1954_v3 = vld [vmem:[%s2425_s1 + $0x48] sm:$0xff] (!%p138_p2)   ;;  %vm2005_vm0 = vmmov (!%p138_p2), 0   ;;  %p161_p3 = scmp.lt.s32.totalorder (!%p138_p2), %s1472_s13, 1  ;;  %v1956_v5 = vld [vmem:[%s2425_s1 + $0x50] sm:$0xff] (!%p138_p2)  }
   0x6   : > { %141 = sbr.rel (%p138_p2) target bundleno = 454 (0x1c6), region = 32  ;;  %1708 = vmatprep.subr.bf16.mxu0 (!%p138_p2), %v2004_v1  ;;  %1824 = vmatprep.subr.bf16.mxu1 (!%p138_p2), %v2004_v1  ;;  %v1953_v2 = vld [vmem:[%s2425_s1] sm:$0xff] (!%p138_p2)   ;;  %v1955_v4 = vld [vmem:[%s2425_s1 + $0x8] sm:$0xff] (!%p138_p2)   ;;  %v1957_v6 = vld [vmem:[%s2425_s1 + $0x10] sm:$0xff] (!%p138_p2)   ;;  %vm387_vm1 = vcmask (!%p138_p2), 1045504   ;;  %vm1366_vm2 = vcmask (!%p138_p2), 257024  }
   0x7   : > { %1709 = vmatpush3.bf16.msra.mxu0 (!%p138_p2), %v1952_v0  ;;  %1724 = vmatprep.mubr.msk.bf16.mxu0 (!%p138_p2), %vm2005_vm0, %v2004_v1  ;;  %v1958_v7 = vld [vmem:[%s2425_s1 + $0x58] sm:$0xff] (!%p138_p2)   ;;  %v1960_v9 = vld [vmem:[%s2425_s1 + $0x60] sm:$0xff] (!%p138_p2)   ;;  %v1962_v11 = vld [vmem:[%s2425_s1 + $0x68] sm:$0xff] (!%p138_p2)  }
   0x8   : > { %1825 = vmatpush3.bf16.msra.mxu1 (!%p138_p2), %v1953_v2  ;;  %1710 = vmatprep.subr.bf16.mxu0 (!%p138_p2), %v2004_v1  ;;  %v1959_v8 = vld [vmem:[%s2425_s1 + $0x18] sm:$0xff] (!%p138_p2)   ;;  %v1961_v10 = vld [vmem:[%s2425_s1 + $0x20] sm:$0xff] (!%p138_p2)   ;;  %v1963_v12 = vld [vmem:[%s2425_s1 + $0x28] sm:$0xff] (!%p138_p2)  }
   0x9   : > { %1826 = vmatprep.subr.bf16.mxu1 (!%p138_p2), %v2004_v1  ;;  %1840 = vmatprep.mubr.msk.bf16.mxu1 (!%p138_p2), %vm2005_vm0, %v2004_v1  ;;  %v1964_v15 = vld [vmem:[%s2425_s1 + $0x70] sm:$0xff] (!%p138_p2)   ;;  %v1966_v19 = vld [vmem:[%s2425_s1 + $0x78] sm:$0xff] (!%p138_p2)  }
   0xa   : > { %v1965_v18 = vld [vmem:[%s2425_s1 + $0x30] sm:$0xff] (!%p138_p2)   ;;  %v1967_v22 = vld [vmem:[%s2425_s1 + $0x38] sm:$0xff] (!%p138_p2)  }
   0xb   : > { %1711 = vmatpush3.bf16.msra.mxu0 (!%p138_p2), %v1954_v3 }
   0xc   : > { %1827 = vmatpush3.bf16.msra.mxu1 (!%p138_p2), %v1955_v4  ;;  %1712 = vmatprep.subr.bf16.mxu0 (!%p138_p2), %v2004_v1 }
   0xd   : > { %s2429_s13 = smov (!%p161_p3, %s1472_s13), 1  ;;  %1828 = vmatprep.subr.bf16.mxu1 %v2004_v1 }
   0xe   : > { %s1940_s30 = smul.u32 212, %s2429_s13 }
   0xf   : > { %1713 = vmatpush3.bf16.msra.mxu0 %v1956_v5  ;;  %s1941_s27 = smul.u32 200, %s2429_s13 }
  0x10   : > { %1829 = vmatpush3.bf16.msra.mxu1 %v1957_v6  ;;  %1714 = vmatprep.subr.bf16.mxu0 %v2004_v1  ;;  %s2083_s10 = scalar_lea.vmem %s2424_s0, %s1940_s30 }
  0x11   : > { %1830 = vmatprep.subr.bf16.mxu1 %v2004_v1  ;;  %v175_v13 = vld [vmem:[%s2083_s10 + $0xc] sm:$0xf]  ;;  %v238_v14 = vld [vmem:[%s2083_s10 + $0x8] sm:$0xc]  ;;  %v1969_v17 = vld [vmem:[%s2083_s10 + $0x10] sm:$0xff]   ;;  %s2271_s30 = scalar_lea.vmem %s2427_s3, %s1941_s27 }
  0x12   : > { %v1495_v16 = vcombine.low %v238_v14, %v175_v13  ;;  %v389_v21 = vrot.slane %v1969_v17, 2  ;;  %v1970_v23 = vld [vmem:[%s2083_s10] sm:$0xff]   ;;  %v1971_v25 = vld [vmem:[%s2083_s10 + $0x18] sm:$0xff]   ;;  %v174_v27 = vld [vmem:[%s2083_s10 + $0x8] sm:$0xf] }
  0x13   : > { %1715 = vmatpush3.bf16.msra.mxu0 %v1958_v7  ;;  %v391_v26 = vrot.slane %v1971_v25, 2  ;;  %v1973_v28 = vld [vmem:[%s2083_s10 + $0x20] sm:$0xff]   ;;  %v1530_v30 = vcombine.low %v174_v27, %v175_v13  ;;  %v1974_v33 = vld [vmem:[%s2083_s10 + $0x28] sm:$0xff]   ;;  %v1975_v36 = vld [vmem:[%s2083_s10 + $0x30] sm:$0xff]  }
  0x14   : > { %1831 = vmatpush3.bf16.msra.mxu1 %v1959_v8  ;;  %1716 = vmatprep.subr.bf16.mxu0 %v2004_v1  ;;  %v388_v20 = vrot.slane %v1495_v16, 2  ;;  %v393_v31 = vrot.slane %v1973_v28, 2  ;;  %v395_v34 = vrot.slane %v1974_v33, 2  ;;  %v397_v37 = vrot.slane %v1975_v36, 2  ;;  %v1976_v39 = vld [vmem:[%s2083_s10 + $0x38] sm:$0xff]   ;;  %v1977_v42 = vld [vmem:[%s2083_s10 + $0x40] sm:$0xff]  }
  0x15   : > { %1832 = vmatprep.subr.bf16.mxu1 %v2004_v1  ;;  %v392_v29 = vsel %vm387_vm1, %v389_v21, %v391_v26  ;;  %v399_v40 = vrot.slane %v1976_v39, 2  ;;  %v401_v43 = vrot.slane %v1977_v42, 2  ;;  %v1978_v45 = vld [vmem:[%s2083_s10 + $0x48] sm:$0xff]   ;;  %v1979_v48 = vld [vmem:[%s2083_s10 + $0x50] sm:$0xff]   ;;  %v1980_v51 = vld [vmem:[%s2083_s10 + $0x58] sm:$0xff]  }
  0x16   : > { %v390_v24 = vsel %vm387_vm1, %v388_v20, %v389_v21  ;;  %v394_v32 = vsel %vm387_vm1, %v391_v26, %v393_v31  ;;  %v396_v35 = vsel %vm387_vm1, %v393_v31, %v395_v34  ;;  %v398_v38 = vsel %vm387_vm1, %v395_v34, %v397_v37  ;;  %v1981_v54 = vld [vmem:[%s2083_s10 + $0x60] sm:$0xff]   ;;  %v1982_v57 = vld [vmem:[%s2083_s10 + $0x68] sm:$0xff]   ;;  %v1983_v60 = vld [vmem:[%s2083_s10 + $0x70] sm:$0xff]  }
  0x17   : > { %1717 = vmatpush3.bf16.msra.mxu0 %v1960_v9  ;;  %v400_v41 = vsel %vm387_vm1, %v397_v37, %v399_v40  ;;  %v402_v44 = vsel %vm387_vm1, %v399_v40, %v401_v43  ;;  %v403_v46 = vrot.slane %v1978_v45, 2  ;;  %v405_v49 = vrot.slane %v1979_v48, 2  ;;  %v1984_v63 = vld [vmem:[%s2083_s10 + $0x78] sm:$0xff]   ;;  %v1985_v3 = vld [vmem:[%s2083_s10 + $0x80] sm:$0xff]   ;;  %v1986_v6 = vld [vmem:[%s2083_s10 + $0x88] sm:$0xff]  }
  0x18   : > { %1833 = vmatpush3.bf16.msra.mxu1 %v1961_v10  ;;  %1718 = vmatprep.subr.bf16.mxu0 %v2004_v1  ;;  %v407_v52 = vrot.slane %v1980_v51, 2  ;;  %v409_v55 = vrot.slane %v1981_v54, 2  ;;  %v411_v58 = vrot.slane %v1982_v57, 2  ;;  %v413_v61 = vrot.slane %v1983_v60, 2  ;;  %v1987_v9 = vld [vmem:[%s2083_s10 + $0x90] sm:$0xff]   ;;  %v1993_v27 = vld [vmem:[%s2083_s10 + $0xc0] sm:$0xff]  }
  0x19   : > { %1834 = vmatprep.subr.bf16.mxu1 %v2004_v1  ;;  %v404_v47 = vsel %vm387_vm1, %v401_v43, %v403_v46  ;;  %v406_v50 = vsel %vm387_vm1, %v403_v46, %v405_v49  ;;  %v415_v0 = vrot.slane %v1984_v63, 2  ;;  %v417_v4 = vrot.slane %v1985_v3, 2  ;;  %v1991_v21 = vld [vmem:[%s2083_s10 + $0xb0] sm:$0xff]  }
  0x1a   : > { %v408_v53 = vsel %vm387_vm1, %v405_v49, %v407_v52  ;;  %v410_v56 = vsel %vm387_vm1, %v407_v52, %v409_v55  ;;  %v412_v59 = vsel %vm387_vm1, %v409_v55, %v411_v58  ;;  %v414_v62 = vsel %vm387_vm1, %v411_v58, %v413_v61 }
  0x1b   : > { %1719 = vmatpush3.bf16.msra.mxu0 %v1962_v11  ;;  %v416_v2 = vsel %vm387_vm1, %v413_v61, %v415_v0  ;;  %v418_v5 = vsel %vm387_vm1, %v415_v0, %v417_v4  ;;  %v419_v7 = vrot.slane %v1986_v6, 2  ;;  %v421_v10 = vrot.slane %v1987_v9, 2 }
  0x1c   : > { %1835 = vmatpush3.bf16.msra.mxu1 %v1963_v12  ;;  %1720 = vmatprep.subr.bf16.mxu0 %v2004_v1  ;;  %v1988_v12 = vld [vmem:[%s2083_s10 + $0x98] sm:$0xff]  }
  0x1d   : > { %1836 = vmatprep.subr.bf16.mxu1 %v2004_v1  ;;  %v420_v8 = vsel %vm387_vm1, %v417_v4, %v419_v7  ;;  %v422_v11 = vsel %vm387_vm1, %v419_v7, %v421_v10  ;;  %v423_v13 = vrot.slane %v1988_v12, 2 }
  0x1f   : > { %1721 = vmatpush3.bf16.msra.mxu0 %v1964_v15  ;;  %v424_v14 = vsel %vm387_vm1, %v421_v10, %v423_v13  ;;  %v1989_v15 = vld [vmem:[%s2083_s10 + $0xa0] sm:$0xff]  }
  0x20   : > { %1837 = vmatpush3.bf16.msra.mxu1 %v1965_v18  ;;  %1722 = vmatprep.subr.bf16.mxu0 %v2004_v1  ;;  %v425_v16 = vrot.slane %v1989_v15, 2  ;;  %v1990_v18 = vld [vmem:[%s2083_s10 + $0xa8] sm:$0xff]  }
  0x21   : > { %1838 = vmatprep.subr.bf16.mxu1 %v2004_v1 }
  0x23   : > { %1723 = vmatpush3.bf16.msra.mxu0 %v1966_v19  ;;  %v427_v19 = vrot.slane %v1990_v18, 2 }
  0x24   : > { %1839 = vmatpush3.bf16.msra.mxu1 %v1967_v22  ;;  %v429_v22 = vrot.slane %v1991_v21, 2 }
  0x25   : > { %v428_v20 = vsel %vm387_vm1, %v425_v16, %v427_v19 }
  0x26   : > { %1725 = vmatmul.mubr.bf16.vlgmr.msra.gmra.mrb[0].mxu0 %v390_v24  ;;  %v1992_v24 = vld [vmem:[%s2083_s10 + $0xb8] sm:$0xff]  }
  0x27   : > { %1841 = vmatmul.mubr.bf16.vlgmr.msra.gmra.mrb[0].mxu1 %v1970_v23  ;;  %1728 = vmatprep.mubr.msk.bf16.mxu0 %vm2005_vm0, %v2004_v1  ;;  %v430_v23 = vsel %vm387_vm1, %v427_v19, %v429_v22 }
  0x28   : > { %1844 = vmatprep.mubr.msk.bf16.mxu1 %vm2005_vm0, %v2004_v1 }
  0x2e   : > { %1729 = vmatmul.mubr.bf16.gmra.mrb[4].mxu0 %v392_v29 }
  0x2f   : > { %1845 = vmatmul.mubr.bf16.gmra.mrb[4].mxu1 %v1530_v30  ;;  %1732 = vmatprep.mubr.msk.bf16.mxu0 %vm2005_vm0, %v2004_v1  ;;  %v1994_v30 = vld [vmem:[%s2083_s10 + $0xc8] sm:$0xff]  }
  0x30   : > { %1848 = vmatprep.mubr.msk.bf16.mxu1 %vm2005_vm0, %v2004_v1  ;;  %v435_v31 = vrot.slane %v1994_v30, 2 }
  0x36   : > { %1733 = vmatmul.mubr.bf16.gmra.mrb[8].mxu0 %v394_v32 }
  0x37   : > { %1849 = vmatmul.mubr.bf16.gmra.mrb[8].mxu1 %v1969_v17  ;;  %1736 = vmatprep.mubr.msk.bf16.mxu0 %vm2005_vm0, %v2004_v1  ;;  %v426_v17 = vsel %vm387_vm1, %v423_v13, %v425_v16 }
  0x38   : > { %1852 = vmatprep.mubr.msk.bf16.mxu1 %vm2005_vm0, %v2004_v1 }
  0x3e   : > { %1737 = vmatmul.mubr.bf16.gmra.mrb[12].mxu0 %v396_v35 }
  0x3f   : > { %1853 = vmatmul.mubr.bf16.gmra.mrb[12].mxu1 %v1971_v25  ;;  %1740 = vmatprep.mubr.msk.bf16.mxu0 %vm2005_vm0, %v2004_v1  ;;  %v431_v25 = vrot.slane %v1992_v24, 2 }
  0x40   : > { %1856 = vmatprep.mubr.msk.bf16.mxu1 %vm2005_vm0, %v2004_v1 }
  0x41   : > { %v432_v26 = vsel %vm387_vm1, %v429_v22, %v431_v25 }
  0x46   : > { %1741 = vmatmul.mubr.bf16.gmra.mrb[16].mxu0 %v398_v38  ;;  %v2263_v38 = vld [vmem:[%s2426_s2] ss:$0 sm:$0xff] }
  0x47   : > { %1857 = vmatmul.mubr.bf16.gmra.mrb[16].mxu1 %v1973_v28  ;;  %1744 = vmatprep.mubr.msk.bf16.mxu0 %vm2005_vm0, %v2004_v1  ;;  %v433_v28 = vrot.slane %v1993_v27, 2 }
  0x48   : > { %1860 = vmatprep.mubr.msk.bf16.mxu1 %vm2005_vm0, %v2004_v1 }
  0x49   : > { %v434_v29 = vsel %vm387_vm1, %v431_v25, %v433_v28  ;;  %v436_v32 = vsel %vm387_vm1, %v433_v28, %v435_v31 }
  0x4e   : > { %1745 = vmatmul.mubr.bf16.gmra.mrb[20].mxu0 %v400_v41 }
  0x4f   : > { %1861 = vmatmul.mubr.bf16.gmra.mrb[20].mxu1 %v1974_v33  ;;  %1748 = vmatprep.mubr.msk.bf16.mxu0 %vm2005_vm0, %v2004_v1  ;;  %v1995_v33 = vld [vmem:[%s2083_s10 + $0xd0] ss:$0 sps:$4 sm:$0x33]  }
  0x50   : > { %1864 = vmatprep.mubr.msk.bf16.mxu1 %vm2005_vm0, %v2004_v1  ;;  %v437_v34 = vrot.slane %v1995_v33, 2 }
  0x52   : > { %v438_v35 = vsel %vm387_vm1, %v435_v31, %v437_v34 }
  0x56   : > { %1749 = vmatmul.mubr.bf16.gmra.mrb[24].mxu0 %v402_v44 }
  0x57   : > { %1865 = vmatmul.mubr.bf16.gmra.mrb[24].mxu1 %v1975_v36  ;;  %1752 = vmatprep.mubr.msk.bf16.mxu0 %vm2005_vm0, %v2004_v1 }
  0x58   : > { %1868 = vmatprep.mubr.msk.bf16.mxu1 %vm2005_vm0, %v2004_v1 }
  0x5e   : > { %1753 = vmatmul.mubr.bf16.gmra.mrb[28].mxu0 %v404_v47 }
  0x5f   : > { %1869 = vmatmul.mubr.bf16.gmra.mrb[28].mxu1 %v1976_v39  ;;  %1756 = vmatprep.mubr.msk.bf16.mxu0 %vm2005_vm0, %v2004_v1 }
  0x60   : > { %1872 = vmatprep.mubr.msk.bf16.mxu1 %vm2005_vm0, %v2004_v1 }
  0x66   : > { %1757 = vmatmul.mubr.bf16.gmra.mrb[32].mxu0 %v406_v50 }
  0x67   : > { %1873 = vmatmul.mubr.bf16.gmra.mrb[32].mxu1 %v1977_v42  ;;  %1760 = vmatprep.mubr.msk.bf16.mxu0 %vm2005_vm0, %v2004_v1 }
  0x68   : > { %1876 = vmatprep.mubr.msk.bf16.mxu1 %vm2005_vm0, %v2004_v1 }
  0x6e   : > { %1761 = vmatmul.mubr.bf16.gmra.mrb[36].mxu0 %v408_v53 }
  0x6f   : > { %1877 = vmatmul.mubr.bf16.gmra.mrb[36].mxu1 %v1978_v45  ;;  %1764 = vmatprep.mubr.msk.bf16.mxu0 %vm2005_vm0, %v2004_v1 }
  0x70   : > { %1880 = vmatprep.mubr.msk.bf16.mxu1 %vm2005_vm0, %v2004_v1 }
  0x76   : > { %1765 = vmatmul.mubr.bf16.gmra.mrb[40].mxu0 %v410_v56 }
  0x77   : > { %1881 = vmatmul.mubr.bf16.gmra.mrb[40].mxu1 %v1979_v48  ;;  %1768 = vmatprep.mubr.msk.bf16.mxu0 %vm2005_vm0, %v2004_v1 }
  0x78   : > { %1884 = vmatprep.mubr.msk.bf16.mxu1 %vm2005_vm0, %v2004_v1 }
  0x7e   : > { %1769 = vmatmul.mubr.bf16.gmra.mrb[44].mxu0 %v412_v59 }
  0x7f   : > { %1885 = vmatmul.mubr.bf16.gmra.mrb[44].mxu1 %v1980_v51  ;;  %1772 = vmatprep.mubr.msk.bf16.mxu0 %vm2005_vm0, %v2004_v1 }
  0x80   : > { %1888 = vmatprep.mubr.msk.bf16.mxu1 %vm2005_vm0, %v2004_v1 }
  0x86   : > { %1773 = vmatmul.mubr.bf16.gmra.mrb[48].mxu0 %v414_v62 }
  0x87   : > { %1889 = vmatmul.mubr.bf16.gmra.mrb[48].mxu1 %v1981_v54  ;;  %1776 = vmatprep.mubr.msk.bf16.mxu0 %vm2005_vm0, %v2004_v1 }
  0x88   : > { %1892 = vmatprep.mubr.msk.bf16.mxu1 %vm2005_vm0, %v2004_v1 }
  0x8e   : > { %1777 = vmatmul.mubr.bf16.gmra.mrb[52].mxu0 %v416_v2 }
  0x8f   : > { %1893 = vmatmul.mubr.bf16.gmra.mrb[52].mxu1 %v1982_v57  ;;  %1780 = vmatprep.mubr.msk.bf16.mxu0 %vm2005_vm0, %v2004_v1 }
  0x90   : > { %1896 = vmatprep.mubr.msk.bf16.mxu1 %vm2005_vm0, %v2004_v1 }
  0x96   : > { %1781 = vmatmul.mubr.bf16.gmra.mrb[56].mxu0 %v418_v5 }
  0x97   : > { %1897 = vmatmul.mubr.bf16.gmra.mrb[56].mxu1 %v1983_v60  ;;  %1784 = vmatprep.mubr.msk.bf16.mxu0 %vm2005_vm0, %v2004_v1 }
  0x98   : > { %1900 = vmatprep.mubr.msk.bf16.mxu1 %vm2005_vm0, %v2004_v1 }
  0x9e   : > { %1785 = vmatmul.mubr.bf16.gmra.mrb[60].mxu0 %v420_v8 }
  0x9f   : > { %1901 = vmatmul.mubr.bf16.gmra.mrb[60].mxu1 %v1984_v63  ;;  %1788 = vmatprep.mubr.msk.bf16.mxu0 %vm2005_vm0, %v2004_v1 }
  0xa0   : > { %1904 = vmatprep.mubr.msk.bf16.mxu1 %vm2005_vm0, %v2004_v1 }
  0xa6   : > { %1789 = vmatmul.mubr.bf16.gmra.mrb[64].mxu0 %v422_v11 }
  0xa7   : > { %1905 = vmatmul.mubr.bf16.gmra.mrb[64].mxu1 %v1985_v3  ;;  %1792 = vmatprep.mubr.msk.bf16.mxu0 %vm2005_vm0, %v2004_v1 }
  0xa8   : > { %1908 = vmatprep.mubr.msk.bf16.mxu1 %vm2005_vm0, %v2004_v1 }
  0xae   : > { %1793 = vmatmul.mubr.bf16.gmra.mrb[68].mxu0 %v424_v14 }
  0xaf   : > { %1909 = vmatmul.mubr.bf16.gmra.mrb[68].mxu1 %v1986_v6  ;;  %1796 = vmatprep.mubr.msk.bf16.mxu0 %vm2005_vm0, %v2004_v1 }
  0xb0   : > { %1912 = vmatprep.mubr.msk.bf16.mxu1 %vm2005_vm0, %v2004_v1 }
  0xb6   : > { %1797 = vmatmul.mubr.bf16.gmra.mrb[72].mxu0 %v426_v17 }
  0xb7   : > { %1913 = vmatmul.mubr.bf16.gmra.mrb[72].mxu1 %v1987_v9  ;;  %1800 = vmatprep.mubr.msk.bf16.mxu0 %vm2005_vm0, %v2004_v1 }
  0xb8   : > { %1916 = vmatprep.mubr.msk.bf16.mxu1 %vm2005_vm0, %v2004_v1 }
  0xbe   : > { %1801 = vmatmul.mubr.bf16.gmra.mrb[76].mxu0 %v428_v20 }
  0xbf   : > { %1917 = vmatmul.mubr.bf16.gmra.mrb[76].mxu1 %v1988_v12  ;;  %1804 = vmatprep.mubr.msk.bf16.mxu0 %vm2005_vm0, %v2004_v1 }
  0xc0   : > { %1920 = vmatprep.mubr.msk.bf16.mxu1 %vm2005_vm0, %v2004_v1 }
  0xc6   : > { %1805 = vmatmul.mubr.bf16.gmra.mrb[80].mxu0 %v430_v23 }
  0xc7   : > { %1921 = vmatmul.mubr.bf16.gmra.mrb[80].mxu1 %v1989_v15  ;;  %1808 = vmatprep.mubr.msk.bf16.mxu0 %vm2005_vm0, %v2004_v1 }
  0xc8   : > { %1924 = vmatprep.mubr.msk.bf16.mxu1 %vm2005_vm0, %v2004_v1 }
  0xce   : > { %1809 = vmatmul.mubr.bf16.gmra.mrb[84].mxu0 %v432_v26 }
  0xcf   : > { %1925 = vmatmul.mubr.bf16.gmra.mrb[84].mxu1 %v1990_v18  ;;  %1812 = vmatprep.mubr.msk.bf16.mxu0 %vm2005_vm0, %v2004_v1 }
  0xd0   : > { %1928 = vmatprep.mubr.msk.bf16.mxu1 %vm2005_vm0, %v2004_v1 }
  0xd6   : > { %1813 = vmatmul.mubr.bf16.gmra.mrb[88].mxu0 %v434_v29 }
  0xd7   : > { %1929 = vmatmul.mubr.bf16.gmra.mrb[88].mxu1 %v1991_v21  ;;  %1816 = vmatprep.mubr.msk.bf16.mxu0 %vm2005_vm0, %v2004_v1 }
  0xd8   : > { %1932 = vmatprep.mubr.msk.bf16.mxu1 %vm2005_vm0, %v2004_v1 }
  0xde   : > { %1817 = vmatmul.mubr.bf16.gmra.mrb[92].mxu0 %v436_v32 }
  0xdf   : > { %1933 = vmatmul.mubr.bf16.gmra.mrb[92].mxu1 %v1992_v24  ;;  %1820 = vmatprep.mubr.msk.bf16.mxu0 %vm2005_vm0, %v2004_v1 }
  0xe0   : > { %1936 = vmatprep.mubr.msk.bf16.mxu1 %vm2005_vm0, %v2004_v1 }
  0xe6   : > { %1821 = vmatmul.mubr.bf16.gmra.mrb[96].mxu0 %v438_v35 }
  0xe7   : > { %1937 = vmatmul.mubr.bf16.gmra.mrb[96].mxu1 %v1993_v27 }
  0xf9   : > { %v546_v36 = vpop.f32.mrb[0].mxu0 }
  0xfa   : > { %v860_v37 = vpop.f32.mrb[0].mxu1  ;;  %v1726_v39 = vpop.f32.mrb[1].mxu0 }
  0xfb   : > { %v861_v40 = vadd.f32 %v860_v37, %v546_v36  ;;  %v1842_v41 = vpop.f32.mrb[1].mxu1  ;;  %v549_v42 = vpop.f32.mrb[2].mxu0 }
  0xfc   : > { %v863_v43 = vpop.f32.mrb[2].mxu1  ;;  %v1727_v44 = vpop.f32.mrb[3].mxu0 }
  0xfd   : > { %v1066_v1 = vadd.f32 %v2263_v38, %v861_v40  ;;  %v864_v45 = vadd.f32 %v863_v43, %v549_v42  ;;  %v1843_v46 = vpop.f32.mrb[3].mxu1 }
  0xff   : > { %v1116_v47 = vmax.f32 %v1066_v1, 0.0  ;;  %v1067_v48 = vadd.f32 %v2263_v38, %v864_v45 }
 0x101   : > { %v1592_v49 = vpack.c.bf16 %v1116_v47, %v1116_v47  ;;  %v1117_v50 = vmax.f32 %v1067_v48, 0.0  ;;  %v554_v51 = vpop.f32.mrb[4].mxu0 }
 0x102   : > { %v868_v52 = vpop.f32.mrb[4].mxu1  ;;  %v1730_v53 = vpop.f32.mrb[5].mxu0 }
 0x103   : > { %1367 = vst.msk [vmem:[%s2271_s30] sm:$0xf] %vm1366_vm2, %v1592_v49  ;;  %v1593_v54 = vpack.c.bf16 %v1117_v50, %v1117_v50  ;;  %v869_v55 = vadd.f32 %v868_v52, %v554_v51  ;;  %v1846_v56 = vpop.f32.mrb[5].mxu1  ;;  %v557_v57 = vpop.f32.mrb[6].mxu0 }
 0x104   : > { %v871_v58 = vpop.f32.mrb[6].mxu1  ;;  %v1731_v59 = vpop.f32.mrb[7].mxu0 }
 0x105   : > { %1368 = vst.msk [vmem:[%s2271_s30 + $0x4] sm:$0xf] %vm1366_vm2, %v1593_v54  ;;  %v1068_v60 = vadd.f32 %v2263_v38, %v869_v55  ;;  %v872_v61 = vadd.f32 %v871_v58, %v557_v57  ;;  %v1847_v62 = vpop.f32.mrb[7].mxu1 }
 0x107   : > { %v1118_v63 = vmax.f32 %v1068_v60, 0.0  ;;  %v1069_v0 = vadd.f32 %v2263_v38, %v872_v61 }
 0x109   : > { %v1594_v2 = vpack.c.bf16 %v1118_v63, %v1118_v63  ;;  %v1119_v3 = vmax.f32 %v1069_v0, 0.0  ;;  %v562_v4 = vpop.f32.mrb[8].mxu0 }
 0x10a   : > { %v876_v5 = vpop.f32.mrb[8].mxu1  ;;  %v1734_v6 = vpop.f32.mrb[9].mxu0 }
 0x10b   : > { %1369 = vst.msk [vmem:[%s2271_s30 + $0x8] sm:$0xf] %vm1366_vm2, %v1594_v2  ;;  %v1595_v7 = vpack.c.bf16 %v1119_v3, %v1119_v3  ;;  %v877_v8 = vadd.f32 %v876_v5, %v562_v4  ;;  %v1850_v9 = vpop.f32.mrb[9].mxu1  ;;  %v565_v10 = vpop.f32.mrb[10].mxu0 }
 0x10c   : > { %v879_v11 = vpop.f32.mrb[10].mxu1  ;;  %v1735_v12 = vpop.f32.mrb[11].mxu0 }
 0x10d   : > { %1370 = vst.msk [vmem:[%s2271_s30 + $0xc] sm:$0xf] %vm1366_vm2, %v1595_v7  ;;  %v1070_v13 = vadd.f32 %v2263_v38, %v877_v8  ;;  %v880_v14 = vadd.f32 %v879_v11, %v565_v10  ;;  %v1851_v15 = vpop.f32.mrb[11].mxu1 }
 0x10f   : > { %v1120_v16 = vmax.f32 %v1070_v13, 0.0  ;;  %v1071_v17 = vadd.f32 %v2263_v38, %v880_v14 }
 0x111   : > { %v1596_v18 = vpack.c.bf16 %v1120_v16, %v1120_v16  ;;  %v1121_v19 = vmax.f32 %v1071_v17, 0.0  ;;  %v570_v20 = vpop.f32.mrb[12].mxu0 }
 0x112   : > { %v884_v21 = vpop.f32.mrb[12].mxu1  ;;  %v1738_v22 = vpop.f32.mrb[13].mxu0 }
 0x113   : > { %1371 = vst.msk [vmem:[%s2271_s30 + $0x10] sm:$0xf] %vm1366_vm2, %v1596_v18  ;;  %v1597_v23 = vpack.c.bf16 %v1121_v19, %v1121_v19  ;;  %v885_v24 = vadd.f32 %v884_v21, %v570_v20  ;;  %v1854_v25 = vpop.f32.mrb[13].mxu1  ;;  %v573_v26 = vpop.f32.mrb[14].mxu0 }
 0x114   : > { %v887_v27 = vpop.f32.mrb[14].mxu1  ;;  %v1739_v28 = vpop.f32.mrb[15].mxu0 }
 0x115   : > { %1372 = vst.msk [vmem:[%s2271_s30 + $0x14] sm:$0xf] %vm1366_vm2, %v1597_v23  ;;  %v1072_v29 = vadd.f32 %v2263_v38, %v885_v24  ;;  %v888_v30 = vadd.f32 %v887_v27, %v573_v26  ;;  %v1855_v31 = vpop.f32.mrb[15].mxu1 }
 0x117   : > { %v1122_v32 = vmax.f32 %v1072_v29, 0.0  ;;  %v1073_v33 = vadd.f32 %v2263_v38, %v888_v30 }
 0x119   : > { %v1598_v34 = vpack.c.bf16 %v1122_v32, %v1122_v32  ;;  %v1123_v35 = vmax.f32 %v1073_v33, 0.0  ;;  %v578_v36 = vpop.f32.mrb[16].mxu0 }
 0x11a   : > { %v892_v37 = vpop.f32.mrb[16].mxu1  ;;  %v1742_v39 = vpop.f32.mrb[17].mxu0 }
 0x11b   : > { %1373 = vst.msk [vmem:[%s2271_s30 + $0x18] sm:$0xf] %vm1366_vm2, %v1598_v34  ;;  %v1599_v40 = vpack.c.bf16 %v1123_v35, %v1123_v35  ;;  %v893_v41 = vadd.f32 %v892_v37, %v578_v36  ;;  %v1858_v42 = vpop.f32.mrb[17].mxu1  ;;  %v581_v43 = vpop.f32.mrb[18].mxu0 }
 0x11c   : > { %v895_v44 = vpop.f32.mrb[18].mxu1  ;;  %v1743_v1 = vpop.f32.mrb[19].mxu0 }
 0x11d   : > { %1374 = vst.msk [vmem:[%s2271_s30 + $0x1c] sm:$0xf] %vm1366_vm2, %v1599_v40  ;;  %v1074_v45 = vadd.f32 %v2263_v38, %v893_v41  ;;  %v896_v46 = vadd.f32 %v895_v44, %v581_v43  ;;  %v1859_v47 = vpop.f32.mrb[19].mxu1 }
 0x11f   : > { %v1124_v48 = vmax.f32 %v1074_v45, 0.0  ;;  %v1075_v49 = vadd.f32 %v2263_v38, %v896_v46 }
 0x121   : > { %v1600_v50 = vpack.c.bf16 %v1124_v48, %v1124_v48  ;;  %v1125_v51 = vmax.f32 %v1075_v49, 0.0  ;;  %v586_v52 = vpop.f32.mrb[20].mxu0 }
 0x122   : > { %v900_v53 = vpop.f32.mrb[20].mxu1  ;;  %v1746_v54 = vpop.f32.mrb[21].mxu0 }
 0x123   : > { %1375 = vst.msk [vmem:[%s2271_s30 + $0x20] sm:$0xf] %vm1366_vm2, %v1600_v50  ;;  %v1601_v55 = vpack.c.bf16 %v1125_v51, %v1125_v51  ;;  %v901_v56 = vadd.f32 %v900_v53, %v586_v52  ;;  %v1862_v57 = vpop.f32.mrb[21].mxu1  ;;  %v589_v58 = vpop.f32.mrb[22].mxu0 }
 0x124   : > { %v903_v59 = vpop.f32.mrb[22].mxu1  ;;  %v1747_v60 = vpop.f32.mrb[23].mxu0 }
 0x125   : > { %1376 = vst.msk [vmem:[%s2271_s30 + $0x24] sm:$0xf] %vm1366_vm2, %v1601_v55  ;;  %v1076_v61 = vadd.f32 %v2263_v38, %v901_v56  ;;  %v904_v62 = vadd.f32 %v903_v59, %v589_v58  ;;  %v1863_v63 = vpop.f32.mrb[23].mxu1 }
 0x127   : > { %v1126_v0 = vmax.f32 %v1076_v61, 0.0  ;;  %v1077_v2 = vadd.f32 %v2263_v38, %v904_v62 }
 0x129   : > { %v1602_v3 = vpack.c.bf16 %v1126_v0, %v1126_v0  ;;  %v1127_v4 = vmax.f32 %v1077_v2, 0.0  ;;  %v594_v5 = vpop.f32.mrb[24].mxu0 }
 0x12a   : > { %v908_v6 = vpop.f32.mrb[24].mxu1  ;;  %v1750_v7 = vpop.f32.mrb[25].mxu0 }
 0x12b   : > { %1377 = vst.msk [vmem:[%s2271_s30 + $0x28] sm:$0xf] %vm1366_vm2, %v1602_v3  ;;  %v1603_v8 = vpack.c.bf16 %v1127_v4, %v1127_v4  ;;  %v909_v9 = vadd.f32 %v908_v6, %v594_v5  ;;  %v1866_v10 = vpop.f32.mrb[25].mxu1  ;;  %v597_v11 = vpop.f32.mrb[26].mxu0 }
 0x12c   : > { %v911_v12 = vpop.f32.mrb[26].mxu1  ;;  %v1751_v13 = vpop.f32.mrb[27].mxu0 }
 0x12d   : > { %1378 = vst.msk [vmem:[%s2271_s30 + $0x2c] sm:$0xf] %vm1366_vm2, %v1603_v8  ;;  %v1078_v14 = vadd.f32 %v2263_v38, %v909_v9  ;;  %v912_v15 = vadd.f32 %v911_v12, %v597_v11  ;;  %v1867_v16 = vpop.f32.mrb[27].mxu1 }
 0x12f   : > { %v1128_v17 = vmax.f32 %v1078_v14, 0.0  ;;  %v1079_v18 = vadd.f32 %v2263_v38, %v912_v15 }
 0x131   : > { %v1604_v19 = vpack.c.bf16 %v1128_v17, %v1128_v17  ;;  %v1129_v20 = vmax.f32 %v1079_v18, 0.0  ;;  %v602_v21 = vpop.f32.mrb[28].mxu0 }
 0x132   : > { %v916_v22 = vpop.f32.mrb[28].mxu1  ;;  %v1754_v23 = vpop.f32.mrb[29].mxu0 }
 0x133   : > { %1379 = vst.msk [vmem:[%s2271_s30 + $0x30] sm:$0xf] %vm1366_vm2, %v1604_v19  ;;  %v1605_v24 = vpack.c.bf16 %v1129_v20, %v1129_v20  ;;  %v917_v25 = vadd.f32 %v916_v22, %v602_v21  ;;  %v1870_v26 = vpop.f32.mrb[29].mxu1  ;;  %v605_v27 = vpop.f32.mrb[30].mxu0 }
 0x134   : > { %v919_v28 = vpop.f32.mrb[30].mxu1  ;;  %v1755_v29 = vpop.f32.mrb[31].mxu0 }
 0x135   : > { %1380 = vst.msk [vmem:[%s2271_s30 + $0x34] sm:$0xf] %vm1366_vm2, %v1605_v24  ;;  %v1080_v30 = vadd.f32 %v2263_v38, %v917_v25  ;;  %v920_v31 = vadd.f32 %v919_v28, %v605_v27  ;;  %v1871_v32 = vpop.f32.mrb[31].mxu1 }
 0x137   : > { %v1130_v33 = vmax.f32 %v1080_v30, 0.0  ;;  %v1081_v34 = vadd.f32 %v2263_v38, %v920_v31 }
 0x139   : > { %v1606_v35 = vpack.c.bf16 %v1130_v33, %v1130_v33  ;;  %v1131_v36 = vmax.f32 %v1081_v34, 0.0  ;;  %v610_v37 = vpop.f32.mrb[32].mxu0 }
 0x13a   : > { %v924_v39 = vpop.f32.mrb[32].mxu1  ;;  %v1758_v40 = vpop.f32.mrb[33].mxu0 }
 0x13b   : > { %1381 = vst.msk [vmem:[%s2271_s30 + $0x38] sm:$0xf] %vm1366_vm2, %v1606_v35  ;;  %v1607_v41 = vpack.c.bf16 %v1131_v36, %v1131_v36  ;;  %v925_v42 = vadd.f32 %v924_v39, %v610_v37  ;;  %v1874_v43 = vpop.f32.mrb[33].mxu1  ;;  %v613_v44 = vpop.f32.mrb[34].mxu0 }
 0x13c   : > { %v927_v1 = vpop.f32.mrb[34].mxu1  ;;  %v1759_v45 = vpop.f32.mrb[35].mxu0 }
 0x13d   : > { %1382 = vst.msk [vmem:[%s2271_s30 + $0x3c] sm:$0xf] %vm1366_vm2, %v1607_v41  ;;  %v1082_v46 = vadd.f32 %v2263_v38, %v925_v42  ;;  %v928_v47 = vadd.f32 %v927_v1, %v613_v44  ;;  %v1875_v48 = vpop.f32.mrb[35].mxu1 }
 0x13f   : > { %v1132_v49 = vmax.f32 %v1082_v46, 0.0  ;;  %v1083_v50 = vadd.f32 %v2263_v38, %v928_v47 }
 0x141   : > { %v1608_v51 = vpack.c.bf16 %v1132_v49, %v1132_v49  ;;  %v1133_v52 = vmax.f32 %v1083_v50, 0.0  ;;  %v618_v53 = vpop.f32.mrb[36].mxu0 }
 0x142   : > { %v932_v54 = vpop.f32.mrb[36].mxu1  ;;  %v1762_v55 = vpop.f32.mrb[37].mxu0 }
 0x143   : > { %1383 = vst.msk [vmem:[%s2271_s30 + $0x40] sm:$0xf] %vm1366_vm2, %v1608_v51  ;;  %v1609_v56 = vpack.c.bf16 %v1133_v52, %v1133_v52  ;;  %v933_v57 = vadd.f32 %v932_v54, %v618_v53  ;;  %v1878_v58 = vpop.f32.mrb[37].mxu1  ;;  %v621_v59 = vpop.f32.mrb[38].mxu0 }
 0x144   : > { %v935_v60 = vpop.f32.mrb[38].mxu1  ;;  %v1763_v61 = vpop.f32.mrb[39].mxu0 }
 0x145   : > { %1384 = vst.msk [vmem:[%s2271_s30 + $0x44] sm:$0xf] %vm1366_vm2, %v1609_v56  ;;  %v1084_v62 = vadd.f32 %v2263_v38, %v933_v57  ;;  %v936_v63 = vadd.f32 %v935_v60, %v621_v59  ;;  %v1879_v0 = vpop.f32.mrb[39].mxu1 }
 0x147   : > { %v1134_v2 = vmax.f32 %v1084_v62, 0.0  ;;  %v1085_v3 = vadd.f32 %v2263_v38, %v936_v63 }
 0x149   : > { %v1610_v4 = vpack.c.bf16 %v1134_v2, %v1134_v2  ;;  %v1135_v5 = vmax.f32 %v1085_v3, 0.0  ;;  %v626_v6 = vpop.f32.mrb[40].mxu0 }
 0x14a   : > { %v940_v7 = vpop.f32.mrb[40].mxu1  ;;  %v1766_v8 = vpop.f32.mrb[41].mxu0 }
 0x14b   : > { %1385 = vst.msk [vmem:[%s2271_s30 + $0x48] sm:$0xf] %vm1366_vm2, %v1610_v4  ;;  %v1611_v9 = vpack.c.bf16 %v1135_v5, %v1135_v5  ;;  %v941_v10 = vadd.f32 %v940_v7, %v626_v6  ;;  %v1882_v11 = vpop.f32.mrb[41].mxu1  ;;  %v629_v12 = vpop.f32.mrb[42].mxu0 }
 0x14c   : > { %v943_v13 = vpop.f32.mrb[42].mxu1  ;;  %v1767_v14 = vpop.f32.mrb[43].mxu0 }
 0x14d   : > { %1386 = vst.msk [vmem:[%s2271_s30 + $0x4c] sm:$0xf] %vm1366_vm2, %v1611_v9  ;;  %v1086_v15 = vadd.f32 %v2263_v38, %v941_v10  ;;  %v944_v16 = vadd.f32 %v943_v13, %v629_v12  ;;  %v1883_v17 = vpop.f32.mrb[43].mxu1 }
 0x14f   : > { %v1136_v18 = vmax.f32 %v1086_v15, 0.0  ;;  %v1087_v19 = vadd.f32 %v2263_v38, %v944_v16 }
 0x151   : > { %v1612_v20 = vpack.c.bf16 %v1136_v18, %v1136_v18  ;;  %v1137_v21 = vmax.f32 %v1087_v19, 0.0  ;;  %v634_v22 = vpop.f32.mrb[44].mxu0 }
 0x152   : > { %v948_v23 = vpop.f32.mrb[44].mxu1  ;;  %v1770_v24 = vpop.f32.mrb[45].mxu0 }
 0x153   : > { %1387 = vst.msk [vmem:[%s2271_s30 + $0x50] sm:$0xf] %vm1366_vm2, %v1612_v20  ;;  %v1613_v25 = vpack.c.bf16 %v1137_v21, %v1137_v21  ;;  %v949_v26 = vadd.f32 %v948_v23, %v634_v22  ;;  %v1886_v27 = vpop.f32.mrb[45].mxu1  ;;  %v637_v28 = vpop.f32.mrb[46].mxu0 }
 0x154   : > { %v951_v29 = vpop.f32.mrb[46].mxu1  ;;  %v1771_v30 = vpop.f32.mrb[47].mxu0 }
 0x155   : > { %1388 = vst.msk [vmem:[%s2271_s30 + $0x54] sm:$0xf] %vm1366_vm2, %v1613_v25  ;;  %v1088_v31 = vadd.f32 %v2263_v38, %v949_v26  ;;  %v952_v32 = vadd.f32 %v951_v29, %v637_v28  ;;  %v1887_v33 = vpop.f32.mrb[47].mxu1 }
 0x157   : > { %v1138_v34 = vmax.f32 %v1088_v31, 0.0  ;;  %v1089_v35 = vadd.f32 %v2263_v38, %v952_v32 }
 0x159   : > { %v1614_v36 = vpack.c.bf16 %v1138_v34, %v1138_v34  ;;  %v1139_v37 = vmax.f32 %v1089_v35, 0.0  ;;  %v642_v39 = vpop.f32.mrb[48].mxu0 }
 0x15a   : > { %v956_v40 = vpop.f32.mrb[48].mxu1  ;;  %v1774_v41 = vpop.f32.mrb[49].mxu0 }
 0x15b   : > { %1389 = vst.msk [vmem:[%s2271_s30 + $0x58] sm:$0xf] %vm1366_vm2, %v1614_v36  ;;  %v1615_v42 = vpack.c.bf16 %v1139_v37, %v1139_v37  ;;  %v957_v43 = vadd.f32 %v956_v40, %v642_v39  ;;  %v1890_v44 = vpop.f32.mrb[49].mxu1  ;;  %v645_v1 = vpop.f32.mrb[50].mxu0 }
 0x15c   : > { %v959_v45 = vpop.f32.mrb[50].mxu1  ;;  %v1775_v46 = vpop.f32.mrb[51].mxu0 }
 0x15d   : > { %1390 = vst.msk [vmem:[%s2271_s30 + $0x5c] sm:$0xf] %vm1366_vm2, %v1615_v42  ;;  %v1090_v47 = vadd.f32 %v2263_v38, %v957_v43  ;;  %v960_v48 = vadd.f32 %v959_v45, %v645_v1  ;;  %v1891_v49 = vpop.f32.mrb[51].mxu1 }
 0x15f   : > { %v1140_v50 = vmax.f32 %v1090_v47, 0.0  ;;  %v1091_v51 = vadd.f32 %v2263_v38, %v960_v48 }
 0x161   : > { %v1616_v52 = vpack.c.bf16 %v1140_v50, %v1140_v50  ;;  %v1141_v53 = vmax.f32 %v1091_v51, 0.0  ;;  %v650_v54 = vpop.f32.mrb[52].mxu0 }
 0x162   : > { %v964_v55 = vpop.f32.mrb[52].mxu1  ;;  %v1778_v56 = vpop.f32.mrb[53].mxu0 }
 0x163   : > { %1391 = vst.msk [vmem:[%s2271_s30 + $0x60] sm:$0xf] %vm1366_vm2, %v1616_v52  ;;  %v1617_v57 = vpack.c.bf16 %v1141_v53, %v1141_v53  ;;  %v965_v58 = vadd.f32 %v964_v55, %v650_v54  ;;  %v1894_v59 = vpop.f32.mrb[53].mxu1  ;;  %v653_v60 = vpop.f32.mrb[54].mxu0 }
 0x164   : > { %v967_v61 = vpop.f32.mrb[54].mxu1  ;;  %v1779_v62 = vpop.f32.mrb[55].mxu0 }
 0x165   : > { %1392 = vst.msk [vmem:[%s2271_s30 + $0x64] sm:$0xf] %vm1366_vm2, %v1617_v57  ;;  %v1092_v63 = vadd.f32 %v2263_v38, %v965_v58  ;;  %v968_v0 = vadd.f32 %v967_v61, %v653_v60  ;;  %v1895_v2 = vpop.f32.mrb[55].mxu1 }
 0x167   : > { %v1142_v3 = vmax.f32 %v1092_v63, 0.0  ;;  %v1093_v4 = vadd.f32 %v2263_v38, %v968_v0 }
 0x169   : > { %v1618_v5 = vpack.c.bf16 %v1142_v3, %v1142_v3  ;;  %v1143_v6 = vmax.f32 %v1093_v4, 0.0  ;;  %v658_v7 = vpop.f32.mrb[56].mxu0 }
 0x16a   : > { %v972_v8 = vpop.f32.mrb[56].mxu1  ;;  %v1782_v9 = vpop.f32.mrb[57].mxu0 }
 0x16b   : > { %1393 = vst.msk [vmem:[%s2271_s30 + $0x68] sm:$0xf] %vm1366_vm2, %v1618_v5  ;;  %v1619_v10 = vpack.c.bf16 %v1143_v6, %v1143_v6  ;;  %v973_v11 = vadd.f32 %v972_v8, %v658_v7  ;;  %v1898_v12 = vpop.f32.mrb[57].mxu1  ;;  %v661_v13 = vpop.f32.mrb[58].mxu0 }
 0x16c   : > { %v975_v14 = vpop.f32.mrb[58].mxu1  ;;  %v1783_v15 = vpop.f32.mrb[59].mxu0 }
 0x16d   : > { %1394 = vst.msk [vmem:[%s2271_s30 + $0x6c] sm:$0xf] %vm1366_vm2, %v1619_v10  ;;  %v1094_v16 = vadd.f32 %v2263_v38, %v973_v11  ;;  %v976_v17 = vadd.f32 %v975_v14, %v661_v13  ;;  %v1899_v18 = vpop.f32.mrb[59].mxu1 }
 0x16f   : > { %v1144_v19 = vmax.f32 %v1094_v16, 0.0  ;;  %v1095_v20 = vadd.f32 %v2263_v38, %v976_v17 }
 0x171   : > { %v1620_v21 = vpack.c.bf16 %v1144_v19, %v1144_v19  ;;  %v1145_v22 = vmax.f32 %v1095_v20, 0.0  ;;  %v666_v23 = vpop.f32.mrb[60].mxu0 }
 0x172   : > { %v980_v24 = vpop.f32.mrb[60].mxu1  ;;  %v1786_v25 = vpop.f32.mrb[61].mxu0 }
 0x173   : > { %1395 = vst.msk [vmem:[%s2271_s30 + $0x70] sm:$0xf] %vm1366_vm2, %v1620_v21  ;;  %v1621_v26 = vpack.c.bf16 %v1145_v22, %v1145_v22  ;;  %v981_v27 = vadd.f32 %v980_v24, %v666_v23  ;;  %v1902_v28 = vpop.f32.mrb[61].mxu1  ;;  %v669_v29 = vpop.f32.mrb[62].mxu0 }
 0x174   : > { %v983_v30 = vpop.f32.mrb[62].mxu1  ;;  %v1787_v31 = vpop.f32.mrb[63].mxu0 }
 0x175   : > { %1396 = vst.msk [vmem:[%s2271_s30 + $0x74] sm:$0xf] %vm1366_vm2, %v1621_v26  ;;  %v1096_v32 = vadd.f32 %v2263_v38, %v981_v27  ;;  %v984_v33 = vadd.f32 %v983_v30, %v669_v29  ;;  %v1903_v34 = vpop.f32.mrb[63].mxu1 }
 0x177   : > { %v1146_v35 = vmax.f32 %v1096_v32, 0.0  ;;  %v1097_v36 = vadd.f32 %v2263_v38, %v984_v33 }
 0x179   : > { %v1622_v37 = vpack.c.bf16 %v1146_v35, %v1146_v35  ;;  %v1147_v39 = vmax.f32 %v1097_v36, 0.0  ;;  %v674_v40 = vpop.f32.mrb[64].mxu0 }
 0x17a   : > { %v988_v41 = vpop.f32.mrb[64].mxu1  ;;  %v1790_v42 = vpop.f32.mrb[65].mxu0 }
 0x17b   : > { %1397 = vst.msk [vmem:[%s2271_s30 + $0x78] sm:$0xf] %vm1366_vm2, %v1622_v37  ;;  %v1623_v43 = vpack.c.bf16 %v1147_v39, %v1147_v39  ;;  %v989_v44 = vadd.f32 %v988_v41, %v674_v40  ;;  %v1906_v1 = vpop.f32.mrb[65].mxu1  ;;  %v677_v45 = vpop.f32.mrb[66].mxu0 }
 0x17c   : > { %v991_v46 = vpop.f32.mrb[66].mxu1  ;;  %v1791_v47 = vpop.f32.mrb[67].mxu0 }
 0x17d   : > { %1398 = vst.msk [vmem:[%s2271_s30 + $0x7c] sm:$0xf] %vm1366_vm2, %v1623_v43  ;;  %v1098_v48 = vadd.f32 %v2263_v38, %v989_v44  ;;  %v992_v49 = vadd.f32 %v991_v46, %v677_v45  ;;  %v1907_v50 = vpop.f32.mrb[67].mxu1 }
 0x17f   : > { %v1148_v51 = vmax.f32 %v1098_v48, 0.0  ;;  %v1099_v52 = vadd.f32 %v2263_v38, %v992_v49 }
 0x181   : > { %v1624_v53 = vpack.c.bf16 %v1148_v51, %v1148_v51  ;;  %v1149_v54 = vmax.f32 %v1099_v52, 0.0  ;;  %v682_v55 = vpop.f32.mrb[68].mxu0 }
 0x182   : > { %v996_v56 = vpop.f32.mrb[68].mxu1  ;;  %v1794_v57 = vpop.f32.mrb[69].mxu0 }
 0x183   : > { %1399 = vst.msk [vmem:[%s2271_s30 + $0x80] sm:$0xf] %vm1366_vm2, %v1624_v53  ;;  %v1625_v58 = vpack.c.bf16 %v1149_v54, %v1149_v54  ;;  %v997_v59 = vadd.f32 %v996_v56, %v682_v55  ;;  %v1910_v60 = vpop.f32.mrb[69].mxu1  ;;  %v685_v61 = vpop.f32.mrb[70].mxu0 }
 0x184   : > { %v999_v62 = vpop.f32.mrb[70].mxu1  ;;  %v1795_v63 = vpop.f32.mrb[71].mxu0 }
 0x185   : > { %1400 = vst.msk [vmem:[%s2271_s30 + $0x84] sm:$0xf] %vm1366_vm2, %v1625_v58  ;;  %v1100_v0 = vadd.f32 %v2263_v38, %v997_v59  ;;  %v1000_v2 = vadd.f32 %v999_v62, %v685_v61  ;;  %v1911_v3 = vpop.f32.mrb[71].mxu1 }
 0x187   : > { %v1150_v4 = vmax.f32 %v1100_v0, 0.0  ;;  %v1101_v5 = vadd.f32 %v2263_v38, %v1000_v2 }
 0x189   : > { %v1626_v6 = vpack.c.bf16 %v1150_v4, %v1150_v4  ;;  %v1151_v7 = vmax.f32 %v1101_v5, 0.0  ;;  %v690_v8 = vpop.f32.mrb[72].mxu0 }
 0x18a   : > { %v1004_v9 = vpop.f32.mrb[72].mxu1  ;;  %v1798_v10 = vpop.f32.mrb[73].mxu0 }
 0x18b   : > { %1401 = vst.msk [vmem:[%s2271_s30 + $0x88] sm:$0xf] %vm1366_vm2, %v1626_v6  ;;  %v1627_v11 = vpack.c.bf16 %v1151_v7, %v1151_v7  ;;  %v1005_v12 = vadd.f32 %v1004_v9, %v690_v8  ;;  %v1914_v13 = vpop.f32.mrb[73].mxu1  ;;  %v693_v14 = vpop.f32.mrb[74].mxu0 }
 0x18c   : > { %v1007_v15 = vpop.f32.mrb[74].mxu1  ;;  %v1799_v16 = vpop.f32.mrb[75].mxu0 }
 0x18d   : > { %1402 = vst.msk [vmem:[%s2271_s30 + $0x8c] sm:$0xf] %vm1366_vm2, %v1627_v11  ;;  %v1102_v17 = vadd.f32 %v2263_v38, %v1005_v12  ;;  %v1008_v18 = vadd.f32 %v1007_v15, %v693_v14  ;;  %v1915_v19 = vpop.f32.mrb[75].mxu1 }
 0x18f   : > { %v1152_v20 = vmax.f32 %v1102_v17, 0.0  ;;  %v1103_v21 = vadd.f32 %v2263_v38, %v1008_v18 }
 0x191   : > { %v1628_v22 = vpack.c.bf16 %v1152_v20, %v1152_v20  ;;  %v1153_v23 = vmax.f32 %v1103_v21, 0.0  ;;  %v698_v24 = vpop.f32.mrb[76].mxu0 }
 0x192   : > { %v1012_v25 = vpop.f32.mrb[76].mxu1  ;;  %v1802_v26 = vpop.f32.mrb[77].mxu0 }
 0x193   : > { %1403 = vst.msk [vmem:[%s2271_s30 + $0x90] sm:$0xf] %vm1366_vm2, %v1628_v22  ;;  %v1629_v27 = vpack.c.bf16 %v1153_v23, %v1153_v23  ;;  %v1013_v28 = vadd.f32 %v1012_v25, %v698_v24  ;;  %v1918_v29 = vpop.f32.mrb[77].mxu1  ;;  %v701_v30 = vpop.f32.mrb[78].mxu0 }
 0x194   : > { %v1015_v31 = vpop.f32.mrb[78].mxu1  ;;  %v1803_v32 = vpop.f32.mrb[79].mxu0 }
 0x195   : > { %1404 = vst.msk [vmem:[%s2271_s30 + $0x94] sm:$0xf] %vm1366_vm2, %v1629_v27  ;;  %v1104_v33 = vadd.f32 %v2263_v38, %v1013_v28  ;;  %v1016_v34 = vadd.f32 %v1015_v31, %v701_v30  ;;  %v1919_v35 = vpop.f32.mrb[79].mxu1 }
 0x197   : > { %v1154_v36 = vmax.f32 %v1104_v33, 0.0  ;;  %v1105_v37 = vadd.f32 %v2263_v38, %v1016_v34 }
 0x199   : > { %v1630_v39 = vpack.c.bf16 %v1154_v36, %v1154_v36  ;;  %v1155_v40 = vmax.f32 %v1105_v37, 0.0  ;;  %v706_v41 = vpop.f32.mrb[80].mxu0 }
 0x19a   : > { %v1020_v42 = vpop.f32.mrb[80].mxu1  ;;  %v1806_v43 = vpop.f32.mrb[81].mxu0 }
 0x19b   : > { %1405 = vst.msk [vmem:[%s2271_s30 + $0x98] sm:$0xf] %vm1366_vm2, %v1630_v39  ;;  %v1631_v44 = vpack.c.bf16 %v1155_v40, %v1155_v40  ;;  %v1021_v1 = vadd.f32 %v1020_v42, %v706_v41  ;;  %v1922_v45 = vpop.f32.mrb[81].mxu1  ;;  %v709_v46 = vpop.f32.mrb[82].mxu0 }
 0x19c   : > { %v1023_v47 = vpop.f32.mrb[82].mxu1  ;;  %v1807_v48 = vpop.f32.mrb[83].mxu0 }
 0x19d   : > { %1406 = vst.msk [vmem:[%s2271_s30 + $0x9c] sm:$0xf] %vm1366_vm2, %v1631_v44  ;;  %v1106_v49 = vadd.f32 %v2263_v38, %v1021_v1  ;;  %v1024_v50 = vadd.f32 %v1023_v47, %v709_v46  ;;  %v1923_v51 = vpop.f32.mrb[83].mxu1 }
 0x19f   : > { %v1156_v52 = vmax.f32 %v1106_v49, 0.0  ;;  %v1107_v53 = vadd.f32 %v2263_v38, %v1024_v50 }
 0x1a1   : > { %v1632_v54 = vpack.c.bf16 %v1156_v52, %v1156_v52  ;;  %v1157_v55 = vmax.f32 %v1107_v53, 0.0  ;;  %v714_v56 = vpop.f32.mrb[84].mxu0 }
 0x1a2   : > { %v1028_v57 = vpop.f32.mrb[84].mxu1  ;;  %v1810_v58 = vpop.f32.mrb[85].mxu0 }
 0x1a3   : > { %1407 = vst.msk [vmem:[%s2271_s30 + $0xa0] sm:$0xf] %vm1366_vm2, %v1632_v54  ;;  %v1633_v59 = vpack.c.bf16 %v1157_v55, %v1157_v55  ;;  %v1029_v60 = vadd.f32 %v1028_v57, %v714_v56  ;;  %v1926_v61 = vpop.f32.mrb[85].mxu1  ;;  %v717_v62 = vpop.f32.mrb[86].mxu0 }
 0x1a4   : > { %v1031_v63 = vpop.f32.mrb[86].mxu1  ;;  %v1811_v0 = vpop.f32.mrb[87].mxu0 }
 0x1a5   : > { %1408 = vst.msk [vmem:[%s2271_s30 + $0xa4] sm:$0xf] %vm1366_vm2, %v1633_v59  ;;  %v1108_v2 = vadd.f32 %v2263_v38, %v1029_v60  ;;  %v1032_v3 = vadd.f32 %v1031_v63, %v717_v62  ;;  %v1927_v4 = vpop.f32.mrb[87].mxu1 }
 0x1a7   : > { %v1158_v5 = vmax.f32 %v1108_v2, 0.0  ;;  %v1109_v6 = vadd.f32 %v2263_v38, %v1032_v3 }
 0x1a9   : > { %v1634_v7 = vpack.c.bf16 %v1158_v5, %v1158_v5  ;;  %v1159_v8 = vmax.f32 %v1109_v6, 0.0  ;;  %v722_v9 = vpop.f32.mrb[88].mxu0 }
 0x1aa   : > { %v1036_v10 = vpop.f32.mrb[88].mxu1  ;;  %v1814_v11 = vpop.f32.mrb[89].mxu0 }
 0x1ab   : > { %1409 = vst.msk [vmem:[%s2271_s30 + $0xa8] sm:$0xf] %vm1366_vm2, %v1634_v7  ;;  %v1635_v12 = vpack.c.bf16 %v1159_v8, %v1159_v8  ;;  %v1037_v13 = vadd.f32 %v1036_v10, %v722_v9  ;;  %v1930_v14 = vpop.f32.mrb[89].mxu1  ;;  %v725_v15 = vpop.f32.mrb[90].mxu0 }
 0x1ac   : > { %v1039_v16 = vpop.f32.mrb[90].mxu1  ;;  %v1815_v17 = vpop.f32.mrb[91].mxu0 }
 0x1ad   : > { %1410 = vst.msk [vmem:[%s2271_s30 + $0xac] sm:$0xf] %vm1366_vm2, %v1635_v12  ;;  %v1110_v18 = vadd.f32 %v2263_v38, %v1037_v13  ;;  %v1040_v19 = vadd.f32 %v1039_v16, %v725_v15  ;;  %v1931_v20 = vpop.f32.mrb[91].mxu1 }
 0x1af   : > { %v1160_v21 = vmax.f32 %v1110_v18, 0.0  ;;  %v1111_v22 = vadd.f32 %v2263_v38, %v1040_v19 }
 0x1b1   : > { %v1636_v23 = vpack.c.bf16 %v1160_v21, %v1160_v21  ;;  %v1161_v24 = vmax.f32 %v1111_v22, 0.0  ;;  %v730_v25 = vpop.f32.mrb[92].mxu0 }
 0x1b2   : > { %v1044_v26 = vpop.f32.mrb[92].mxu1  ;;  %v1818_v27 = vpop.f32.mrb[93].mxu0 }
 0x1b3   : > { %1411 = vst.msk [vmem:[%s2271_s30 + $0xb0] sm:$0xf] %vm1366_vm2, %v1636_v23  ;;  %v1637_v28 = vpack.c.bf16 %v1161_v24, %v1161_v24  ;;  %v1045_v29 = vadd.f32 %v1044_v26, %v730_v25  ;;  %v1934_v30 = vpop.f32.mrb[93].mxu1  ;;  %v733_v31 = vpop.f32.mrb[94].mxu0 }
 0x1b4   : > { %v1047_v32 = vpop.f32.mrb[94].mxu1  ;;  %v1819_v33 = vpop.f32.mrb[95].mxu0 }
 0x1b5   : > { %1412 = vst.msk [vmem:[%s2271_s30 + $0xb4] sm:$0xf] %vm1366_vm2, %v1637_v28  ;;  %v1112_v34 = vadd.f32 %v2263_v38, %v1045_v29  ;;  %v1048_v35 = vadd.f32 %v1047_v32, %v733_v31  ;;  %v1935_v36 = vpop.f32.mrb[95].mxu1 }
 0x1b7   : > { %v1162_v37 = vmax.f32 %v1112_v34, 0.0  ;;  %v1113_v39 = vadd.f32 %v2263_v38, %v1048_v35 }
 0x1b9   : > { %v1638_v40 = vpack.c.bf16 %v1162_v37, %v1162_v37  ;;  %v1163_v41 = vmax.f32 %v1113_v39, 0.0  ;;  %v738_v42 = vpop.f32.mrb[96].mxu0 }
 0x1ba   : > { %v1052_v43 = vpop.f32.mrb[96].mxu1  ;;  %v1822_v44 = vpop.f32.mrb[97].mxu0 }
 0x1bb   : > { %1413 = vst.msk [vmem:[%s2271_s30 + $0xb8] sm:$0xf] %vm1366_vm2, %v1638_v40  ;;  %v1639_v1 = vpack.c.bf16 %v1163_v41, %v1163_v41  ;;  %v1053_v45 = vadd.f32 %v1052_v43, %v738_v42  ;;  %v1938_v46 = vpop.f32.mrb[97].mxu1  ;;  %v741_v47 = vpop.f32.mrb[98].mxu0 }
 0x1bc   : > { %v1055_v48 = vpop.f32.mrb[98].mxu1  ;;  %v1823_v49 = vpop.f32.mrb[99].mxu0 }
 0x1bd   : > { %1414 = vst.msk [vmem:[%s2271_s30 + $0xbc] sm:$0xf] %vm1366_vm2, %v1639_v1  ;;  %v1114_v50 = vadd.f32 %v2263_v38, %v1053_v45  ;;  %v1056_v51 = vadd.f32 %v1055_v48, %v741_v47  ;;  %v1939_v52 = vpop.f32.mrb[99].mxu1 }
 0x1bf   : > { %v1164_v53 = vmax.f32 %v1114_v50, 0.0  ;;  %v1115_v54 = vadd.f32 %v2263_v38, %v1056_v51 }
 0x1c1   : > { %v1640_v55 = vpack.c.bf16 %v1164_v53, %v1164_v53  ;;  %v1165_v56 = vmax.f32 %v1115_v54, 0.0 }
 0x1c3   : > { %1415 = vst.msk [vmem:[%s2271_s30 + $0xc0] sm:$0xf] %vm1366_vm2, %v1640_v55  ;;  %v1641_v57 = vpack.c.bf16 %v1165_v56, %v1165_v56 }
 0x1c5   : > { %1416 = vst.msk [vmem:[%s2271_s30 + $0xc4] sm:$0xf] %vm1366_vm2, %v1641_v57 }
 0x1c6 PF: > { %s13_s12 = sadd.s32 1, %s2002_s12  }
 0x1c7   : > { %p10_p4 = scmp.ge.s32.totalorder %s13_s12, 4  }
 0x1c9   :  { %12 = sbr.rel (!%p10_p4) target bundleno = 1 (0x1), region = 63 }

// kernel: cnn_forward.5
= control target key start
LH: loop header
LB: loop body
LE: loop exit
PB: predicated region body
PF: predicated region fallthrough
CT: control target
= control target key end

     0   :  { %s1246_s12 = smov 0   ;;  %s1462_s0 = inlined_call_operand.vmem [shape: bf16[2,90,256], index: 0, kind: input, shape index: {}]   ;;  %s1463_s1 = inlined_call_operand.vmem [shape: bf16[2,256,64], index: 1, kind: input, shape index: {}]   ;;  %s1464_s2 = inlined_call_operand.vmem [shape: f32[1,64], index: 2, kind: input, shape index: {}]   ;;  %s1465_s3 = inlined_call_operand.vmem [shape: bf16[2,81,64], index: 3, kind: output, shape index: {}]  }
   0x1 LB: > { %s928_s13 = sadd.s32 4294967295, %s1224_s12   ;;  %p932_p0 = scmp.ge.s32.totalorder %s1224_s12, 1  ;;  %s1224_s12 = sphi %s1246_s12, %s13_s12  }
   0x2   : > { %p137_p1 = scmp.lt.s32.totalorder %s1224_s12, 3 }
   0x4   : > { %p138_p2 = pnand %p932_p0, %p137_p1 }
   0x5   : > { %v1162_v0 = vld [vmem:[%s1463_s1 + $0xc0] sm:$0xff] (!%p138_p2)   ;;  %v1166_v4 = vld [vmem:[%s1463_s1 + $0xc8] sm:$0xff] (!%p138_p2)   ;;  %v1170_v8 = vld [vmem:[%s1463_s1 + $0xd0] sm:$0xff] (!%p138_p2)   ;;  %p161_p3 = scmp.lt.s32.totalorder (!%p138_p2), %s928_s13, 1  ;;  %vm295_vm0 = vsmask.f32 (!%p138_p2), 7424 }
   0x6   : > { %141 = sbr.rel (%p138_p2) target bundleno = 305 (0x131), region = 32  ;;  %v1163_v1 = vld [vmem:[%s1463_s1 + $0x40] sm:$0xff] (!%p138_p2)   ;;  %1048 = vmatprep.subr.bf16.mxu0 (!%p138_p2), %v1162_v0  ;;  %v1167_v5 = vld [vmem:[%s1463_s1 + $0x48] sm:$0xff] (!%p138_p2)   ;;  %v1171_v9 = vld [vmem:[%s1463_s1 + $0x50] sm:$0xff] (!%p138_p2)   ;;  %vm856_vm1 = vcmask (!%p138_p2), 519168   ;;  %vm867_vm2 = vcmask (!%p138_p2), 516096  }
   0x7   : > { %v1164_v2 = vld [vmem:[%s1463_s1 + $0x80] sm:$0xff] (!%p138_p2)   ;;  %1100 = vmatprep.subr.bf16.mxu1 (!%p138_p2), %v1163_v1  ;;  %v1168_v6 = vld [vmem:[%s1463_s1 + $0x88] sm:$0xff] (!%p138_p2)   ;;  %v1172_v10 = vld [vmem:[%s1463_s1 + $0x90] sm:$0xff] (!%p138_p2)   ;;  %vm868_vm3 = vsmask.f32 (!%p138_p2), 256 }
   0x8   : > { %v1165_v3 = vld [vmem:[%s1463_s1] sm:$0xff] (!%p138_p2)   ;;  %1049 = vmatpush3.bf16.msra.mxu0 (!%p138_p2), %v1164_v2  ;;  %v1169_v7 = vld [vmem:[%s1463_s1 + $0x8] sm:$0xff] (!%p138_p2)   ;;  %v1173_v11 = vld [vmem:[%s1463_s1 + $0x10] sm:$0xff] (!%p138_p2)  }
   0x9   : > { %1101 = vmatpush3.bf16.msra.mxu1 (!%p138_p2), %v1165_v3  ;;  %1050 = vmatprep.subr.bf16.mxu0 (!%p138_p2), %v1166_v4  ;;  %v1174_v12 = vld [vmem:[%s1463_s1 + $0xd8] sm:$0xff] (!%p138_p2)   ;;  %v1178_v16 = vld [vmem:[%s1463_s1 + $0xe0] sm:$0xff] (!%p138_p2)   ;;  %v1182_v20 = vld [vmem:[%s1463_s1 + $0xe8] sm:$0xff] (!%p138_p2)  }
   0xa   : > { %1102 = vmatprep.subr.bf16.mxu1 (!%p138_p2), %v1167_v5  ;;  %v1175_v13 = vld [vmem:[%s1463_s1 + $0x58] sm:$0xff] (!%p138_p2)   ;;  %v1179_v17 = vld [vmem:[%s1463_s1 + $0x60] sm:$0xff] (!%p138_p2)   ;;  %v1183_v21 = vld [vmem:[%s1463_s1 + $0x68] sm:$0xff] (!%p138_p2)  }
   0xb   : > { %v1176_v14 = vld [vmem:[%s1463_s1 + $0x98] sm:$0xff] (!%p138_p2)   ;;  %v1180_v18 = vld [vmem:[%s1463_s1 + $0xa0] sm:$0xff] (!%p138_p2)   ;;  %v1184_v22 = vld [vmem:[%s1463_s1 + $0xa8] sm:$0xff] (!%p138_p2)  }
   0xc   : > { %1051 = vmatpush3.bf16.msra.mxu0 (!%p138_p2), %v1168_v6  ;;  %v1177_v15 = vld [vmem:[%s1463_s1 + $0x18] sm:$0xff] (!%p138_p2)   ;;  %v1181_v19 = vld [vmem:[%s1463_s1 + $0x20] sm:$0xff] (!%p138_p2)   ;;  %v1185_v23 = vld [vmem:[%s1463_s1 + $0x28] sm:$0xff] (!%p138_p2)  }
   0xd   : > { %1103 = vmatpush3.bf16.msra.mxu1 %v1169_v7  ;;  %1052 = vmatprep.subr.bf16.mxu0 %v1170_v8  ;;  %s1467_s13 = smov (!%p161_p3, %s928_s13), 1  ;;  %v1186_v24 = vld [vmem:[%s1463_s1 + $0xf0] sm:$0xff]   ;;  %v1190_v28 = vld [vmem:[%s1463_s1 + $0xf8] sm:$0xff]   ;;  %vm869_vm4 = vmand %vm867_vm2, %vm868_vm3 }
   0xe   : > { %1104 = vmatprep.subr.bf16.mxu1 %v1171_v9  ;;  %v1187_v25 = vld [vmem:[%s1463_s1 + $0x70] sm:$0xff]   ;;  %s1152_s16 = smul.u32 96, %s1467_s13  ;;  %v1191_v29 = vld [vmem:[%s1463_s1 + $0x78] sm:$0xff]  }
   0xf   : > { %v1188_v26 = vld [vmem:[%s1463_s1 + $0xb0] sm:$0xff]   ;;  %v1192_v30 = vld [vmem:[%s1463_s1 + $0xb8] sm:$0xff]   ;;  %s1153_s7 = smul.u32 44, %s1467_s13 }
  0x10   : > { %1053 = vmatpush3.bf16.msra.mxu0 %v1172_v10  ;;  %v1189_v27 = vld [vmem:[%s1463_s1 + $0x30] sm:$0xff]   ;;  %s1354_s27 = scalar_lea.vmem %s1462_s0, %s1152_s16  ;;  %v1193_v31 = vld [vmem:[%s1463_s1 + $0x38] sm:$0xff]  }
  0x11   : > { %1105 = vmatpush3.bf16.msra.mxu1 %v1173_v11  ;;  %1054 = vmatprep.subr.bf16.mxu0 %v1174_v12  ;;  %v173_v32 = vld [vmem:[%s1354_s27 + $0x8] sm:$0xff]  ;;  %v174_v33 = vld [vmem:[%s1354_s27 + $0x10] sm:$0xff]  ;;  %v175_v34 = vld [vmem:[%s1354_s27 + $0x18] sm:$0xff]  ;;  %s1426_s10 = scalar_lea.vmem %s1465_s3, %s1153_s7 }
  0x12   : > { %1106 = vmatprep.subr.bf16.mxu1 %v1175_v13  ;;  %v1366_v35 = vld [vmem:[%s1354_s27 + $0x20] sm:$0xff]  ;;  %v968_v36 = vcombine.high %v173_v32, %v174_v33  ;;  %v967_v38 = vcombine.low %v173_v32, %v174_v33  ;;  %v1370_v39 = vld [vmem:[%s1354_s27 + $0x28] sm:$0xff]  ;;  %v998_v40 = vcombine.high %v174_v33, %v175_v34  ;;  %v1375_v45 = vld [vmem:[%s1354_s27 + $0x30] sm:$0xff]  ;;  %v997_v1 = vcombine.low %v174_v33, %v175_v34 }
  0x13   : > { %v172_v37 = vld [vmem:[%s1354_s27] sm:$0xff]  ;;  %v970_v41 = vcombine.high %v175_v34, %v1366_v35  ;;  %v969_v44 = vcombine.low %v175_v34, %v1366_v35  ;;  %v1378_v50 = vld [vmem:[%s1354_s27 + $0x38] sm:$0xff]  ;;  %v972_v54 = vcombine.high %v1370_v39, %v1375_v45  ;;  %v971_v58 = vcombine.low %v1370_v39, %v1375_v45  ;;  %v181_v12 = vld [vmem:[%s1354_s27 + $0x48] sm:$0xff] }
  0x14   : > { %1055 = vmatpush3.bf16.msra.mxu0 %v1176_v14  ;;  %v995_v42 = vcombine.low %v172_v37, %v173_v32  ;;  %v996_v43 = vcombine.high %v172_v37, %v173_v32  ;;  %v309_v46 = vshrl.u32 %v968_v36, 16  ;;  %v311_v47 = vshll.u32 %v968_v36, 16  ;;  %v1381_v51 = vld [vmem:[%s1354_s27 + $0x40] sm:$0xff]  ;;  %v215_v13 = vld [vmem:[%s1354_s27 + $0x50] sm:$0xff] }
  0x15   : > { %1107 = vmatpush3.bf16.msra.mxu1 %v1177_v15  ;;  %1056 = vmatprep.subr.bf16.mxu0 %v1178_v16  ;;  %v297_v48 = vshrl.u32 %v967_v38, 16  ;;  %v299_v49 = vshll.u32 %v967_v38, 16  ;;  %v316_v52 = vshll.u32 %v970_v41, 16  ;;  %v304_v53 = vshll.u32 %v969_v44, 16 }
  0x16   : > { %1108 = vmatprep.subr.bf16.mxu1 %v1179_v17  ;;  %734 = vmatprep.mubr.bf16.mxu1 %v996_v43  ;;  %v328_v55 = vshrl.u32 %v970_v41, 16  ;;  %v313_v56 = vrot.slane %v311_v47, 1  ;;  %v332_v61 = vshll.u32 %v972_v54, 16  ;;  %v974_v62 = vcombine.high %v1378_v50, %v1381_v51 }
  0x17   : > { %v301_v57 = vrot.slane %v299_v49, 1  ;;  %v318_v59 = vrot.slane %v316_v52, 1  ;;  %v306_v60 = vrot.slane %v304_v53, 1  ;;  %v320_v4 = vshrl.u32 %v969_v44, 16  ;;  %v182_v49 = vld [vmem:[%s1354_s27 + $0x50] sm:$0x11] }
  0x18   : > { %1057 = vmatpush3.bf16.msra.mxu0 %v1180_v18  ;;  %v314_v63 = vor.u32 %v313_v56, %v309_v46  ;;  %v334_v3 = vrot.slane %v332_v61, 1  ;;  %v324_v5 = vshll.u32 %v971_v58, 16  ;;  %v344_v8 = vshrl.u32 %v972_v54, 16 }
  0x19   : > { %1109 = vmatpush3.bf16.msra.mxu1 %v1181_v19  ;;  %1058 = vmatprep.subr.bf16.mxu0 %v1182_v20  ;;  %v302_v0 = vor.u32 %v301_v57, %v297_v48  ;;  %v330_v2 = vor.u32 %v328_v55, %v318_v59  ;;  %v348_v9 = vshll.u32 %v974_v62, 16  ;;  %v1000_v11 = vcombine.high %v1366_v35, %v1370_v39 }
  0x1a   : > { %1110 = vmatprep.subr.bf16.mxu1 %v1183_v21  ;;  %v319_v6 = vsel %vm295_vm0, %v314_v63, %v318_v59  ;;  %v322_v14 = vor.u32 %v320_v4, %v306_v60  ;;  %v326_v15 = vrot.slane %v324_v5, 1  ;;  %v973_v16 = vcombine.low %v1378_v50, %v1381_v51 }
  0x1b   : > { %v307_v7 = vsel %vm295_vm0, %v302_v0, %v306_v60  ;;  %528 = vmatprep.mubr.bf16.mxu0 %v319_v6  ;;  %v335_v10 = vsel %vm295_vm0, %v330_v2, %v334_v3  ;;  %v346_v17 = vor.u32 %v344_v8, %v334_v3  ;;  %v350_v18 = vrot.slane %v348_v9, 1  ;;  %v1418_v8 = vld [vmem:[%s1464_s2] ss:$0 sm:$0xff] }
  0x1c   : > { %1059 = vmatpush3.bf16.msra.mxu0 %v1184_v22  ;;  %v976_v19 = vcombine.high %v181_v12, %v215_v13  ;;  %v327_v20 = vsel %vm295_vm0, %v322_v14, %v326_v15  ;;  %v336_v21 = vshrl.u32 %v971_v58, 16  ;;  %v340_v22 = vshll.u32 %v973_v16, 16 }
  0x1d   : > { %1111 = vmatpush3.bf16.msra.mxu1 %v1185_v23  ;;  %1060 = vmatprep.subr.bf16.mxu0 %v1186_v24  ;;  %v351_v23 = vsel %vm295_vm0, %v346_v17, %v350_v18  ;;  %v999_v24 = vcombine.low %v1366_v35, %v1370_v39  ;;  %v352_v37 = vshrl.u32 %v973_v16, 16  ;;  %v1001_v39 = vcombine.low %v1375_v45, %v1378_v50 }
  0x1e   : > { %1112 = vmatprep.subr.bf16.mxu1 %v1187_v25  ;;  %v360_v25 = vshrl.u32 %v974_v62, 16  ;;  %v1006_v55 = vcombine.high %v182_v49, %v182_v49  ;;  %v1005_v60 = vcombine.low %v182_v49, %v182_v49 }
  0x20   : > { %1061 = vmatpush3.bf16.msra.mxu0 %v1188_v26  ;;  %v364_v26 = vshll.u32 %v976_v19, 16  ;;  %v362_v32 = vor.u32 %v360_v25, %v350_v18 }
  0x21   : > { %1113 = vmatpush3.bf16.msra.mxu1 %v1189_v27  ;;  %1062 = vmatprep.subr.bf16.mxu0 %v1190_v28  ;;  %v1002_v27 = vcombine.high %v1375_v45, %v1378_v50  ;;  %v216_v28 = vld [vmem:[%s1354_s27 + $0x58] sm:$0x11]  ;;  %v1003_v50 = vcombine.low %v1381_v51, %v181_v12 }
  0x22   : > { %1114 = vmatprep.subr.bf16.mxu1 %v1191_v29  ;;  %v338_v29 = vor.u32 %v336_v21, %v326_v15  ;;  %v366_v33 = vrot.slane %v364_v26, 1  ;;  %v978_v34 = vcombine.high %v216_v28, %v216_v28  ;;  %v977_v46 = vcombine.low %v216_v28, %v216_v28 }
  0x24   : > { %1063 = vmatpush3.bf16.msra.mxu0 %v1192_v30  ;;  %v342_v30 = vrot.slane %v340_v22, 1  ;;  %v367_v38 = vsel %vm295_vm0, %v362_v32, %v366_v33  ;;  %v380_v41 = vshll.u32 %v978_v34, 16  ;;  %v372_v54 = vshll.u32 %v977_v46, 16 }
  0x25   : > { %1115 = vmatpush3.bf16.msra.mxu1 %v1193_v31  ;;  %v975_v31 = vcombine.low %v181_v12, %v215_v13  ;;  %v386_v59 = vshrl.u32 %v978_v34, 16  ;;  %v384_v61 = vshrl.u32 %v977_v46, 16 }
  0x26   : > { %v343_v36 = vsel %vm295_vm0, %v338_v29, %v342_v30  ;;  %v354_v43 = vor.u32 %v352_v37, %v342_v30  ;;  %v382_v48 = vrot.slane %v380_v41, 1  ;;  %v374_v57 = vrot.slane %v372_v54, 1 }
  0x27   : > { %529 = vmatmul.mubr.bf16.vlgmr.msra.gmra.mrb[0].mxu0 %v307_v7  ;;  %v356_v35 = vshll.u32 %v975_v31, 16  ;;  %v368_v53 = vshrl.u32 %v975_v31, 16 }
  0x28   : > { %735 = vmatmul.mubr.bf16.vlgmr.msra.gmra.mrb[0].mxu1 %v995_v42  ;;  %536 = vmatprep.mubr.bf16.mxu0 %v335_v10  ;;  %v1004_v42 = vcombine.high %v1381_v51, %v181_v12 }
  0x29   : > { %742 = vmatprep.mubr.bf16.mxu1 %v998_v40  ;;  %v376_v40 = vshrl.u32 %v976_v19, 16  ;;  %v358_v44 = vrot.slane %v356_v35, 1 }
  0x2b   : > { %v378_v47 = vor.u32 %v376_v40, %v366_v33  ;;  %v359_v52 = vsel %vm295_vm0, %v354_v43, %v358_v44  ;;  %v370_v56 = vor.u32 %v368_v53, %v358_v44 }
  0x2d   : > { %v383_v45 = vsel %vm295_vm0, %v378_v47, %v382_v48  ;;  %v375_v58 = vsel %vm295_vm0, %v370_v56, %v374_v57 }
  0x2f   : > { %537 = vmatmul.mubr.bf16.gmra.mrb[4].mxu0 %v327_v20 }
  0x30   : > { %743 = vmatmul.mubr.bf16.gmra.mrb[4].mxu1 %v997_v1  ;;  %544 = vmatprep.mubr.bf16.mxu0 %v351_v23 }
  0x31   : > { %750 = vmatprep.mubr.bf16.mxu1 %v1000_v11 }
  0x37   : > { %545 = vmatmul.mubr.bf16.gmra.mrb[8].mxu0 %v343_v36 }
  0x38   : > { %751 = vmatmul.mubr.bf16.gmra.mrb[8].mxu1 %v999_v24  ;;  %552 = vmatprep.mubr.bf16.mxu0 %v367_v38 }
  0x39   : > { %758 = vmatprep.mubr.bf16.mxu1 %v1002_v27 }
  0x3f   : > { %553 = vmatmul.mubr.bf16.gmra.mrb[12].mxu0 %v359_v52 }
  0x40   : > { %759 = vmatmul.mubr.bf16.gmra.mrb[12].mxu1 %v1001_v39  ;;  %560 = vmatprep.mubr.bf16.mxu0 %v383_v45 }
  0x41   : > { %766 = vmatprep.mubr.bf16.mxu1 %v1004_v42 }
  0x47   : > { %561 = vmatmul.mubr.bf16.gmra.mrb[16].mxu0 %v375_v58 }
  0x48   : > { %767 = vmatmul.mubr.bf16.gmra.mrb[16].mxu1 %v1003_v50  ;;  %568 = vmatprep.mubr.bf16.mxu0 %v386_v59 }
  0x49   : > { %774 = vmatprep.mubr.bf16.mxu1 %v1006_v55 }
  0x4f   : > { %569 = vmatmul.mubr.bf16.gmra.mrb[20].mxu0 %v384_v61 }
  0x50   : > { %775 = vmatmul.mubr.bf16.gmra.mrb[20].mxu1 %v1005_v60 }
  0xfa   : > { %v1064_v3 = vpop.f32.mrb[0].mxu0 }
  0xfb   : > { %v1116_v62 = vpop.f32.mrb[0].mxu1  ;;  %v1065_v4 = vpop.f32.mrb[1].mxu0 }
  0xfc   : > { %v1117_v63 = vpop.f32.mrb[1].mxu1  ;;  %v1066_v5 = vadd.f32 %v1065_v4, %v1064_v3  ;;  %v1067_v6 = vpop.f32.mrb[2].mxu0 }
  0xfd   : > { %v1118_v0 = vadd.f32 %v1117_v63, %v1116_v62  ;;  %v1119_v51 = vpop.f32.mrb[2].mxu1  ;;  %v1068_v9 = vpop.f32.mrb[3].mxu0 }
  0xfe   : > { %v1120_v1 = vpop.f32.mrb[3].mxu1  ;;  %v1069_v12 = vadd.f32 %v1068_v9, %v1067_v6 }
  0xff   : > { %v1121_v2 = vadd.f32 %v1120_v1, %v1119_v51  ;;  %v737_v11 = vadd.f32 %v1118_v0, %v1066_v5 }
 0x101   : > { %v789_v16 = vadd.f32 %v1418_v8, %v737_v11  ;;  %v740_v17 = vadd.f32 %v1121_v2, %v1069_v12 }
 0x102   : > { %v1070_v21 = vpop.f32.mrb[4].mxu0 }
 0x103   : > { %v1122_v7 = vpop.f32.mrb[4].mxu1  ;;  %v800_v19 = vmax.f32 %v789_v16, 0.0  ;;  %v790_v20 = vadd.f32 %v1418_v8, %v740_v17  ;;  %v1071_v22 = vpop.f32.mrb[5].mxu0 }
 0x104   : > { %v1123_v10 = vpop.f32.mrb[5].mxu1  ;;  %v1072_v25 = vadd.f32 %v1071_v22, %v1070_v21  ;;  %v1073_v26 = vpop.f32.mrb[6].mxu0 }
 0x105   : > { %v1124_v13 = vadd.f32 %v1123_v10, %v1122_v7  ;;  %v1125_v14 = vpop.f32.mrb[6].mxu1  ;;  %v1037_v23 = vpack.c.bf16 %v800_v19, %v800_v19  ;;  %v801_v24 = vmax.f32 %v790_v20, 0.0  ;;  %v1074_v28 = vpop.f32.mrb[7].mxu0 }
 0x106   : > { %v1126_v15 = vpop.f32.mrb[7].mxu1  ;;  %v1075_v32 = vadd.f32 %v1074_v28, %v1073_v26 }
 0x107   : > { %v1127_v18 = vadd.f32 %v1126_v15, %v1125_v14  ;;  %857 = vst.msk [vmem:[%s1426_s10] sm:$0xf] %vm856_vm1, %v1037_v23  ;;  %v1038_v30 = vpack.c.bf16 %v801_v24, %v801_v24  ;;  %v745_v31 = vadd.f32 %v1124_v13, %v1072_v25 }
 0x109   : > { %858 = vst.msk [vmem:[%s1426_s10 + $0x4] sm:$0xf] %vm856_vm1, %v1038_v30  ;;  %v791_v37 = vadd.f32 %v1418_v8, %v745_v31  ;;  %v748_v35 = vadd.f32 %v1127_v18, %v1075_v32 }
 0x10a   : > { %v1076_v41 = vpop.f32.mrb[8].mxu0 }
 0x10b   : > { %v1128_v27 = vpop.f32.mrb[8].mxu1  ;;  %v802_v39 = vmax.f32 %v791_v37, 0.0  ;;  %v792_v40 = vadd.f32 %v1418_v8, %v748_v35  ;;  %v1077_v42 = vpop.f32.mrb[9].mxu0 }
 0x10c   : > { %v1129_v29 = vpop.f32.mrb[9].mxu1  ;;  %v1078_v46 = vadd.f32 %v1077_v42, %v1076_v41  ;;  %v1079_v47 = vpop.f32.mrb[10].mxu0 }
 0x10d   : > { %v1130_v33 = vadd.f32 %v1129_v29, %v1128_v27  ;;  %v1131_v34 = vpop.f32.mrb[10].mxu1  ;;  %v1039_v43 = vpack.c.bf16 %v802_v39, %v802_v39  ;;  %v803_v44 = vmax.f32 %v792_v40, 0.0  ;;  %v1080_v49 = vpop.f32.mrb[11].mxu0 }
 0x10e   : > { %v1132_v36 = vpop.f32.mrb[11].mxu1  ;;  %v1081_v45 = vadd.f32 %v1080_v49, %v1079_v47  ;;  %v870_v49 = vld [vmem:[%s1426_s10 + $0x28] sm:$0x1] }
 0x10f   : > { %v1133_v38 = vadd.f32 %v1132_v36, %v1131_v34  ;;  %859 = vst.msk [vmem:[%s1426_s10 + $0x8] sm:$0xf] %vm856_vm1, %v1039_v43  ;;  %v1040_v53 = vpack.c.bf16 %v803_v44, %v803_v44  ;;  %v753_v54 = vadd.f32 %v1130_v33, %v1078_v46 }
 0x111   : > { %860 = vst.msk [vmem:[%s1426_s10 + $0xc] sm:$0xf] %vm856_vm1, %v1040_v53  ;;  %v793_v57 = vadd.f32 %v1418_v8, %v753_v54  ;;  %v756_v58 = vadd.f32 %v1133_v38, %v1081_v45 }
 0x112   : > { %v1082_v62 = vpop.f32.mrb[12].mxu0 }
 0x113   : > { %v1134_v48 = vpop.f32.mrb[12].mxu1  ;;  %v804_v60 = vmax.f32 %v793_v57, 0.0  ;;  %v794_v61 = vadd.f32 %v1418_v8, %v756_v58  ;;  %v1083_v63 = vpop.f32.mrb[13].mxu0 }
 0x114   : > { %v1135_v52 = vpop.f32.mrb[13].mxu1  ;;  %v1084_v1 = vadd.f32 %v1083_v63, %v1082_v62  ;;  %v1085_v2 = vpop.f32.mrb[14].mxu0 }
 0x115   : > { %v1136_v50 = vadd.f32 %v1135_v52, %v1134_v48  ;;  %v1137_v55 = vpop.f32.mrb[14].mxu1  ;;  %v1041_v0 = vpack.c.bf16 %v804_v60, %v804_v60  ;;  %v805_v51 = vmax.f32 %v794_v61, 0.0  ;;  %v1086_v4 = vpop.f32.mrb[15].mxu0 }
 0x116   : > { %v1138_v56 = vpop.f32.mrb[15].mxu1  ;;  %v1087_v9 = vadd.f32 %v1086_v4, %v1085_v2 }
 0x117   : > { %v1139_v59 = vadd.f32 %v1138_v56, %v1137_v55  ;;  %861 = vst.msk [vmem:[%s1426_s10 + $0x10] sm:$0xf] %vm856_vm1, %v1041_v0  ;;  %v1042_v6 = vpack.c.bf16 %v805_v51, %v805_v51  ;;  %v761_v7 = vadd.f32 %v1136_v50, %v1084_v1 }
 0x119   : > { %862 = vst.msk [vmem:[%s1426_s10 + $0x14] sm:$0xf] %vm856_vm1, %v1042_v6  ;;  %v795_v13 = vadd.f32 %v1418_v8, %v761_v7  ;;  %v764_v14 = vadd.f32 %v1139_v59, %v1087_v9 }
 0x11a   : > { %v1088_v18 = vpop.f32.mrb[16].mxu0 }
 0x11b   : > { %v1140_v3 = vpop.f32.mrb[16].mxu1  ;;  %v806_v16 = vmax.f32 %v795_v13, 0.0  ;;  %v796_v17 = vadd.f32 %v1418_v8, %v764_v14  ;;  %v1089_v19 = vpop.f32.mrb[17].mxu0 }
 0x11c   : > { %v1141_v5 = vpop.f32.mrb[17].mxu1  ;;  %v1090_v22 = vadd.f32 %v1089_v19, %v1088_v18  ;;  %v1091_v23 = vpop.f32.mrb[18].mxu0 }
 0x11d   : > { %v1142_v10 = vadd.f32 %v1141_v5, %v1140_v3  ;;  %v1143_v11 = vpop.f32.mrb[18].mxu1  ;;  %v1043_v20 = vpack.c.bf16 %v806_v16, %v806_v16  ;;  %v807_v21 = vmax.f32 %v796_v17, 0.0  ;;  %v1092_v25 = vpop.f32.mrb[19].mxu0 }
 0x11e   : > { %v1144_v12 = vpop.f32.mrb[19].mxu1  ;;  %v1093_v29 = vadd.f32 %v1092_v25, %v1091_v23 }
 0x11f   : > { %v1145_v15 = vadd.f32 %v1144_v12, %v1143_v11  ;;  %863 = vst.msk [vmem:[%s1426_s10 + $0x18] sm:$0xf] %vm856_vm1, %v1043_v20  ;;  %v1044_v27 = vpack.c.bf16 %v807_v21, %v807_v21  ;;  %v769_v28 = vadd.f32 %v1142_v10, %v1090_v22 }
 0x121   : > { %864 = vst.msk [vmem:[%s1426_s10 + $0x1c] sm:$0xf] %vm856_vm1, %v1044_v27  ;;  %v797_v33 = vadd.f32 %v1418_v8, %v769_v28  ;;  %v772_v34 = vadd.f32 %v1145_v15, %v1093_v29 }
 0x122   : > { %v1094_v35 = vpop.f32.mrb[20].mxu0 }
 0x123   : > { %v1146_v24 = vpop.f32.mrb[20].mxu1  ;;  %v808_v36 = vmax.f32 %v797_v33, 0.0  ;;  %v798_v37 = vadd.f32 %v1418_v8, %v772_v34  ;;  %v1095_v38 = vpop.f32.mrb[21].mxu0 }
 0x124   : > { %v1147_v26 = vpop.f32.mrb[21].mxu1  ;;  %v1096_v41 = vadd.f32 %v1095_v38, %v1094_v35  ;;  %v1097_v42 = vpop.f32.mrb[22].mxu0 }
 0x125   : > { %v1148_v30 = vadd.f32 %v1147_v26, %v1146_v24  ;;  %v1149_v31 = vpop.f32.mrb[22].mxu1  ;;  %v1045_v39 = vpack.c.bf16 %v808_v36, %v808_v36  ;;  %v809_v40 = vmax.f32 %v798_v37, 0.0  ;;  %v1098_v43 = vpop.f32.mrb[23].mxu0 }
 0x126   : > { %v1150_v32 = vpop.f32.mrb[23].mxu1 }
 0x127   : > { %865 = vst.msk [vmem:[%s1426_s10 + $0x20] sm:$0xf] %vm856_vm1, %v1045_v39  ;;  %v1046_v44 = vpack.c.bf16 %v809_v40, %v809_v40  ;;  %v777_v46 = vadd.f32 %v1148_v30, %v1096_v41 }
 0x129   : > { %866 = vst.msk [vmem:[%s1426_s10 + $0x24] sm:$0xf] %vm856_vm1, %v1046_v44  ;;  %v799_v47 = vadd.f32 %v1418_v8, %v777_v46 }
 0x12b   : > { %v810_v48 = vmax.f32 %v799_v47, 0.0 }
 0x12d   : > { %v1047_v52 = vpack.c.bf16 %v810_v48, %v810_v48 }
 0x12f   : > { %v871_v53 = vsel %vm869_vm4, %v1047_v52, %v870_v49 }
 0x130   : > { %872 = vst [vmem:[%s1426_s10 + $0x28] sm:$0x1] %v871_v53 }
 0x131 PF: > { %s13_s12 = sadd.s32 1, %s1224_s12  }
 0x132   : > { %p10_p4 = scmp.ge.s32.totalorder %s13_s12, 4  }
 0x134   :  { %12 = sbr.rel (!%p10_p4) target bundleno = 1 (0x1), region = 63 }

// kernel: cnn_forward.6
= control target key start
LH: loop header
LB: loop body
LE: loop exit
PB: predicated region body
PF: predicated region fallthrough
CT: control target
= control target key end

     0   :  { %s1257_s12 = smov 0   ;;  %s1571_s0 = inlined_call_operand.vmem [shape: bf16[2,63,192], index: 0, kind: input, shape index: {}]   ;;  %s1572_s1 = inlined_call_operand.vmem [shape: bf16[3,192,64], index: 1, kind: input, shape index: {}]   ;;  %s1573_s2 = inlined_call_operand.vmem [shape: f32[1,64], index: 2, kind: input, shape index: {}]   ;;  %s1574_s3 = inlined_call_operand.vmem [shape: bf16[2,49,64], index: 3, kind: output, shape index: {}]  }
   0x1 LB: > { %s996_s13 = sadd.s32 4294967295, %s1234_s12   ;;  %p1000_p0 = scmp.ge.s32.totalorder %s1234_s12, 1  ;;  %s1234_s12 = sphi %s1257_s12, %s13_s12  }
   0x2   : > { %p137_p1 = scmp.lt.s32.totalorder %s1234_s12, 3 }
   0x4   : > { %p138_p2 = pnand %p1000_p0, %p137_p1 }
   0x5   : > { %v1172_v0 = vld [vmem:[%s1572_s1 + $0x60] sm:$0xff] (!%p138_p2)   ;;  %v1236_v1 = vmov (!%p138_p2), 0   ;;  %v1174_v3 = vld [vmem:[%s1572_s1 + $0x68] sm:$0xff] (!%p138_p2)   ;;  %v1176_v5 = vld [vmem:[%s1572_s1 + $0x70] sm:$0xff] (!%p138_p2)   ;;  %p161_p3 = scmp.lt.s32.totalorder (!%p138_p2), %s996_s13, 1  ;;  %vm406_vm0 = vcmask (!%p138_p2), 523264  }
   0x6   : > { %141 = sbr.rel (%p138_p2) target bundleno = 333 (0x14d), region = 32  ;;  %419 = vmatprep.subr.bf16.mxu0 (!%p138_p2), %v1236_v1  ;;  %579 = vmatprep.subr.bf16.mxu1 (!%p138_p2), %v1236_v1  ;;  %v1173_v2 = vld [vmem:[%s1572_s1] sm:$0xff] (!%p138_p2)   ;;  %v1175_v4 = vld [vmem:[%s1572_s1 + $0x8] sm:$0xff] (!%p138_p2)   ;;  %v1177_v6 = vld [vmem:[%s1572_s1 + $0x10] sm:$0xff] (!%p138_p2)   ;;  %vm259_vm1 = vsmask.f32 (!%p138_p2), 4352 }
   0x7   : > { %420 = vmatpush1.bf16.msra.mxu0 (!%p138_p2), %v1172_v0  ;;  %580 = vmatpush1.bf16.msra.mxu1 (!%p138_p2), %v1173_v2  ;;  %v1178_v7 = vld [vmem:[%s1572_s1 + $0x78] sm:$0xff] (!%p138_p2)   ;;  %v1180_v9 = vld [vmem:[%s1572_s1 + $0x80] sm:$0xff] (!%p138_p2)   ;;  %v1182_v11 = vld [vmem:[%s1572_s1 + $0x88] sm:$0xff] (!%p138_p2)   ;;  %vm704_vm2 = vcmask (!%p138_p2), 1044480   ;;  %vm928_vm3 = vcmask (!%p138_p2), 519168   ;;  %vm935_vm4 = vcmask (!%p138_p2), 516096  }
   0x8   : > { %421 = vmatprep.subr.bf16.mxu0 (!%p138_p2), %v1236_v1  ;;  %581 = vmatprep.subr.bf16.mxu1 (!%p138_p2), %v1236_v1  ;;  %v1179_v8 = vld [vmem:[%s1572_s1 + $0x18] sm:$0xff] (!%p138_p2)   ;;  %v1181_v10 = vld [vmem:[%s1572_s1 + $0x20] sm:$0xff] (!%p138_p2)   ;;  %v1183_v12 = vld [vmem:[%s1572_s1 + $0x28] sm:$0xff] (!%p138_p2)   ;;  %vm936_vm5 = vsmask.f32 (!%p138_p2), 256 }
   0x9   : > { %v1184_v13 = vld [vmem:[%s1572_s1 + $0x90] sm:$0xff] (!%p138_p2)   ;;  %v1186_v21 = vld [vmem:[%s1572_s1 + $0x98] sm:$0xff] (!%p138_p2)   ;;  %v1188_v31 = vld [vmem:[%s1572_s1 + $0xa0] sm:$0xff] (!%p138_p2)  }
   0xa   : > { %v1185_v14 = vld [vmem:[%s1572_s1 + $0x30] sm:$0xff] (!%p138_p2)   ;;  %v1187_v24 = vld [vmem:[%s1572_s1 + $0x38] sm:$0xff] (!%p138_p2)   ;;  %v1189_v32 = vld [vmem:[%s1572_s1 + $0x40] sm:$0xff] (!%p138_p2)  }
   0xb   : > { %422 = vmatpush1.bf16.msra.mxu0 (!%p138_p2), %v1174_v3  ;;  %582 = vmatpush1.bf16.msra.mxu1 (!%p138_p2), %v1175_v4  ;;  %v1190_v45 = vld [vmem:[%s1572_s1 + $0xa8] sm:$0xff] (!%p138_p2)   ;;  %v1192_v55 = vld [vmem:[%s1572_s1 + $0xb0] sm:$0xff] (!%p138_p2)   ;;  %v1194_v61 = vld [vmem:[%s1572_s1 + $0xb8] sm:$0xff] (!%p138_p2)  }
   0xc   : > { %423 = vmatprep.subr.bf16.mxu0 (!%p138_p2), %v1236_v1  ;;  %583 = vmatprep.subr.bf16.mxu1 (!%p138_p2), %v1236_v1  ;;  %v1191_v48 = vld [vmem:[%s1572_s1 + $0x48] sm:$0xff] (!%p138_p2)   ;;  %v1193_v58 = vld [vmem:[%s1572_s1 + $0x50] sm:$0xff] (!%p138_p2)   ;;  %vm937_vm6 = vmand (!%p138_p2), %vm935_vm4, %vm936_vm5 }
   0xd   : > { %s1576_s13 = smov (!%p161_p3, %s996_s13), 1 }
   0xe   : > { %s1130_s9 = sshll.u32 %s1576_s13, 6  ;;  %s1162_s18 = smul.u32 28, %s1576_s13 }
   0xf   : > { %424 = vmatpush1.bf16.msra.mxu0 %v1176_v5  ;;  %584 = vmatpush1.bf16.msra.mxu1 %v1177_v6  ;;  %s1323_s16 = scalar_lea.vmem %s1571_s0, %s1130_s9  ;;  %v1195_v5 = vld [vmem:[%s1572_s1 + $0x58] sm:$0xff]  }
  0x10   : > { %425 = vmatprep.subr.bf16.mxu0 %v1236_v1  ;;  %585 = vmatprep.subr.bf16.mxu1 %v1236_v1  ;;  %v1334_v15 = vld [vmem:[%s1323_s16 + $0x8] sm:$0xff]  ;;  %v1337_v16 = vld [vmem:[%s1323_s16 + $0x10] sm:$0xff]  ;;  %v1340_v17 = vld [vmem:[%s1323_s16 + $0x18] sm:$0xff]  ;;  %s1552_s21 = scalar_lea.vmem %s1574_s3, %s1162_s18 }
  0x11   : > { %v203_v18 = vld [vmem:[%s1323_s16] sm:$0x88]  ;;  %v1345_v19 = vcombine.high %v1337_v16, %v1340_v17  ;;  %v1364_v27 = vcombine.low %v1337_v16, %v1340_v17  ;;  %v1385_v44 = vld [vmem:[%s1323_s16 + $0x28] sm:$0xff]  ;;  %v1412_v57 = vld [vmem:[%s1323_s16 + $0x30] sm:$0xff] }
  0x12   : > { %v1348_v20 = vld [vmem:[%s1323_s16] sm:$0xff]  ;;  %v1029_v22 = vcombine.high %v203_v18, %v1334_v15  ;;  %v1028_v30 = vcombine.low %v203_v18, %v1334_v15  ;;  %v1035_v2 = vcombine.high %v1412_v57, %v1412_v57  ;;  %v1433_v6 = vld [vmem:[%s1323_s16 + $0x8] sm:$0x88] }
  0x13   : > { %426 = vmatpush1.bf16.msra.mxu0 %v1178_v7  ;;  %586 = vmatpush1.bf16.msra.mxu1 %v1179_v8  ;;  %v1053_v23 = vcombine.high %v1348_v20, %v1334_v15  ;;  %v286_v25 = vshrl.u32 %v1345_v19, 16  ;;  %v289_v26 = vshll.u32 %v1345_v19, 16  ;;  %v269_v38 = vshrl.u32 %v1364_v27, 16  ;;  %v1382_v43 = vld [vmem:[%s1323_s16 + $0x20] sm:$0xff] }
  0x14   : > { %427 = vmatprep.subr.bf16.mxu0 %v1236_v1  ;;  %587 = vmatprep.subr.bf16.mxu1 %v1236_v1  ;;  %v278_v28 = vshrl.u32 %v1029_v22, 16  ;;  %v281_v29 = vshll.u32 %v1029_v22, 16  ;;  %v272_v39 = vshll.u32 %v1364_v27, 16  ;;  %v261_v41 = vshrl.u32 %v1028_v30, 16 }
  0x15   : > { %1068 = vmatprep.mubr.msk.bf16.mxu1 %vm406_vm0, %v1053_v23  ;;  %v288_v33 = vrot.slane %v286_v25, 3  ;;  %v291_v34 = vrot.slane %v289_v26, 4  ;;  %v264_v42 = vshll.u32 %v1028_v30, 16  ;;  %v1394_v47 = vcombine.high %v1382_v43, %v1385_v44  ;;  %v1203_v26 = vld [vmem:[%s1572_s1 + $0xc8] sm:$0xff]  }
  0x16   : > { %v280_v35 = vrot.slane %v278_v28, 3  ;;  %v283_v36 = vrot.slane %v281_v29, 4  ;;  %v263_v49 = vrot.slane %v261_v41, 3  ;;  %v271_v51 = vrot.slane %v269_v38, 3  ;;  %v1206_v38 = vld [vmem:[%s1572_s1 + $0xe0] sm:$0xff]  }
  0x17   : > { %428 = vmatpush1.bf16.msra.mxu0 %v1180_v9  ;;  %588 = vmatpush1.bf16.msra.mxu1 %v1181_v10  ;;  %v1376_v37 = vor.u32 %v291_v34, %v288_v33  ;;  %v266_v50 = vrot.slane %v264_v42, 4  ;;  %v274_v52 = vrot.slane %v272_v39, 4  ;;  %v304_v53 = vshrl.u32 %v1394_v47, 16 }
  0x18   : > { %429 = vmatprep.subr.bf16.mxu0 %v1236_v1  ;;  %589 = vmatprep.subr.bf16.mxu1 %v1236_v1  ;;  %v284_v40 = vor.u32 %v283_v36, %v280_v35  ;;  %v307_v54 = vshll.u32 %v1394_v47, 16  ;;  %v1409_v56 = vcombine.low %v1382_v43, %v1385_v44  ;;  %v1098_v60 = vcombine.low %v1340_v17, %v1382_v43 }
  0x19   : > { %v275_v59 = vor.u32 %v274_v52, %v271_v51  ;;  %v267_v62 = vor.u32 %v266_v50, %v263_v49  ;;  %v306_v63 = vrot.slane %v304_v53, 3  ;;  %v1052_v7 = vcombine.low %v1348_v20, %v1334_v15  ;;  %v1213_v53 = vld [vmem:[%s1572_s1 + $0xf8] sm:$0xff]  }
  0x1a   : > { %v293_v46 = vsel %vm259_vm1, %v284_v40, %v1376_v37  ;;  %v309_v0 = vrot.slane %v307_v54, 4  ;;  %v295_v3 = vshrl.u32 %v1409_v56, 16  ;;  %v298_v4 = vshll.u32 %v1409_v56, 16  ;;  %v178_v40 = vld [vmem:[%s1323_s16 + $0x30] sm:$0x11] }
  0x1b   : > { %430 = vmatpush1.bf16.msra.mxu0 %v1182_v11  ;;  %590 = vmatpush1.bf16.msra.mxu1 %v1183_v12  ;;  %v1096_v8 = vcombine.low %v1433_v6, %v1337_v16  ;;  %v1440_v9 = vrot.slane %v1098_v60, 3  ;;  %v276_v10 = vsel %vm259_vm1, %v267_v62, %v275_v59  ;;  %v322_v12 = vshrl.u32 %v1035_v2, 16 }
  0x1c   : > { %431 = vmatprep.subr.bf16.mxu0 %v1236_v1  ;;  %591 = vmatprep.subr.bf16.mxu1 %v1236_v1  ;;  %v310_v11 = vor.u32 %v309_v0, %v306_v63  ;;  %v297_v18 = vrot.slane %v295_v3, 3  ;;  %v1034_v15 = vcombine.low %v1412_v57, %v1412_v57  ;;  %v1055_v41 = vcombine.high %v178_v40, %v178_v40 }
  0x1d   : > { %1048 = vmatprep.mubr.msk.bf16.mxu0 %vm406_vm0, %v293_v46  ;;  %v705_v20 = vrot.slane %v1096_v8, 3  ;;  %v1097_v42 = vcombine.high %v1433_v6, %v1337_v16  ;;  %v1209_v46 = vld [vmem:[%s1572_s1 + $0xe8] sm:$0xff]   ;;  %v1054_v49 = vcombine.low %v178_v40, %v178_v40 }
  0x1e   : > { %v311_v23 = vsel %vm259_vm1, %v1376_v37, %v310_v11  ;;  %v313_v29 = vshrl.u32 %v1034_v15, 16  ;;  %v316_v30 = vshll.u32 %v1034_v15, 16 }
  0x1f   : > { %432 = vmatpush1.bf16.msra.mxu0 %v1184_v13  ;;  %592 = vmatpush1.bf16.msra.mxu1 %v1185_v14  ;;  %v325_v13 = vshll.u32 %v1035_v2, 16  ;;  %v1202_v14 = vld [vmem:[%s1572_s1 + $0xc0] sm:$0xff]   ;;  %v1452_v22 = vsel %vm704_vm2, %v705_v20, %v1440_v9  ;;  %v708_v16 = vrot.slane %v1097_v42, 3 }
  0x20   : > { %433 = vmatprep.subr.bf16.mxu0 %v1236_v1  ;;  %593 = vmatprep.subr.bf16.mxu1 %v1236_v1  ;;  %v315_v34 = vrot.slane %v313_v29, 3  ;;  %v318_v35 = vrot.slane %v316_v30, 4 }
  0x21   : > { %v327_v25 = vrot.slane %v325_v13, 4 }
  0x22   : > { %v319_v37 = vor.u32 %v318_v35, %v315_v34 }
  0x23   : > { %434 = vmatpush1.bf16.msra.mxu0 %v1186_v21  ;;  %594 = vmatpush1.bf16.msra.mxu1 %v1187_v24  ;;  %v300_v21 = vrot.slane %v298_v4, 4  ;;  %v324_v24 = vrot.slane %v322_v12, 3 }
  0x24   : > { %435 = vmatprep.subr.bf16.mxu0 %v1236_v1  ;;  %595 = vmatprep.subr.bf16.mxu1 %v1236_v1 }
  0x25   : > { %v301_v28 = vor.u32 %v300_v21, %v297_v18 }
  0x27   : > { %436 = vmatpush1.bf16.msra.mxu0 %v1188_v31  ;;  %596 = vmatpush1.bf16.msra.mxu1 %v1189_v32  ;;  %v328_v31 = vor.u32 %v327_v25, %v324_v24  ;;  %v1204_v32 = vld [vmem:[%s1572_s1 + $0xd0] sm:$0xff]   ;;  %v302_v33 = vsel %vm259_vm1, %v275_v59, %v301_v28  ;;  %v320_v39 = vsel %vm259_vm1, %v301_v28, %v319_v37 }
  0x28   : > { %437 = vmatprep.subr.bf16.mxu0 %v1236_v1  ;;  %597 = vmatprep.subr.bf16.mxu1 %v1236_v1  ;;  %v1100_v59 = vcombine.low %v1385_v44, %v1412_v57 }
  0x29   : > { %v329_v36 = vsel %vm259_vm1, %v310_v11, %v328_v31 }
  0x2a   : > { %v711_v62 = vrot.slane %v1100_v59, 3 }
  0x2b   : > { %438 = vmatpush1.bf16.msra.mxu0 %v1190_v45  ;;  %598 = vmatpush1.bf16.msra.mxu1 %v1191_v48  ;;  %v1099_v45 = vcombine.high %v1340_v17, %v1382_v43  ;;  %v1210_v43 = vld [vmem:[%s1572_s1 + $0xf0] sm:$0xff]  }
  0x2c   : > { %439 = vmatprep.subr.bf16.mxu0 %v1236_v1  ;;  %599 = vmatprep.subr.bf16.mxu1 %v1236_v1 }
  0x2d   : > { %v709_v17 = vrot.slane %v1099_v45, 3  ;;  %v1120_v45 = vld [vmem:[%s1573_s2] ss:$0 sm:$0xff] }
  0x2f   : > { %440 = vmatpush1.bf16.msra.mxu0 %v1192_v55  ;;  %600 = vmatpush1.bf16.msra.mxu1 %v1193_v58  ;;  %v710_v52 = vsel %vm704_vm2, %v708_v16, %v709_v17  ;;  %v1214_v55 = vld [vmem:[%s1572_s1 + $0x100] sm:$0xff]   ;;  %v1218_v58 = vld [vmem:[%s1572_s1 + $0x110] sm:$0xff]  }
  0x30   : > { %441 = vmatprep.subr.bf16.mxu0 %v1236_v1  ;;  %601 = vmatprep.subr.bf16.mxu1 %v1236_v1 }
  0x33   : > { %442 = vmatpush1.bf16.msra.mxu0 %v1194_v61  ;;  %602 = vmatpush1.bf16.msra.mxu1 %v1195_v5  ;;  %v1219_v61 = vld [vmem:[%s1572_s1 + $0x118] sm:$0xff]  }
  0x34   : > { %807 = vmatprep.subr.bf16.mxu0 %v1236_v1  ;;  %1138 = vmatprep.subr.bf16.mxu1 %v1236_v1 }
  0x36   : > { %452 = vmatmul.mubr.bf16.vlgmr.msra.gmra.mrb[0].mxu0 %v276_v10  ;;  %612 = vmatmul.mubr.bf16.vlgmr.msra.gmra.mrb[0].mxu1 %v1052_v7 }
  0x37   : > { %808 = vmatpush1.bf16.msra.mxu0 %v1202_v14  ;;  %1150 = vmatpush1.bf16.msra.mxu1 %v1202_v14 }
  0x38   : > { %809 = vmatprep.subr.bf16.mxu0 %v1236_v1  ;;  %1139 = vmatprep.subr.bf16.mxu1 %v1236_v1 }
  0x39   : > { %1049 = vmatprep.mubr.msk.bf16.mxu0 %vm406_vm0, %v311_v23  ;;  %1069 = vmatprep.mubr.msk.bf16.mxu1 %vm406_vm0, %v1345_v19  ;;  %v1205_v19 = vld [vmem:[%s1572_s1 + $0xd8] sm:$0xff]  }
  0x3b   : > { %810 = vmatpush1.bf16.msra.mxu0 %v1203_v26  ;;  %1151 = vmatpush1.bf16.msra.mxu1 %v1203_v26 }
  0x3c   : > { %811 = vmatprep.subr.bf16.mxu0 %v1236_v1  ;;  %1140 = vmatprep.subr.bf16.mxu1 %v1236_v1 }
  0x3e   : > { %460 = vmatmul.mubr.bf16.gmra.mrb[4].mxu0 %v302_v33  ;;  %620 = vmatmul.mubr.bf16.gmra.mrb[4].mxu1 %v1364_v27  ;;  %v649_v27 = vld [vmem:[%s1323_s16 + $0x38] sm:$0xff] }
  0x3f   : > { %812 = vmatpush1.bf16.msra.mxu0 %v1204_v32  ;;  %1152 = vmatpush1.bf16.msra.mxu1 %v1204_v32  ;;  %v1103_v48 = vcombine.high %v649_v27, %v649_v27  ;;  %v1102_v60 = vcombine.low %v649_v27, %v649_v27 }
  0x40   : > { %813 = vmatprep.subr.bf16.mxu0 %v1236_v1  ;;  %1141 = vmatprep.subr.bf16.mxu1 %v1236_v1 }
  0x41   : > { %1050 = vmatprep.mubr.msk.bf16.mxu0 %vm406_vm0, %v329_v36  ;;  %1070 = vmatprep.mubr.msk.bf16.mxu1 %vm406_vm0, %v1394_v47  ;;  %v1101_v47 = vcombine.high %v1385_v44, %v1412_v57  ;;  %v717_v51 = vrot.slane %v1103_v48, 3  ;;  %v715_v63 = vrot.slane %v1102_v60, 3  ;;  %v712_v57 = vsel %vm704_vm2, %v1440_v9, %v711_v62 }
  0x43   : > { %814 = vmatpush1.bf16.msra.mxu0 %v1205_v19  ;;  %1153 = vmatpush1.bf16.msra.mxu1 %v1205_v19  ;;  %v713_v50 = vrot.slane %v1101_v47, 3  ;;  %v716_v0 = vsel %vm704_vm2, %v711_v62, %v715_v63 }
  0x44   : > { %815 = vmatprep.subr.bf16.mxu0 %v1236_v1  ;;  %1142 = vmatprep.subr.bf16.mxu1 %v1236_v1 }
  0x45   : > { %v718_v54 = vsel %vm704_vm2, %v713_v50, %v717_v51  ;;  %v714_v44 = vsel %vm704_vm2, %v709_v17, %v713_v50 }
  0x46   : > { %468 = vmatmul.mubr.bf16.gmra.mrb[8].mxu0 %v320_v39  ;;  %628 = vmatmul.mubr.bf16.gmra.mrb[8].mxu1 %v1409_v56  ;;  %v1216_v56 = vld [vmem:[%s1572_s1 + $0x108] sm:$0xff]  }
  0x47   : > { %816 = vmatpush1.bf16.msra.mxu0 %v1206_v38  ;;  %1154 = vmatpush1.bf16.msra.mxu1 %v1206_v38 }
  0x48   : > { %817 = vmatprep.subr.bf16.mxu0 %v1236_v1  ;;  %1143 = vmatprep.subr.bf16.mxu1 %v1236_v1 }
  0x49   : > { %1051 = vmatprep.mubr.msk.bf16.mxu0 %vm406_vm0, %v324_v24  ;;  %1071 = vmatprep.mubr.msk.bf16.mxu1 %vm406_vm0, %v1055_v41 }
  0x4b   : > { %818 = vmatpush1.bf16.msra.mxu0 %v1209_v46  ;;  %1155 = vmatpush1.bf16.msra.mxu1 %v1209_v46 }
  0x4c   : > { %819 = vmatprep.subr.bf16.mxu0 %v1236_v1  ;;  %1144 = vmatprep.subr.bf16.mxu1 %v1236_v1 }
  0x4e   : > { %476 = vmatmul.mubr.bf16.gmra.mrb[12].mxu0 %v315_v34  ;;  %636 = vmatmul.mubr.bf16.gmra.mrb[12].mxu1 %v1054_v49 }
  0x4f   : > { %820 = vmatpush1.bf16.msra.mxu0 %v1210_v43  ;;  %1156 = vmatpush1.bf16.msra.mxu1 %v1210_v43 }
  0x50   : > { %821 = vmatprep.subr.bf16.mxu0 %v1236_v1  ;;  %1145 = vmatprep.subr.bf16.mxu1 %v1236_v1 }
  0x51   : > { %1116 = vmatprep.mubr.msk.bf16.mxu0 %vm406_vm0, %v710_v52  ;;  %1118 = vmatprep.mubr.msk.bf16.mxu1 %vm406_vm0, %v718_v54 }
  0x53   : > { %822 = vmatpush1.bf16.msra.mxu0 %v1213_v53  ;;  %1157 = vmatpush1.bf16.msra.mxu1 %v1213_v53 }
  0x54   : > { %823 = vmatprep.subr.bf16.mxu0 %v1236_v1  ;;  %1146 = vmatprep.subr.bf16.mxu1 %v1236_v1 }
  0x57   : > { %824 = vmatpush1.bf16.msra.mxu0 %v1214_v55  ;;  %1158 = vmatpush1.bf16.msra.mxu1 %v1214_v55 }
  0x58   : > { %825 = vmatprep.subr.bf16.mxu0 %v1236_v1  ;;  %1147 = vmatprep.subr.bf16.mxu1 %v1236_v1 }
  0x5b   : > { %826 = vmatpush1.bf16.msra.mxu0 %v1216_v56  ;;  %1159 = vmatpush1.bf16.msra.mxu1 %v1216_v56 }
  0x5c   : > { %827 = vmatprep.subr.bf16.mxu0 %v1236_v1  ;;  %1148 = vmatprep.subr.bf16.mxu1 %v1236_v1 }
  0x5f   : > { %828 = vmatpush1.bf16.msra.mxu0 %v1218_v58  ;;  %1160 = vmatpush1.bf16.msra.mxu1 %v1218_v58 }
  0x60   : > { %829 = vmatprep.subr.bf16.mxu0 %v1236_v1  ;;  %1149 = vmatprep.subr.bf16.mxu1 %v1236_v1 }
  0x63   : > { %830 = vmatpush1.bf16.msra.mxu0 %v1219_v61  ;;  %1161 = vmatpush1.bf16.msra.mxu1 %v1219_v61 }
  0x66   : > { %840 = vmatmul.mubr.bf16.vlgmr.msra.gmra.mrb[16].mxu0 %v1452_v22  ;;  %856 = vmatmul.mubr.bf16.vlgmr.msra.gmra.mrb[16].mxu1 %v716_v0 }
  0x67   : > { %1117 = vmatprep.mubr.msk.bf16.mxu0 %vm406_vm0, %v714_v44  ;;  %1119 = vmatprep.mubr.msk.bf16.mxu1 %vm406_vm0, %v717_v51 }
  0x6e   : > { %848 = vmatmul.mubr.bf16.gmra.mrb[20].mxu0 %v712_v57  ;;  %864 = vmatmul.mubr.bf16.gmra.mrb[20].mxu1 %v715_v63 }
 0x109   : > { %v453_v2 = vpop.f32.mrb[0].mxu0  ;;  %v613_v1 = vpop.f32.mrb[0].mxu1 }
 0x10a   : > { %v455_v3 = vpop.f32.mrb[1].mxu0  ;;  %v614_v4 = vadd.f32 %v613_v1, %v453_v2  ;;  %v615_v5 = vpop.f32.mrb[1].mxu1 }
 0x10b   : > { %v456_v6 = vpop.f32.mrb[2].mxu0  ;;  %v616_v7 = vpop.f32.mrb[2].mxu1 }
 0x10c   : > { %v458_v8 = vpop.f32.mrb[3].mxu0  ;;  %v617_v10 = vadd.f32 %v616_v7, %v456_v6  ;;  %v618_v11 = vpop.f32.mrb[3].mxu1 }
 0x111   : > { %v461_v12 = vpop.f32.mrb[4].mxu0  ;;  %v621_v14 = vpop.f32.mrb[4].mxu1 }
 0x112   : > { %v463_v13 = vpop.f32.mrb[5].mxu0  ;;  %v622_v18 = vadd.f32 %v621_v14, %v461_v12  ;;  %v623_v15 = vpop.f32.mrb[5].mxu1 }
 0x113   : > { %v464_v21 = vpop.f32.mrb[6].mxu0  ;;  %v624_v9 = vpop.f32.mrb[6].mxu1 }
 0x114   : > { %v466_v20 = vpop.f32.mrb[7].mxu0  ;;  %v625_v22 = vadd.f32 %v624_v9, %v464_v21  ;;  %v626_v23 = vpop.f32.mrb[7].mxu1  ;;  %v938_v9 = vld [vmem:[%s1552_s21 + $0x18] sm:$0x1] }
 0x119   : > { %v469_v24 = vpop.f32.mrb[8].mxu0  ;;  %v629_v26 = vpop.f32.mrb[8].mxu1 }
 0x11a   : > { %v471_v25 = vpop.f32.mrb[9].mxu0  ;;  %v630_v28 = vadd.f32 %v629_v26, %v469_v24  ;;  %v631_v30 = vpop.f32.mrb[9].mxu1 }
 0x11b   : > { %v472_v29 = vpop.f32.mrb[10].mxu0  ;;  %v632_v32 = vpop.f32.mrb[10].mxu1 }
 0x11c   : > { %v474_v31 = vpop.f32.mrb[11].mxu0  ;;  %v633_v33 = vadd.f32 %v632_v32, %v472_v29  ;;  %v634_v34 = vpop.f32.mrb[11].mxu1 }
 0x121   : > { %v477_v35 = vpop.f32.mrb[12].mxu0  ;;  %v637_v19 = vpop.f32.mrb[12].mxu1 }
 0x122   : > { %v479_v36 = vpop.f32.mrb[13].mxu0  ;;  %v638_v37 = vadd.f32 %v637_v19, %v477_v35  ;;  %v639_v39 = vpop.f32.mrb[13].mxu1 }
 0x123   : > { %v480_v38 = vpop.f32.mrb[14].mxu0  ;;  %v640_v27 = vpop.f32.mrb[14].mxu1 }
 0x124   : > { %v481_v40 = vpop.f32.mrb[15].mxu0  ;;  %v641_v41 = vpop.f32.mrb[15].mxu1 }
 0x139   : > { %v841_v42 = vpop.f32.mrb[16].mxu0  ;;  %v857_v47 = vpop.f32.mrb[16].mxu1 }
 0x13a   : > { %v871_v46 = vadd.f32 %v841_v42, %v614_v4  ;;  %v843_v48 = vpop.f32.mrb[17].mxu0  ;;  %v875_v16 = vadd.f32 %v857_v47, %v630_v28  ;;  %v859_v17 = vpop.f32.mrb[17].mxu1 }
 0x13b   : > { %v844_v43 = vpop.f32.mrb[18].mxu0  ;;  %v860_v51 = vpop.f32.mrb[18].mxu1 }
 0x13c   : > { %v885_v49 = vadd.f32 %v1120_v45, %v871_v46  ;;  %v872_v50 = vadd.f32 %v844_v43, %v617_v10  ;;  %v846_v52 = vpop.f32.mrb[19].mxu0  ;;  %v889_v53 = vadd.f32 %v1120_v45, %v875_v16  ;;  %v876_v54 = vadd.f32 %v860_v51, %v633_v33  ;;  %v862_v55 = vpop.f32.mrb[19].mxu1 }
 0x13e   : > { %v892_v56 = vmax.f32 %v885_v49, 0.0  ;;  %v886_v58 = vadd.f32 %v1120_v45, %v872_v50  ;;  %v896_v59 = vmax.f32 %v889_v53, 0.0  ;;  %v890_v60 = vadd.f32 %v1120_v45, %v876_v54 }
 0x140   : > { %v1131_v61 = vpack.c.bf16 %v892_v56, %v892_v56  ;;  %v893_v62 = vmax.f32 %v886_v58, 0.0  ;;  %v1135_v63 = vpack.c.bf16 %v896_v59, %v896_v59  ;;  %v897_v0 = vmax.f32 %v890_v60, 0.0 }
 0x141   : > { %v849_v44 = vpop.f32.mrb[20].mxu0  ;;  %v865_v1 = vpop.f32.mrb[20].mxu1 }
 0x142   : > { %929 = vst.msk [vmem:[%s1552_s21] sm:$0xf] %vm928_vm3, %v1131_v61  ;;  %v1132_v57 = vpack.c.bf16 %v893_v62, %v893_v62  ;;  %v873_v2 = vadd.f32 %v849_v44, %v622_v18  ;;  %v851_v3 = vpop.f32.mrb[21].mxu0  ;;  %933 = vst.msk [vmem:[%s1552_s21 + $0x10] sm:$0xf] %vm928_vm3, %v1135_v63  ;;  %v1136_v4 = vpack.c.bf16 %v897_v0, %v897_v0  ;;  %v867_v6 = vpop.f32.mrb[21].mxu1 }
 0x143   : > { %v877_v5 = vadd.f32 %v865_v1, %v638_v37  ;;  %v852_v7 = vpop.f32.mrb[22].mxu0  ;;  %v868_v11 = vpop.f32.mrb[22].mxu1 }
 0x144   : > { %930 = vst.msk [vmem:[%s1552_s21 + $0x4] sm:$0xf] %vm928_vm3, %v1132_v57  ;;  %v887_v8 = vadd.f32 %v1120_v45, %v873_v2  ;;  %v874_v10 = vadd.f32 %v852_v7, %v625_v22  ;;  %v854_v12 = vpop.f32.mrb[23].mxu0  ;;  %934 = vst.msk [vmem:[%s1552_s21 + $0x14] sm:$0xf] %vm928_vm3, %v1136_v4  ;;  %v869_v14 = vpop.f32.mrb[23].mxu1 }
 0x145   : > { %v891_v13 = vadd.f32 %v1120_v45, %v877_v5 }
 0x146   : > { %v894_v18 = vmax.f32 %v887_v8, 0.0  ;;  %v888_v21 = vadd.f32 %v1120_v45, %v874_v10 }
 0x147   : > { %v898_v15 = vmax.f32 %v891_v13, 0.0 }
 0x148   : > { %v1133_v20 = vpack.c.bf16 %v894_v18, %v894_v18  ;;  %v895_v23 = vmax.f32 %v888_v21, 0.0 }
 0x149   : > { %v1137_v24 = vpack.c.bf16 %v898_v15, %v898_v15 }
 0x14a   : > { %931 = vst.msk [vmem:[%s1552_s21 + $0x8] sm:$0xf] %vm928_vm3, %v1133_v20  ;;  %v1134_v22 = vpack.c.bf16 %v895_v23, %v895_v23 }
 0x14b   : > { %v939_v25 = vsel %vm937_vm6, %v1137_v24, %v938_v9 }
 0x14c   : > { %940 = vst [vmem:[%s1552_s21 + $0x18] sm:$0x1] %v939_v25  ;;  %932 = vst.msk [vmem:[%s1552_s21 + $0xc] sm:$0xf] %vm928_vm3, %v1134_v22 }
 0x14d PF: > { %s13_s12 = sadd.s32 1, %s1234_s12  }
 0x14e   : > { %p10_p4 = scmp.ge.s32.totalorder %s13_s12, 4  }
 0x150   :  { %12 = sbr.rel (!%p10_p4) target bundleno = 1 (0x1), region = 64 }

// kernel: cnn_forward.7
= control target key start
LH: loop header
LB: loop body
LE: loop exit
PB: predicated region body
PF: predicated region fallthrough
CT: control target
= control target key end

     0   :  { %vm4847_vm0 = vcmask 523264   ;;  %s11088_s1 = inlined_call_operand.vmem [shape: bf16[3136,512], index: 1, kind: input, shape index: {}]   ;;  %s11089_s0 = inlined_call_operand.vmem [shape: bf16[8,3136], index: 0, kind: input, shape index: {}]   ;;  %s11090_s3 = inlined_call_operand.vmem [shape: bf16[512,128], index: 3, kind: input, shape index: {}]   ;;  %s11091_s2 = inlined_call_operand.vmem [shape: f32[1,512], index: 2, kind: input, shape index: {}]   ;;  %s11092_s4 = inlined_call_operand.vmem [shape: f32[1,128], index: 4, kind: input, shape index: {}]   ;;  %s11093_s5 = inlined_call_operand.vmem [shape: f32[8,128], index: 5, kind: output, shape index: {}]  }
   0x1   :  { %v7262_v0 = vld [vmem:[%s11088_s1 + $0x4] ss:$16 sps:$4 sm:$0xff]   ;;  %v7264_v1 = vld [vmem:[%s11088_s1 + $0xc] ss:$16 sps:$4 sm:$0xff]   ;;  %v7266_v2 = vld [vmem:[%s11088_s1] ss:$16 sps:$4 sm:$0xff]  }
   0x2   :  { %4851 = vmatprep.subr.bf16.mxu0 %v7262_v0  ;;  %v7267_v3 = vld [vmem:[%s11088_s1 + $0x8] ss:$16 sps:$4 sm:$0xff]   ;;  %5384 = vmatprep.subr.bf16.mxu1 %v7264_v1  ;;  %v7268_v4 = vld [vmem:[%s11088_s1 + $0x24] ss:$16 sps:$4 sm:$0xff]   ;;  %v7270_v5 = vld [vmem:[%s11088_s1 + $0x2c] ss:$16 sps:$4 sm:$0xff]  }
   0x3   :  { %4852 = vmatpush1.bf16.msra.mxu0 %v7266_v2  ;;  %5385 = vmatpush1.bf16.msra.mxu1 %v7267_v3  ;;  %v7272_v6 = vld [vmem:[%s11088_s1 + $0x20] ss:$16 sps:$4 sm:$0xff]   ;;  %v7273_v7 = vld [vmem:[%s11088_s1 + $0x28] ss:$16 sps:$4 sm:$0xff]   ;;  %v7274_v8 = vld [vmem:[%s11088_s1 + $0x44] ss:$16 sps:$4 sm:$0xff]  }
   0x4   :  { %4853 = vmatprep.subr.bf16.mxu0 %v7268_v4  ;;  %5386 = vmatprep.subr.bf16.mxu1 %v7270_v5  ;;  %v7276_v9 = vld [vmem:[%s11088_s1 + $0x4c] ss:$16 sps:$4 sm:$0xff]   ;;  %v7278_v10 = vld [vmem:[%s11088_s1 + $0x40] ss:$16 sps:$4 sm:$0xff]   ;;  %v7279_v11 = vld [vmem:[%s11088_s1 + $0x48] ss:$16 sps:$4 sm:$0xff]  }
   0x5   :  { %v7280_v12 = vld [vmem:[%s11088_s1 + $0x64] ss:$16 sps:$4 sm:$0xff]   ;;  %v7282_v13 = vld [vmem:[%s11088_s1 + $0x6c] ss:$16 sps:$4 sm:$0xff]   ;;  %v7284_v14 = vld [vmem:[%s11088_s1 + $0x60] ss:$16 sps:$4 sm:$0xff]  }
   0x6   :  { %v7285_v15 = vld [vmem:[%s11088_s1 + $0x68] ss:$16 sps:$4 sm:$0xff]   ;;  %v7286_v16 = vld [vmem:[%s11088_s1 + $0x84] ss:$16 sps:$4 sm:$0xff]   ;;  %v7288_v17 = vld [vmem:[%s11088_s1 + $0x8c] ss:$16 sps:$4 sm:$0xff]  }
   0x7   :  { %4854 = vmatpush1.bf16.msra.mxu0 %v7272_v6  ;;  %5387 = vmatpush1.bf16.msra.mxu1 %v7273_v7  ;;  %v7290_v18 = vld [vmem:[%s11088_s1 + $0x80] ss:$16 sps:$4 sm:$0xff]   ;;  %v7291_v19 = vld [vmem:[%s11088_s1 + $0x88] ss:$16 sps:$4 sm:$0xff]   ;;  %v7292_v20 = vld [vmem:[%s11088_s1 + $0xa4] ss:$16 sps:$4 sm:$0xff]  }
   0x8   :  { %4855 = vmatprep.subr.bf16.mxu0 %v7274_v8  ;;  %5388 = vmatprep.subr.bf16.mxu1 %v7276_v9  ;;  %v7294_v21 = vld [vmem:[%s11088_s1 + $0xac] ss:$16 sps:$4 sm:$0xff]   ;;  %v7296_v22 = vld [vmem:[%s11088_s1 + $0xa0] ss:$16 sps:$4 sm:$0xff]   ;;  %v7297_v23 = vld [vmem:[%s11088_s1 + $0xa8] ss:$16 sps:$4 sm:$0xff]  }
   0x9   :  { %v7298_v24 = vld [vmem:[%s11088_s1 + $0xc4] ss:$16 sps:$4 sm:$0xff]   ;;  %v7300_v25 = vld [vmem:[%s11088_s1 + $0xcc] ss:$16 sps:$4 sm:$0xff]   ;;  %v7302_v26 = vld [vmem:[%s11088_s1 + $0xc0] ss:$16 sps:$4 sm:$0xff]  }
   0xa   :  { %v7303_v27 = vld [vmem:[%s11088_s1 + $0xc8] ss:$16 sps:$4 sm:$0xff]   ;;  %v7304_v28 = vld [vmem:[%s11088_s1 + $0xe4] ss:$16 sps:$4 sm:$0xff]   ;;  %v7306_v29 = vld [vmem:[%s11088_s1 + $0xec] ss:$16 sps:$4 sm:$0xff]  }
   0xb   :  { %4856 = vmatpush1.bf16.msra.mxu0 %v7278_v10  ;;  %5389 = vmatpush1.bf16.msra.mxu1 %v7279_v11  ;;  %v7308_v30 = vld [vmem:[%s11088_s1 + $0xe0] ss:$16 sps:$4 sm:$0xff]   ;;  %v7309_v31 = vld [vmem:[%s11088_s1 + $0xe8] ss:$16 sps:$4 sm:$0xff]   ;;  %v7310_v32 = vld [vmem:[%s11088_s1 + $0x104] ss:$16 sps:$4 sm:$0xff]  }
   0xc   :  { %4857 = vmatprep.subr.bf16.mxu0 %v7280_v12  ;;  %5390 = vmatprep.subr.bf16.mxu1 %v7282_v13  ;;  %v7312_v33 = vld [vmem:[%s11088_s1 + $0x10c] ss:$16 sps:$4 sm:$0xff]   ;;  %v7314_v34 = vld [vmem:[%s11088_s1 + $0x100] ss:$16 sps:$4 sm:$0xff]   ;;  %v7315_v35 = vld [vmem:[%s11088_s1 + $0x108] ss:$16 sps:$4 sm:$0xff]  }
   0xd   :  { %v7316_v36 = vld [vmem:[%s11088_s1 + $0x124] ss:$16 sps:$4 sm:$0xff]   ;;  %v7318_v37 = vld [vmem:[%s11088_s1 + $0x12c] ss:$16 sps:$4 sm:$0xff]   ;;  %v7320_v38 = vld [vmem:[%s11088_s1 + $0x120] ss:$16 sps:$4 sm:$0xff]  }
   0xe   :  { %v7321_v39 = vld [vmem:[%s11088_s1 + $0x128] ss:$16 sps:$4 sm:$0xff]   ;;  %v7322_v40 = vld [vmem:[%s11088_s1 + $0x144] ss:$16 sps:$4 sm:$0xff]   ;;  %v7324_v41 = vld [vmem:[%s11088_s1 + $0x14c] ss:$16 sps:$4 sm:$0xff]  }
   0xf   :  { %4858 = vmatpush1.bf16.msra.mxu0 %v7284_v14  ;;  %5391 = vmatpush1.bf16.msra.mxu1 %v7285_v15  ;;  %v7326_v42 = vld [vmem:[%s11088_s1 + $0x140] ss:$16 sps:$4 sm:$0xff]   ;;  %v7327_v43 = vld [vmem:[%s11088_s1 + $0x148] ss:$16 sps:$4 sm:$0xff]   ;;  %v7328_v44 = vld [vmem:[%s11088_s1 + $0x164] ss:$16 sps:$4 sm:$0xff]  }
  0x10   :  { %4859 = vmatprep.subr.bf16.mxu0 %v7286_v16  ;;  %5392 = vmatprep.subr.bf16.mxu1 %v7288_v17  ;;  %v7330_v45 = vld [vmem:[%s11088_s1 + $0x16c] ss:$16 sps:$4 sm:$0xff]   ;;  %v21_v46 = vld [vmem:[%s11089_s0] sm:$0xff]  ;;  %v7333_v49 = vld [vmem:[%s11088_s1 + $0x168] ss:$16 sps:$4 sm:$0xff]  }
  0x11   :  { %v7332_v47 = vld [vmem:[%s11088_s1 + $0x160] ss:$16 sps:$4 sm:$0xff]   ;;  %v6274_v48 = vcombine.high %v21_v46, %v21_v46  ;;  %v7334_v50 = vld [vmem:[%s11088_s1 + $0x184] ss:$16 sps:$4 sm:$0xff]   ;;  %v7336_v51 = vld [vmem:[%s11088_s1 + $0x18c] ss:$16 sps:$4 sm:$0xff]   ;;  %v6273_v4 = vcombine.low %v21_v46, %v21_v46 }
  0x12   :  { %v7338_v52 = vld [vmem:[%s11088_s1 + $0x180] ss:$16 sps:$4 sm:$0xff]   ;;  %v7339_v53 = vld [vmem:[%s11088_s1 + $0x188] ss:$16 sps:$4 sm:$0xff]   ;;  %v7340_v54 = vld [vmem:[%s11088_s1 + $0x1a4] ss:$16 sps:$4 sm:$0xff]  }
  0x13   :  { %4860 = vmatpush1.bf16.msra.mxu0 %v7290_v18  ;;  %5393 = vmatpush1.bf16.msra.mxu1 %v7291_v19  ;;  %v7342_v55 = vld [vmem:[%s11088_s1 + $0x1ac] ss:$16 sps:$4 sm:$0xff]   ;;  %v7344_v56 = vld [vmem:[%s11088_s1 + $0x1a0] ss:$16 sps:$4 sm:$0xff]   ;;  %v7345_v57 = vld [vmem:[%s11088_s1 + $0x1a8] ss:$16 sps:$4 sm:$0xff]  }
  0x14   :  { %4861 = vmatprep.subr.bf16.mxu0 %v7292_v20  ;;  %5394 = vmatprep.subr.bf16.mxu1 %v7294_v21  ;;  %v7346_v58 = vld [vmem:[%s11088_s1 + $0x1c4] ss:$16 sps:$4 sm:$0xff]   ;;  %v7348_v59 = vld [vmem:[%s11088_s1 + $0x1cc] ss:$16 sps:$4 sm:$0xff]   ;;  %v7350_v60 = vld [vmem:[%s11088_s1 + $0x1c0] ss:$16 sps:$4 sm:$0xff]  }
  0x15   :  { %4883 = vmatprep.mubr.bf16.mxu0 %v6274_v48  ;;  %5416 = vmatprep.mubr.bf16.mxu1 %v6274_v48  ;;  %v7351_v61 = vld [vmem:[%s11088_s1 + $0x1c8] ss:$16 sps:$4 sm:$0xff]   ;;  %v7352_v62 = vld [vmem:[%s11088_s1 + $0x1e4] ss:$16 sps:$4 sm:$0xff]   ;;  %v7354_v63 = vld [vmem:[%s11088_s1 + $0x1ec] ss:$16 sps:$4 sm:$0xff]  }
  0x16   :  { %v7356_v0 = vld [vmem:[%s11088_s1 + $0x1e0] ss:$16 sps:$4 sm:$0xff]   ;;  %v7357_v1 = vld [vmem:[%s11088_s1 + $0x1e8] ss:$16 sps:$4 sm:$0xff]   ;;  %v7362_v2 = vld [vmem:[%s11088_s1 + $0x204] ss:$16 sps:$4 sm:$0xff]  }
  0x17   :  { %4862 = vmatpush1.bf16.msra.mxu0 %v7296_v22  ;;  %5395 = vmatpush1.bf16.msra.mxu1 %v7297_v23  ;;  %v7365_v3 = vld [vmem:[%s11088_s1 + $0x20c] ss:$16 sps:$4 sm:$0xff]   ;;  %v7360_v5 = vld [vmem:[%s11088_s1 + $0x200] ss:$16 sps:$4 sm:$0xff]   ;;  %v7363_v6 = vld [vmem:[%s11088_s1 + $0x208] ss:$16 sps:$4 sm:$0xff]  }
  0x18   :  { %4863 = vmatprep.subr.bf16.mxu0 %v7298_v24  ;;  %5396 = vmatprep.subr.bf16.mxu1 %v7300_v25  ;;  %v7368_v7 = vld [vmem:[%s11088_s1 + $0x224] ss:$16 sps:$4 sm:$0xff]   ;;  %v7371_v8 = vld [vmem:[%s11088_s1 + $0x22c] ss:$16 sps:$4 sm:$0xff]   ;;  %v7366_v9 = vld [vmem:[%s11088_s1 + $0x220] ss:$16 sps:$4 sm:$0xff]  }
  0x19   :  { %v7369_v10 = vld [vmem:[%s11088_s1 + $0x228] ss:$16 sps:$4 sm:$0xff]   ;;  %v7374_v11 = vld [vmem:[%s11088_s1 + $0x244] ss:$16 sps:$4 sm:$0xff]   ;;  %v7377_v12 = vld [vmem:[%s11088_s1 + $0x24c] ss:$16 sps:$4 sm:$0xff]  }
  0x1a   :  { %v7372_v13 = vld [vmem:[%s11088_s1 + $0x240] ss:$16 sps:$4 sm:$0xff]   ;;  %v7375_v14 = vld [vmem:[%s11088_s1 + $0x248] ss:$16 sps:$4 sm:$0xff]   ;;  %v7380_v15 = vld [vmem:[%s11088_s1 + $0x264] ss:$16 sps:$4 sm:$0xff]  }
  0x1b   :  { %4864 = vmatpush1.bf16.msra.mxu0 %v7302_v26  ;;  %5397 = vmatpush1.bf16.msra.mxu1 %v7303_v27  ;;  %v7383_v16 = vld [vmem:[%s11088_s1 + $0x26c] ss:$16 sps:$4 sm:$0xff]   ;;  %v7378_v17 = vld [vmem:[%s11088_s1 + $0x260] ss:$16 sps:$4 sm:$0xff]   ;;  %v7381_v18 = vld [vmem:[%s11088_s1 + $0x268] ss:$16 sps:$4 sm:$0xff]  }
  0x1c   :  { %4865 = vmatprep.subr.bf16.mxu0 %v7304_v28  ;;  %5398 = vmatprep.subr.bf16.mxu1 %v7306_v29  ;;  %v7386_v19 = vld [vmem:[%s11088_s1 + $0x284] ss:$16 sps:$4 sm:$0xff]   ;;  %v7389_v20 = vld [vmem:[%s11088_s1 + $0x28c] ss:$16 sps:$4 sm:$0xff]   ;;  %v7384_v21 = vld [vmem:[%s11088_s1 + $0x280] ss:$16 sps:$4 sm:$0xff]  }
  0x1d   :  { %v7387_v22 = vld [vmem:[%s11088_s1 + $0x288] ss:$16 sps:$4 sm:$0xff]   ;;  %v7392_v23 = vld [vmem:[%s11088_s1 + $0x2a4] ss:$16 sps:$4 sm:$0xff]   ;;  %v7395_v24 = vld [vmem:[%s11088_s1 + $0x2ac] ss:$16 sps:$4 sm:$0xff]  }
  0x1e   :  { %v7390_v25 = vld [vmem:[%s11088_s1 + $0x2a0] ss:$16 sps:$4 sm:$0xff]   ;;  %v7393_v26 = vld [vmem:[%s11088_s1 + $0x2a8] ss:$16 sps:$4 sm:$0xff]   ;;  %v7398_v27 = vld [vmem:[%s11088_s1 + $0x2c4] ss:$16 sps:$4 sm:$0xff]  }
  0x1f   :  { %4866 = vmatpush1.bf16.msra.mxu0 %v7308_v30  ;;  %5399 = vmatpush1.bf16.msra.mxu1 %v7309_v31  ;;  %v7401_v28 = vld [vmem:[%s11088_s1 + $0x2cc] ss:$16 sps:$4 sm:$0xff]   ;;  %v7396_v31 = vld [vmem:[%s11088_s1 + $0x2c0] ss:$16 sps:$4 sm:$0xff]   ;;  %v7423_v48 = vld [vmem:[%s11088_s1 + $0x348] ss:$16 sps:$4 sm:$0xff]  }
  0x20   :  { %4867 = vmatprep.subr.bf16.mxu0 %v7310_v32  ;;  %5400 = vmatprep.subr.bf16.mxu1 %v7312_v33  ;;  %v8802_v29 = vld [vmem:[%s11089_s0 + $0x8] sm:$0xff]  ;;  %v7404_v33 = vld [vmem:[%s11088_s1 + $0x2e4] ss:$16 sps:$4 sm:$0xff]  }
  0x21   :  { %v6276_v30 = vcombine.high %v8802_v29, %v8802_v29  ;;  %v7399_v32 = vld [vmem:[%s11088_s1 + $0x2c8] ss:$16 sps:$4 sm:$0xff]   ;;  %v7425_v46 = vld [vmem:[%s11088_s1 + $0x34c] ss:$16 sps:$4 sm:$0xff]  }
  0x23   :  { %4868 = vmatpush1.bf16.msra.mxu0 %v7314_v34  ;;  %5401 = vmatpush1.bf16.msra.mxu1 %v7315_v35  ;;  %v7407_v34 = vld [vmem:[%s11088_s1 + $0x2ec] ss:$16 sps:$4 sm:$0xff]   ;;  %v7402_v35 = vld [vmem:[%s11088_s1 + $0x2e0] ss:$16 sps:$4 sm:$0xff]  }
  0x24   :  { %4869 = vmatprep.subr.bf16.mxu0 %v7316_v36  ;;  %5402 = vmatprep.subr.bf16.mxu1 %v7318_v37  ;;  %v7405_v36 = vld [vmem:[%s11088_s1 + $0x2e8] ss:$16 sps:$4 sm:$0xff]   ;;  %v7410_v37 = vld [vmem:[%s11088_s1 + $0x304] ss:$16 sps:$4 sm:$0xff]  }
  0x27   :  { %4870 = vmatpush1.bf16.msra.mxu0 %v7320_v38  ;;  %5403 = vmatpush1.bf16.msra.mxu1 %v7321_v39  ;;  %v7413_v38 = vld [vmem:[%s11088_s1 + $0x30c] ss:$16 sps:$4 sm:$0xff]   ;;  %v7408_v39 = vld [vmem:[%s11088_s1 + $0x300] ss:$16 sps:$4 sm:$0xff]  }
  0x28   :  { %4871 = vmatprep.subr.bf16.mxu0 %v7322_v40  ;;  %5404 = vmatprep.subr.bf16.mxu1 %v7324_v41  ;;  %v7411_v40 = vld [vmem:[%s11088_s1 + $0x308] ss:$16 sps:$4 sm:$0xff]   ;;  %v7416_v41 = vld [vmem:[%s11088_s1 + $0x324] ss:$16 sps:$4 sm:$0xff]  }
  0x2b   :  { %4872 = vmatpush1.bf16.msra.mxu0 %v7326_v42  ;;  %5405 = vmatpush1.bf16.msra.mxu1 %v7327_v43  ;;  %v7419_v42 = vld [vmem:[%s11088_s1 + $0x32c] ss:$16 sps:$4 sm:$0xff]   ;;  %v7414_v43 = vld [vmem:[%s11088_s1 + $0x320] ss:$16 sps:$4 sm:$0xff]  }
  0x2c   :  { %4873 = vmatprep.subr.bf16.mxu0 %v7328_v44  ;;  %5406 = vmatprep.subr.bf16.mxu1 %v7330_v45  ;;  %v7417_v44 = vld [vmem:[%s11088_s1 + $0x328] ss:$16 sps:$4 sm:$0xff]   ;;  %v7422_v45 = vld [vmem:[%s11088_s1 + $0x344] ss:$16 sps:$4 sm:$0xff]  }
  0x2f   :  { %4874 = vmatpush1.bf16.msra.mxu0 %v7332_v47  ;;  %5407 = vmatpush1.bf16.msra.mxu1 %v7333_v49  ;;  %v7420_v47 = vld [vmem:[%s11088_s1 + $0x340] ss:$16 sps:$4 sm:$0xff]   ;;  %v7428_v49 = vld [vmem:[%s11088_s1 + $0x364] ss:$16 sps:$4 sm:$0xff]  }
  0x30   :  { %4875 = vmatprep.subr.bf16.mxu0 %v7334_v50  ;;  %5408 = vmatprep.subr.bf16.mxu1 %v7336_v51  ;;  %v7431_v50 = vld [vmem:[%s11088_s1 + $0x36c] ss:$16 sps:$4 sm:$0xff]   ;;  %v7426_v51 = vld [vmem:[%s11088_s1 + $0x360] ss:$16 sps:$4 sm:$0xff]  }
  0x33   :  { %4876 = vmatpush1.bf16.msra.mxu0 %v7338_v52  ;;  %5409 = vmatpush1.bf16.msra.mxu1 %v7339_v53  ;;  %v7429_v52 = vld [vmem:[%s11088_s1 + $0x368] ss:$16 sps:$4 sm:$0xff]   ;;  %v7434_v53 = vld [vmem:[%s11088_s1 + $0x384] ss:$16 sps:$4 sm:$0xff]  }
  0x34   :  { %4877 = vmatprep.subr.bf16.mxu0 %v7340_v54  ;;  %5410 = vmatprep.subr.bf16.mxu1 %v7342_v55  ;;  %v7437_v54 = vld [vmem:[%s11088_s1 + $0x38c] ss:$16 sps:$4 sm:$0xff]   ;;  %v7432_v55 = vld [vmem:[%s11088_s1 + $0x380] ss:$16 sps:$4 sm:$0xff]  }
  0x37   :  { %4878 = vmatpush1.bf16.msra.mxu0 %v7344_v56  ;;  %5411 = vmatpush1.bf16.msra.mxu1 %v7345_v57  ;;  %v7435_v56 = vld [vmem:[%s11088_s1 + $0x388] ss:$16 sps:$4 sm:$0xff]   ;;  %v7440_v57 = vld [vmem:[%s11088_s1 + $0x3a4] ss:$16 sps:$4 sm:$0xff]  }
  0x38   :  { %4879 = vmatprep.subr.bf16.mxu0 %v7346_v58  ;;  %5412 = vmatprep.subr.bf16.mxu1 %v7348_v59  ;;  %v7443_v58 = vld [vmem:[%s11088_s1 + $0x3ac] ss:$16 sps:$4 sm:$0xff]   ;;  %v7438_v59 = vld [vmem:[%s11088_s1 + $0x3a0] ss:$16 sps:$4 sm:$0xff]  }
  0x3b   :  { %4880 = vmatpush1.bf16.msra.mxu0 %v7350_v60  ;;  %5413 = vmatpush1.bf16.msra.mxu1 %v7351_v61  ;;  %v7441_v60 = vld [vmem:[%s11088_s1 + $0x3a8] ss:$16 sps:$4 sm:$0xff]   ;;  %v7446_v61 = vld [vmem:[%s11088_s1 + $0x3c4] ss:$16 sps:$4 sm:$0xff]  }
  0x3c   :  { %4881 = vmatprep.subr.bf16.mxu0 %v7352_v62  ;;  %5414 = vmatprep.subr.bf16.mxu1 %v7354_v63  ;;  %v7449_v62 = vld [vmem:[%s11088_s1 + $0x3cc] ss:$16 sps:$4 sm:$0xff]   ;;  %v7444_v63 = vld [vmem:[%s11088_s1 + $0x3c0] ss:$16 sps:$4 sm:$0xff]  }
  0x3f   :  { %4882 = vmatpush1.bf16.msra.mxu0 %v7356_v0  ;;  %5415 = vmatpush1.bf16.msra.mxu1 %v7357_v1  ;;  %v7447_v0 = vld [vmem:[%s11088_s1 + $0x3c8] ss:$16 sps:$4 sm:$0xff]   ;;  %v7452_v1 = vld [vmem:[%s11088_s1 + $0x3e4] ss:$16 sps:$4 sm:$0xff]  }
  0x40   :  { %4892 = vmatprep.subr.bf16.mxu0 %v7362_v2  ;;  %5425 = vmatprep.subr.bf16.mxu1 %v7365_v3  ;;  %v7455_v2 = vld [vmem:[%s11088_s1 + $0x3ec] ss:$16 sps:$4 sm:$0xff]   ;;  %v7450_v3 = vld [vmem:[%s11088_s1 + $0x3e0] ss:$16 sps:$4 sm:$0xff]  }
  0x42   :  { %4884 = vmatmul.mubr.bf16.vlgmr.msra.gmra.mrb[0].mxu0 %v6273_v4  ;;  %5417 = vmatmul.mubr.bf16.vlgmr.msra.gmra.mrb[0].mxu1 %v6273_v4  ;;  %v7453_v4 = vld [vmem:[%s11088_s1 + $0x3e8] ss:$16 sps:$4 sm:$0xff]  }
  0x43   :  { %4893 = vmatpush1.bf16.msra.mxu0 %v7360_v5  ;;  %5426 = vmatpush1.bf16.msra.mxu1 %v7363_v6  ;;  %v7460_v5 = vld [vmem:[%s11088_s1 + $0x404] ss:$16 sps:$4 sm:$0xff]   ;;  %v7463_v6 = vld [vmem:[%s11088_s1 + $0x40c] ss:$16 sps:$4 sm:$0xff]  }
  0x44   :  { %4894 = vmatprep.subr.bf16.mxu0 %v7368_v7  ;;  %5427 = vmatprep.subr.bf16.mxu1 %v7371_v8  ;;  %v6275_v7 = vcombine.low %v8802_v29, %v8802_v29  ;;  %v7458_v8 = vld [vmem:[%s11088_s1 + $0x400] ss:$16 sps:$4 sm:$0xff]   ;;  %v7493_v29 = vld [vmem:[%s11088_s1 + $0x4ac] ss:$16 sps:$4 sm:$0xff]  }
  0x45   :  { %4924 = vmatprep.mubr.bf16.mxu0 %v6276_v30  ;;  %5457 = vmatprep.mubr.bf16.mxu1 %v6276_v30  ;;  %v7488_v30 = vld [vmem:[%s11088_s1 + $0x4a0] ss:$16 sps:$4 sm:$0xff]  }
  0x47   :  { %4895 = vmatpush1.bf16.msra.mxu0 %v7366_v9  ;;  %5428 = vmatpush1.bf16.msra.mxu1 %v7369_v10  ;;  %v7461_v9 = vld [vmem:[%s11088_s1 + $0x408] ss:$16 sps:$4 sm:$0xff]   ;;  %v7466_v10 = vld [vmem:[%s11088_s1 + $0x424] ss:$16 sps:$4 sm:$0xff]  }
  0x48   :  { %4896 = vmatprep.subr.bf16.mxu0 %v7374_v11  ;;  %5429 = vmatprep.subr.bf16.mxu1 %v7377_v12  ;;  %v8940_v11 = vld [vmem:[%s11089_s0 + $0x10] sm:$0xff]  ;;  %v7469_v12 = vld [vmem:[%s11088_s1 + $0x42c] ss:$16 sps:$4 sm:$0xff]  }
  0x4b   :  { %4897 = vmatpush1.bf16.msra.mxu0 %v7372_v13  ;;  %5430 = vmatpush1.bf16.msra.mxu1 %v7375_v14  ;;  %v6278_v13 = vcombine.high %v8940_v11, %v8940_v11  ;;  %v7464_v14 = vld [vmem:[%s11088_s1 + $0x420] ss:$16 sps:$4 sm:$0xff]  }
  0x4c   :  { %4898 = vmatprep.subr.bf16.mxu0 %v7380_v15  ;;  %5431 = vmatprep.subr.bf16.mxu1 %v7383_v16  ;;  %v7467_v15 = vld [vmem:[%s11088_s1 + $0x428] ss:$16 sps:$4 sm:$0xff]   ;;  %v7472_v16 = vld [vmem:[%s11088_s1 + $0x444] ss:$16 sps:$4 sm:$0xff]  }
  0x4f   :  { %4899 = vmatpush1.bf16.msra.mxu0 %v7378_v17  ;;  %5432 = vmatpush1.bf16.msra.mxu1 %v7381_v18  ;;  %v7475_v17 = vld [vmem:[%s11088_s1 + $0x44c] ss:$16 sps:$4 sm:$0xff]   ;;  %v7470_v18 = vld [vmem:[%s11088_s1 + $0x440] ss:$16 sps:$4 sm:$0xff]  }
  0x50   :  { %4900 = vmatprep.subr.bf16.mxu0 %v7386_v19  ;;  %5433 = vmatprep.subr.bf16.mxu1 %v7389_v20  ;;  %v7473_v19 = vld [vmem:[%s11088_s1 + $0x448] ss:$16 sps:$4 sm:$0xff]   ;;  %v7478_v20 = vld [vmem:[%s11088_s1 + $0x464] ss:$16 sps:$4 sm:$0xff]  }
  0x53   :  { %4901 = vmatpush1.bf16.msra.mxu0 %v7384_v21  ;;  %5434 = vmatpush1.bf16.msra.mxu1 %v7387_v22  ;;  %v7481_v21 = vld [vmem:[%s11088_s1 + $0x46c] ss:$16 sps:$4 sm:$0xff]   ;;  %v7476_v22 = vld [vmem:[%s11088_s1 + $0x460] ss:$16 sps:$4 sm:$0xff]  }
  0x54   :  { %4902 = vmatprep.subr.bf16.mxu0 %v7392_v23  ;;  %5435 = vmatprep.subr.bf16.mxu1 %v7395_v24  ;;  %v7479_v23 = vld [vmem:[%s11088_s1 + $0x468] ss:$16 sps:$4 sm:$0xff]   ;;  %v7484_v24 = vld [vmem:[%s11088_s1 + $0x484] ss:$16 sps:$4 sm:$0xff]  }
  0x57   :  { %4903 = vmatpush1.bf16.msra.mxu0 %v7390_v25  ;;  %5436 = vmatpush1.bf16.msra.mxu1 %v7393_v26  ;;  %v7487_v25 = vld [vmem:[%s11088_s1 + $0x48c] ss:$16 sps:$4 sm:$0xff]   ;;  %v7482_v26 = vld [vmem:[%s11088_s1 + $0x480] ss:$16 sps:$4 sm:$0xff]  }
  0x58   :  { %4904 = vmatprep.subr.bf16.mxu0 %v7398_v27  ;;  %5437 = vmatprep.subr.bf16.mxu1 %v7401_v28  ;;  %v7485_v27 = vld [vmem:[%s11088_s1 + $0x488] ss:$16 sps:$4 sm:$0xff]   ;;  %v7490_v28 = vld [vmem:[%s11088_s1 + $0x4a4] ss:$16 sps:$4 sm:$0xff]  }
  0x5b   :  { %4905 = vmatpush1.bf16.msra.mxu0 %v7396_v31  ;;  %5438 = vmatpush1.bf16.msra.mxu1 %v7399_v32  ;;  %v7491_v31 = vld [vmem:[%s11088_s1 + $0x4a8] ss:$16 sps:$4 sm:$0xff]   ;;  %v7496_v32 = vld [vmem:[%s11088_s1 + $0x4c4] ss:$16 sps:$4 sm:$0xff]  }
  0x5c   :  { %4906 = vmatprep.subr.bf16.mxu0 %v7404_v33  ;;  %5439 = vmatprep.subr.bf16.mxu1 %v7407_v34  ;;  %v7499_v33 = vld [vmem:[%s11088_s1 + $0x4cc] ss:$16 sps:$4 sm:$0xff]   ;;  %v7494_v34 = vld [vmem:[%s11088_s1 + $0x4c0] ss:$16 sps:$4 sm:$0xff]  }
  0x5f   :  { %4907 = vmatpush1.bf16.msra.mxu0 %v7402_v35  ;;  %5440 = vmatpush1.bf16.msra.mxu1 %v7405_v36  ;;  %v7497_v35 = vld [vmem:[%s11088_s1 + $0x4c8] ss:$16 sps:$4 sm:$0xff]   ;;  %v7502_v36 = vld [vmem:[%s11088_s1 + $0x4e4] ss:$16 sps:$4 sm:$0xff]  }
  0x60   :  { %4908 = vmatprep.subr.bf16.mxu0 %v7410_v37  ;;  %5441 = vmatprep.subr.bf16.mxu1 %v7413_v38  ;;  %v7505_v37 = vld [vmem:[%s11088_s1 + $0x4ec] ss:$16 sps:$4 sm:$0xff]   ;;  %v7500_v38 = vld [vmem:[%s11088_s1 + $0x4e0] ss:$16 sps:$4 sm:$0xff]  }
  0x63   :  { %4909 = vmatpush1.bf16.msra.mxu0 %v7408_v39  ;;  %5442 = vmatpush1.bf16.msra.mxu1 %v7411_v40  ;;  %v7503_v39 = vld [vmem:[%s11088_s1 + $0x4e8] ss:$16 sps:$4 sm:$0xff]   ;;  %v7508_v40 = vld [vmem:[%s11088_s1 + $0x504] ss:$16 sps:$4 sm:$0xff]  }
  0x64   :  { %4910 = vmatprep.subr.bf16.mxu0 %v7416_v41  ;;  %5443 = vmatprep.subr.bf16.mxu1 %v7419_v42  ;;  %v7511_v41 = vld [vmem:[%s11088_s1 + $0x50c] ss:$16 sps:$4 sm:$0xff]   ;;  %v7506_v42 = vld [vmem:[%s11088_s1 + $0x500] ss:$16 sps:$4 sm:$0xff]  }
  0x67   :  { %4911 = vmatpush1.bf16.msra.mxu0 %v7414_v43  ;;  %5444 = vmatpush1.bf16.msra.mxu1 %v7417_v44  ;;  %v7509_v43 = vld [vmem:[%s11088_s1 + $0x508] ss:$16 sps:$4 sm:$0xff]   ;;  %v7514_v44 = vld [vmem:[%s11088_s1 + $0x524] ss:$16 sps:$4 sm:$0xff]  }
  0x68   :  { %4912 = vmatprep.subr.bf16.mxu0 %v7422_v45  ;;  %5445 = vmatprep.subr.bf16.mxu1 %v7425_v46  ;;  %v7517_v45 = vld [vmem:[%s11088_s1 + $0x52c] ss:$16 sps:$4 sm:$0xff]   ;;  %v7512_v46 = vld [vmem:[%s11088_s1 + $0x520] ss:$16 sps:$4 sm:$0xff]  }
  0x6b   :  { %4913 = vmatpush1.bf16.msra.mxu0 %v7420_v47  ;;  %5446 = vmatpush1.bf16.msra.mxu1 %v7423_v48  ;;  %v7515_v47 = vld [vmem:[%s11088_s1 + $0x528] ss:$16 sps:$4 sm:$0xff]   ;;  %v7520_v48 = vld [vmem:[%s11088_s1 + $0x544] ss:$16 sps:$4 sm:$0xff]  }
  0x6c   :  { %4914 = vmatprep.subr.bf16.mxu0 %v7428_v49  ;;  %5447 = vmatprep.subr.bf16.mxu1 %v7431_v50  ;;  %v7523_v49 = vld [vmem:[%s11088_s1 + $0x54c] ss:$16 sps:$4 sm:$0xff]   ;;  %v7518_v50 = vld [vmem:[%s11088_s1 + $0x540] ss:$16 sps:$4 sm:$0xff]  }
  0x6f   :  { %4915 = vmatpush1.bf16.msra.mxu0 %v7426_v51  ;;  %5448 = vmatpush1.bf16.msra.mxu1 %v7429_v52  ;;  %v7521_v51 = vld [vmem:[%s11088_s1 + $0x548] ss:$16 sps:$4 sm:$0xff]   ;;  %v7526_v52 = vld [vmem:[%s11088_s1 + $0x564] ss:$16 sps:$4 sm:$0xff]  }
  0x70   :  { %4916 = vmatprep.subr.bf16.mxu0 %v7434_v53  ;;  %5449 = vmatprep.subr.bf16.mxu1 %v7437_v54  ;;  %v7529_v53 = vld [vmem:[%s11088_s1 + $0x56c] ss:$16 sps:$4 sm:$0xff]   ;;  %v7524_v54 = vld [vmem:[%s11088_s1 + $0x560] ss:$16 sps:$4 sm:$0xff]  }
  0x73   :  { %4917 = vmatpush1.bf16.msra.mxu0 %v7432_v55  ;;  %5450 = vmatpush1.bf16.msra.mxu1 %v7435_v56  ;;  %v7527_v55 = vld [vmem:[%s11088_s1 + $0x568] ss:$16 sps:$4 sm:$0xff]   ;;  %v7532_v56 = vld [vmem:[%s11088_s1 + $0x584] ss:$16 sps:$4 sm:$0xff]  }
  0x74   :  { %4918 = vmatprep.subr.bf16.mxu0 %v7440_v57  ;;  %5451 = vmatprep.subr.bf16.mxu1 %v7443_v58  ;;  %v7535_v57 = vld [vmem:[%s11088_s1 + $0x58c] ss:$16 sps:$4 sm:$0xff]   ;;  %v7530_v58 = vld [vmem:[%s11088_s1 + $0x580] ss:$16 sps:$4 sm:$0xff]  }
  0x77   :  { %4919 = vmatpush1.bf16.msra.mxu0 %v7438_v59  ;;  %5452 = vmatpush1.bf16.msra.mxu1 %v7441_v60  ;;  %v7533_v59 = vld [vmem:[%s11088_s1 + $0x588] ss:$16 sps:$4 sm:$0xff]   ;;  %v7538_v60 = vld [vmem:[%s11088_s1 + $0x5a4] ss:$16 sps:$4 sm:$0xff]  }
  0x78   :  { %4920 = vmatprep.subr.bf16.mxu0 %v7446_v61  ;;  %5453 = vmatprep.subr.bf16.mxu1 %v7449_v62  ;;  %v7541_v61 = vld [vmem:[%s11088_s1 + $0x5ac] ss:$16 sps:$4 sm:$0xff]   ;;  %v7536_v62 = vld [vmem:[%s11088_s1 + $0x5a0] ss:$16 sps:$4 sm:$0xff]  }
  0x7b   :  { %4921 = vmatpush1.bf16.msra.mxu0 %v7444_v63  ;;  %5454 = vmatpush1.bf16.msra.mxu1 %v7447_v0  ;;  %v7539_v63 = vld [vmem:[%s11088_s1 + $0x5a8] ss:$16 sps:$4 sm:$0xff]   ;;  %v7544_v0 = vld [vmem:[%s11088_s1 + $0x5c4] ss:$16 sps:$4 sm:$0xff]  }
  0x7c   :  { %4922 = vmatprep.subr.bf16.mxu0 %v7452_v1  ;;  %5455 = vmatprep.subr.bf16.mxu1 %v7455_v2  ;;  %v7547_v1 = vld [vmem:[%s11088_s1 + $0x5cc] ss:$16 sps:$4 sm:$0xff]   ;;  %v7542_v2 = vld [vmem:[%s11088_s1 + $0x5c0] ss:$16 sps:$4 sm:$0xff]  }
  0x7f   :  { %4923 = vmatpush1.bf16.msra.mxu0 %v7450_v3  ;;  %5456 = vmatpush1.bf16.msra.mxu1 %v7453_v4  ;;  %v7545_v3 = vld [vmem:[%s11088_s1 + $0x5c8] ss:$16 sps:$4 sm:$0xff]   ;;  %v7550_v4 = vld [vmem:[%s11088_s1 + $0x5e4] ss:$16 sps:$4 sm:$0xff]  }
  0x80   :  { %4933 = vmatprep.subr.bf16.mxu0 %v7460_v5  ;;  %5466 = vmatprep.subr.bf16.mxu1 %v7463_v6  ;;  %v7553_v5 = vld [vmem:[%s11088_s1 + $0x5ec] ss:$16 sps:$4 sm:$0xff]   ;;  %v7548_v6 = vld [vmem:[%s11088_s1 + $0x5e0] ss:$16 sps:$4 sm:$0xff]  }
  0x82   :  { %4925 = vmatmul.mubr.bf16.vlgmr.msra.gmra.mrb[0].mxu0 %v6275_v7  ;;  %5458 = vmatmul.mubr.bf16.vlgmr.msra.gmra.mrb[0].mxu1 %v6275_v7  ;;  %v7551_v7 = vld [vmem:[%s11088_s1 + $0x5e8] ss:$16 sps:$4 sm:$0xff]  }
  0x83   :  { %4934 = vmatpush1.bf16.msra.mxu0 %v7458_v8  ;;  %5467 = vmatpush1.bf16.msra.mxu1 %v7461_v9  ;;  %v7558_v8 = vld [vmem:[%s11088_s1 + $0x604] ss:$16 sps:$4 sm:$0xff]   ;;  %v7561_v9 = vld [vmem:[%s11088_s1 + $0x60c] ss:$16 sps:$4 sm:$0xff]  }
  0x84   :  { %4935 = vmatprep.subr.bf16.mxu0 %v7466_v10  ;;  %5468 = vmatprep.subr.bf16.mxu1 %v7469_v12  ;;  %v7556_v10 = vld [vmem:[%s11088_s1 + $0x600] ss:$16 sps:$4 sm:$0xff]   ;;  %v6277_v12 = vcombine.low %v8940_v11, %v8940_v11  ;;  %v7567_v11 = vld [vmem:[%s11088_s1 + $0x62c] ss:$16 sps:$4 sm:$0xff]  }
  0x85   :  { %4965 = vmatprep.mubr.bf16.mxu0 %v6278_v13  ;;  %5498 = vmatprep.mubr.bf16.mxu1 %v6278_v13  ;;  %v7559_v13 = vld [vmem:[%s11088_s1 + $0x608] ss:$16 sps:$4 sm:$0xff]  }
  0x87   :  { %4936 = vmatpush1.bf16.msra.mxu0 %v7464_v14  ;;  %5469 = vmatpush1.bf16.msra.mxu1 %v7467_v15  ;;  %v9138_v14 = vld [vmem:[%s11089_s0 + $0x18] sm:$0xff]  ;;  %v7564_v15 = vld [vmem:[%s11088_s1 + $0x624] ss:$16 sps:$4 sm:$0xff]  }
  0x88   :  { %4937 = vmatprep.subr.bf16.mxu0 %v7472_v16  ;;  %5470 = vmatprep.subr.bf16.mxu1 %v7475_v17  ;;  %v6280_v16 = vcombine.high %v9138_v14, %v9138_v14  ;;  %v7562_v17 = vld [vmem:[%s11088_s1 + $0x620] ss:$16 sps:$4 sm:$0xff]  }
  0x8b   :  { %4938 = vmatpush1.bf16.msra.mxu0 %v7470_v18  ;;  %5471 = vmatpush1.bf16.msra.mxu1 %v7473_v19  ;;  %v7565_v18 = vld [vmem:[%s11088_s1 + $0x628] ss:$16 sps:$4 sm:$0xff]   ;;  %v7570_v19 = vld [vmem:[%s11088_s1 + $0x644] ss:$16 sps:$4 sm:$0xff]  }
  0x8c   :  { %4939 = vmatprep.subr.bf16.mxu0 %v7478_v20  ;;  %5472 = vmatprep.subr.bf16.mxu1 %v7481_v21  ;;  %v7573_v20 = vld [vmem:[%s11088_s1 + $0x64c] ss:$16 sps:$4 sm:$0xff]   ;;  %v7568_v21 = vld [vmem:[%s11088_s1 + $0x640] ss:$16 sps:$4 sm:$0xff]  }
  0x8f   :  { %4940 = vmatpush1.bf16.msra.mxu0 %v7476_v22  ;;  %5473 = vmatpush1.bf16.msra.mxu1 %v7479_v23  ;;  %v7571_v22 = vld [vmem:[%s11088_s1 + $0x648] ss:$16 sps:$4 sm:$0xff]   ;;  %v7576_v23 = vld [vmem:[%s11088_s1 + $0x664] ss:$16 sps:$4 sm:$0xff]  }
  0x90   :  { %4941 = vmatprep.subr.bf16.mxu0 %v7484_v24  ;;  %5474 = vmatprep.subr.bf16.mxu1 %v7487_v25  ;;  %v7579_v24 = vld [vmem:[%s11088_s1 + $0x66c] ss:$16 sps:$4 sm:$0xff]   ;;  %v7574_v25 = vld [vmem:[%s11088_s1 + $0x660] ss:$16 sps:$4 sm:$0xff]  }
  0x93   :  { %4942 = vmatpush1.bf16.msra.mxu0 %v7482_v26  ;;  %5475 = vmatpush1.bf16.msra.mxu1 %v7485_v27  ;;  %v7577_v26 = vld [vmem:[%s11088_s1 + $0x668] ss:$16 sps:$4 sm:$0xff]   ;;  %v7582_v27 = vld [vmem:[%s11088_s1 + $0x684] ss:$16 sps:$4 sm:$0xff]  }
  0x94   :  { %4943 = vmatprep.subr.bf16.mxu0 %v7490_v28  ;;  %5476 = vmatprep.subr.bf16.mxu1 %v7493_v29  ;;  %v7585_v28 = vld [vmem:[%s11088_s1 + $0x68c] ss:$16 sps:$4 sm:$0xff]   ;;  %v7580_v29 = vld [vmem:[%s11088_s1 + $0x680] ss:$16 sps:$4 sm:$0xff]  }
  0x97   :  { %4944 = vmatpush1.bf16.msra.mxu0 %v7488_v30  ;;  %5477 = vmatpush1.bf16.msra.mxu1 %v7491_v31  ;;  %v7583_v30 = vld [vmem:[%s11088_s1 + $0x688] ss:$16 sps:$4 sm:$0xff]   ;;  %v7588_v31 = vld [vmem:[%s11088_s1 + $0x6a4] ss:$16 sps:$4 sm:$0xff]  }
  0x98   :  { %4945 = vmatprep.subr.bf16.mxu0 %v7496_v32  ;;  %5478 = vmatprep.subr.bf16.mxu1 %v7499_v33  ;;  %v7591_v32 = vld [vmem:[%s11088_s1 + $0x6ac] ss:$16 sps:$4 sm:$0xff]   ;;  %v7586_v33 = vld [vmem:[%s11088_s1 + $0x6a0] ss:$16 sps:$4 sm:$0xff]  }
  0x9b   :  { %4946 = vmatpush1.bf16.msra.mxu0 %v7494_v34  ;;  %5479 = vmatpush1.bf16.msra.mxu1 %v7497_v35  ;;  %v7589_v34 = vld [vmem:[%s11088_s1 + $0x6a8] ss:$16 sps:$4 sm:$0xff]   ;;  %v7594_v35 = vld [vmem:[%s11088_s1 + $0x6c4] ss:$16 sps:$4 sm:$0xff]  }
  0x9c   :  { %4947 = vmatprep.subr.bf16.mxu0 %v7502_v36  ;;  %5480 = vmatprep.subr.bf16.mxu1 %v7505_v37  ;;  %v7597_v36 = vld [vmem:[%s11088_s1 + $0x6cc] ss:$16 sps:$4 sm:$0xff]   ;;  %v7592_v37 = vld [vmem:[%s11088_s1 + $0x6c0] ss:$16 sps:$4 sm:$0xff]  }
  0x9f   :  { %4948 = vmatpush1.bf16.msra.mxu0 %v7500_v38  ;;  %5481 = vmatpush1.bf16.msra.mxu1 %v7503_v39  ;;  %v7595_v38 = vld [vmem:[%s11088_s1 + $0x6c8] ss:$16 sps:$4 sm:$0xff]   ;;  %v7600_v39 = vld [vmem:[%s11088_s1 + $0x6e4] ss:$16 sps:$4 sm:$0xff]  }
  0xa0   :  { %4949 = vmatprep.subr.bf16.mxu0 %v7508_v40  ;;  %5482 = vmatprep.subr.bf16.mxu1 %v7511_v41  ;;  %v7603_v40 = vld [vmem:[%s11088_s1 + $0x6ec] ss:$16 sps:$4 sm:$0xff]   ;;  %v7598_v41 = vld [vmem:[%s11088_s1 + $0x6e0] ss:$16 sps:$4 sm:$0xff]  }
  0xa3   :  { %4950 = vmatpush1.bf16.msra.mxu0 %v7506_v42  ;;  %5483 = vmatpush1.bf16.msra.mxu1 %v7509_v43  ;;  %v7601_v42 = vld [vmem:[%s11088_s1 + $0x6e8] ss:$16 sps:$4 sm:$0xff]   ;;  %v7606_v43 = vld [vmem:[%s11088_s1 + $0x704] ss:$16 sps:$4 sm:$0xff]  }
  0xa4   :  { %4951 = vmatprep.subr.bf16.mxu0 %v7514_v44  ;;  %5484 = vmatprep.subr.bf16.mxu1 %v7517_v45  ;;  %v7609_v44 = vld [vmem:[%s11088_s1 + $0x70c] ss:$16 sps:$4 sm:$0xff]   ;;  %v7604_v45 = vld [vmem:[%s11088_s1 + $0x700] ss:$16 sps:$4 sm:$0xff]  }
  0xa7   :  { %4952 = vmatpush1.bf16.msra.mxu0 %v7512_v46  ;;  %5485 = vmatpush1.bf16.msra.mxu1 %v7515_v47  ;;  %v7607_v46 = vld [vmem:[%s11088_s1 + $0x708] ss:$16 sps:$4 sm:$0xff]   ;;  %v7612_v47 = vld [vmem:[%s11088_s1 + $0x724] ss:$16 sps:$4 sm:$0xff]  }
  0xa8   :  { %4953 = vmatprep.subr.bf16.mxu0 %v7520_v48  ;;  %5486 = vmatprep.subr.bf16.mxu1 %v7523_v49  ;;  %v7615_v48 = vld [vmem:[%s11088_s1 + $0x72c] ss:$16 sps:$4 sm:$0xff]   ;;  %v7610_v49 = vld [vmem:[%s11088_s1 + $0x720] ss:$16 sps:$4 sm:$0xff]  }
  0xab   :  { %4954 = vmatpush1.bf16.msra.mxu0 %v7518_v50  ;;  %5487 = vmatpush1.bf16.msra.mxu1 %v7521_v51  ;;  %v7613_v50 = vld [vmem:[%s11088_s1 + $0x728] ss:$16 sps:$4 sm:$0xff]   ;;  %v7618_v51 = vld [vmem:[%s11088_s1 + $0x744] ss:$16 sps:$4 sm:$0xff]  }
  0xac   :  { %4955 = vmatprep.subr.bf16.mxu0 %v7526_v52  ;;  %5488 = vmatprep.subr.bf16.mxu1 %v7529_v53  ;;  %v7621_v52 = vld [vmem:[%s11088_s1 + $0x74c] ss:$16 sps:$4 sm:$0xff]   ;;  %v7616_v53 = vld [vmem:[%s11088_s1 + $0x740] ss:$16 sps:$4 sm:$0xff]  }
  0xaf   :  { %4956 = vmatpush1.bf16.msra.mxu0 %v7524_v54  ;;  %5489 = vmatpush1.bf16.msra.mxu1 %v7527_v55  ;;  %v7619_v54 = vld [vmem:[%s11088_s1 + $0x748] ss:$16 sps:$4 sm:$0xff]   ;;  %v7624_v55 = vld [vmem:[%s11088_s1 + $0x764] ss:$16 sps:$4 sm:$0xff]  }
  0xb0   :  { %4957 = vmatprep.subr.bf16.mxu0 %v7532_v56  ;;  %5490 = vmatprep.subr.bf16.mxu1 %v7535_v57  ;;  %v7627_v56 = vld [vmem:[%s11088_s1 + $0x76c] ss:$16 sps:$4 sm:$0xff]   ;;  %v7622_v57 = vld [vmem:[%s11088_s1 + $0x760] ss:$16 sps:$4 sm:$0xff]  }
  0xb3   :  { %4958 = vmatpush1.bf16.msra.mxu0 %v7530_v58  ;;  %5491 = vmatpush1.bf16.msra.mxu1 %v7533_v59  ;;  %v7625_v58 = vld [vmem:[%s11088_s1 + $0x768] ss:$16 sps:$4 sm:$0xff]   ;;  %v7630_v59 = vld [vmem:[%s11088_s1 + $0x784] ss:$16 sps:$4 sm:$0xff]  }
  0xb4   :  { %4959 = vmatprep.subr.bf16.mxu0 %v7538_v60  ;;  %5492 = vmatprep.subr.bf16.mxu1 %v7541_v61  ;;  %v7633_v60 = vld [vmem:[%s11088_s1 + $0x78c] ss:$16 sps:$4 sm:$0xff]   ;;  %v7628_v61 = vld [vmem:[%s11088_s1 + $0x780] ss:$16 sps:$4 sm:$0xff]  }
  0xb7   :  { %4960 = vmatpush1.bf16.msra.mxu0 %v7536_v62  ;;  %5493 = vmatpush1.bf16.msra.mxu1 %v7539_v63  ;;  %v7631_v62 = vld [vmem:[%s11088_s1 + $0x788] ss:$16 sps:$4 sm:$0xff]   ;;  %v7636_v63 = vld [vmem:[%s11088_s1 + $0x7a4] ss:$16 sps:$4 sm:$0xff]  }
  0xb8   :  { %4961 = vmatprep.subr.bf16.mxu0 %v7544_v0  ;;  %5494 = vmatprep.subr.bf16.mxu1 %v7547_v1  ;;  %v7639_v0 = vld [vmem:[%s11088_s1 + $0x7ac] ss:$16 sps:$4 sm:$0xff]   ;;  %v7634_v1 = vld [vmem:[%s11088_s1 + $0x7a0] ss:$16 sps:$4 sm:$0xff]  }
  0xbb   :  { %4962 = vmatpush1.bf16.msra.mxu0 %v7542_v2  ;;  %5495 = vmatpush1.bf16.msra.mxu1 %v7545_v3  ;;  %v7637_v2 = vld [vmem:[%s11088_s1 + $0x7a8] ss:$16 sps:$4 sm:$0xff]   ;;  %v7642_v3 = vld [vmem:[%s11088_s1 + $0x7c4] ss:$16 sps:$4 sm:$0xff]  }
  0xbc   :  { %4963 = vmatprep.subr.bf16.mxu0 %v7550_v4  ;;  %5496 = vmatprep.subr.bf16.mxu1 %v7553_v5  ;;  %v7645_v4 = vld [vmem:[%s11088_s1 + $0x7cc] ss:$16 sps:$4 sm:$0xff]   ;;  %v7640_v5 = vld [vmem:[%s11088_s1 + $0x7c0] ss:$16 sps:$4 sm:$0xff]  }
  0xbf   :  { %4964 = vmatpush1.bf16.msra.mxu0 %v7548_v6  ;;  %5497 = vmatpush1.bf16.msra.mxu1 %v7551_v7  ;;  %v7643_v6 = vld [vmem:[%s11088_s1 + $0x7c8] ss:$16 sps:$4 sm:$0xff]   ;;  %v7648_v7 = vld [vmem:[%s11088_s1 + $0x7e4] ss:$16 sps:$4 sm:$0xff]  }
  0xc0   :  { %4974 = vmatprep.subr.bf16.mxu0 %v7558_v8  ;;  %5507 = vmatprep.subr.bf16.mxu1 %v7561_v9  ;;  %v7651_v8 = vld [vmem:[%s11088_s1 + $0x7ec] ss:$16 sps:$4 sm:$0xff]   ;;  %v7646_v9 = vld [vmem:[%s11088_s1 + $0x7e0] ss:$16 sps:$4 sm:$0xff]  }
  0xc2   :  { %4966 = vmatmul.mubr.bf16.vlgmr.msra.gmra.mrb[0].mxu0 %v6277_v12  ;;  %5499 = vmatmul.mubr.bf16.vlgmr.msra.gmra.mrb[0].mxu1 %v6277_v12  ;;  %v7656_v12 = vld [vmem:[%s11088_s1 + $0x804] ss:$16 sps:$4 sm:$0xff]  }
  0xc3   :  { %4975 = vmatpush1.bf16.msra.mxu0 %v7556_v10  ;;  %5508 = vmatpush1.bf16.msra.mxu1 %v7559_v13  ;;  %v7649_v10 = vld [vmem:[%s11088_s1 + $0x7e8] ss:$16 sps:$4 sm:$0xff]   ;;  %v7659_v13 = vld [vmem:[%s11088_s1 + $0x80c] ss:$16 sps:$4 sm:$0xff]  }
  0xc4   :  { %4976 = vmatprep.subr.bf16.mxu0 %v7564_v15  ;;  %5509 = vmatprep.subr.bf16.mxu1 %v7567_v11  ;;  %v7654_v15 = vld [vmem:[%s11088_s1 + $0x800] ss:$16 sps:$4 sm:$0xff]   ;;  %v6279_v11 = vcombine.low %v9138_v14, %v9138_v14  ;;  %v7665_v14 = vld [vmem:[%s11088_s1 + $0x82c] ss:$16 sps:$4 sm:$0xff]  }
  0xc5   :  { %5006 = vmatprep.mubr.bf16.mxu0 %v6280_v16  ;;  %5539 = vmatprep.mubr.bf16.mxu1 %v6280_v16  ;;  %v9336_v16 = vld [vmem:[%s11089_s0 + $0x20] sm:$0xff] }
  0xc7   :  { %4977 = vmatpush1.bf16.msra.mxu0 %v7562_v17  ;;  %5510 = vmatpush1.bf16.msra.mxu1 %v7565_v18  ;;  %v7657_v17 = vld [vmem:[%s11088_s1 + $0x808] ss:$16 sps:$4 sm:$0xff]   ;;  %v7662_v18 = vld [vmem:[%s11088_s1 + $0x824] ss:$16 sps:$4 sm:$0xff]  }
  0xc8   :  { %4978 = vmatprep.subr.bf16.mxu0 %v7570_v19  ;;  %5511 = vmatprep.subr.bf16.mxu1 %v7573_v20  ;;  %v6282_v19 = vcombine.high %v9336_v16, %v9336_v16  ;;  %v7660_v20 = vld [vmem:[%s11088_s1 + $0x820] ss:$16 sps:$4 sm:$0xff]  }
  0xcb   :  { %4979 = vmatpush1.bf16.msra.mxu0 %v7568_v21  ;;  %5512 = vmatpush1.bf16.msra.mxu1 %v7571_v22  ;;  %v7663_v21 = vld [vmem:[%s11088_s1 + $0x828] ss:$16 sps:$4 sm:$0xff]   ;;  %v7668_v22 = vld [vmem:[%s11088_s1 + $0x844] ss:$16 sps:$4 sm:$0xff]  }
  0xcc   :  { %4980 = vmatprep.subr.bf16.mxu0 %v7576_v23  ;;  %5513 = vmatprep.subr.bf16.mxu1 %v7579_v24  ;;  %v7671_v23 = vld [vmem:[%s11088_s1 + $0x84c] ss:$16 sps:$4 sm:$0xff]   ;;  %v7666_v24 = vld [vmem:[%s11088_s1 + $0x840] ss:$16 sps:$4 sm:$0xff]  }
  0xcf   :  { %4981 = vmatpush1.bf16.msra.mxu0 %v7574_v25  ;;  %5514 = vmatpush1.bf16.msra.mxu1 %v7577_v26  ;;  %v7669_v25 = vld [vmem:[%s11088_s1 + $0x848] ss:$16 sps:$4 sm:$0xff]   ;;  %v7674_v26 = vld [vmem:[%s11088_s1 + $0x864] ss:$16 sps:$4 sm:$0xff]  }
  0xd0   :  { %4982 = vmatprep.subr.bf16.mxu0 %v7582_v27  ;;  %5515 = vmatprep.subr.bf16.mxu1 %v7585_v28  ;;  %v7677_v27 = vld [vmem:[%s11088_s1 + $0x86c] ss:$16 sps:$4 sm:$0xff]   ;;  %v7672_v28 = vld [vmem:[%s11088_s1 + $0x860] ss:$16 sps:$4 sm:$0xff]  }
  0xd3   :  { %4983 = vmatpush1.bf16.msra.mxu0 %v7580_v29  ;;  %5516 = vmatpush1.bf16.msra.mxu1 %v7583_v30  ;;  %v7675_v29 = vld [vmem:[%s11088_s1 + $0x868] ss:$16 sps:$4 sm:$0xff]   ;;  %v7680_v30 = vld [vmem:[%s11088_s1 + $0x884] ss:$16 sps:$4 sm:$0xff]  }
  0xd4   :  { %4984 = vmatprep.subr.bf16.mxu0 %v7588_v31  ;;  %5517 = vmatprep.subr.bf16.mxu1 %v7591_v32  ;;  %v7683_v31 = vld [vmem:[%s11088_s1 + $0x88c] ss:$16 sps:$4 sm:$0xff]   ;;  %v7678_v32 = vld [vmem:[%s11088_s1 + $0x880] ss:$16 sps:$4 sm:$0xff]  }
  0xd7   :  { %4985 = vmatpush1.bf16.msra.mxu0 %v7586_v33  ;;  %5518 = vmatpush1.bf16.msra.mxu1 %v7589_v34  ;;  %v7681_v33 = vld [vmem:[%s11088_s1 + $0x888] ss:$16 sps:$4 sm:$0xff]   ;;  %v7686_v34 = vld [vmem:[%s11088_s1 + $0x8a4] ss:$16 sps:$4 sm:$0xff]  }
  0xd8   :  { %4986 = vmatprep.subr.bf16.mxu0 %v7594_v35  ;;  %5519 = vmatprep.subr.bf16.mxu1 %v7597_v36  ;;  %v7689_v35 = vld [vmem:[%s11088_s1 + $0x8ac] ss:$16 sps:$4 sm:$0xff]   ;;  %v7684_v36 = vld [vmem:[%s11088_s1 + $0x8a0] ss:$16 sps:$4 sm:$0xff]  }
  0xdb   :  { %4987 = vmatpush1.bf16.msra.mxu0 %v7592_v37  ;;  %5520 = vmatpush1.bf16.msra.mxu1 %v7595_v38  ;;  %v7687_v37 = vld [vmem:[%s11088_s1 + $0x8a8] ss:$16 sps:$4 sm:$0xff]   ;;  %v7692_v38 = vld [vmem:[%s11088_s1 + $0x8c4] ss:$16 sps:$4 sm:$0xff]  }
  0xdc   :  { %4988 = vmatprep.subr.bf16.mxu0 %v7600_v39  ;;  %5521 = vmatprep.subr.bf16.mxu1 %v7603_v40  ;;  %v7695_v39 = vld [vmem:[%s11088_s1 + $0x8cc] ss:$16 sps:$4 sm:$0xff]   ;;  %v7690_v40 = vld [vmem:[%s11088_s1 + $0x8c0] ss:$16 sps:$4 sm:$0xff]  }
  0xdf   :  { %4989 = vmatpush1.bf16.msra.mxu0 %v7598_v41  ;;  %5522 = vmatpush1.bf16.msra.mxu1 %v7601_v42  ;;  %v7693_v41 = vld [vmem:[%s11088_s1 + $0x8c8] ss:$16 sps:$4 sm:$0xff]   ;;  %v7698_v42 = vld [vmem:[%s11088_s1 + $0x8e4] ss:$16 sps:$4 sm:$0xff]  }
  0xe0   :  { %4990 = vmatprep.subr.bf16.mxu0 %v7606_v43  ;;  %5523 = vmatprep.subr.bf16.mxu1 %v7609_v44  ;;  %v7701_v43 = vld [vmem:[%s11088_s1 + $0x8ec] ss:$16 sps:$4 sm:$0xff]   ;;  %v7696_v44 = vld [vmem:[%s11088_s1 + $0x8e0] ss:$16 sps:$4 sm:$0xff]  }
  0xe3   :  { %4991 = vmatpush1.bf16.msra.mxu0 %v7604_v45  ;;  %5524 = vmatpush1.bf16.msra.mxu1 %v7607_v46  ;;  %v7699_v45 = vld [vmem:[%s11088_s1 + $0x8e8] ss:$16 sps:$4 sm:$0xff]   ;;  %v7704_v46 = vld [vmem:[%s11088_s1 + $0x904] ss:$16 sps:$4 sm:$0xff]  }
  0xe4   :  { %4992 = vmatprep.subr.bf16.mxu0 %v7612_v47  ;;  %5525 = vmatprep.subr.bf16.mxu1 %v7615_v48  ;;  %v7707_v47 = vld [vmem:[%s11088_s1 + $0x90c] ss:$16 sps:$4 sm:$0xff]   ;;  %v7702_v48 = vld [vmem:[%s11088_s1 + $0x900] ss:$16 sps:$4 sm:$0xff]  }
  0xe7   :  { %4993 = vmatpush1.bf16.msra.mxu0 %v7610_v49  ;;  %5526 = vmatpush1.bf16.msra.mxu1 %v7613_v50  ;;  %v7705_v49 = vld [vmem:[%s11088_s1 + $0x908] ss:$16 sps:$4 sm:$0xff]   ;;  %v7710_v50 = vld [vmem:[%s11088_s1 + $0x924] ss:$16 sps:$4 sm:$0xff]  }
  0xe8   :  { %4994 = vmatprep.subr.bf16.mxu0 %v7618_v51  ;;  %5527 = vmatprep.subr.bf16.mxu1 %v7621_v52  ;;  %v7713_v51 = vld [vmem:[%s11088_s1 + $0x92c] ss:$16 sps:$4 sm:$0xff]   ;;  %v7708_v52 = vld [vmem:[%s11088_s1 + $0x920] ss:$16 sps:$4 sm:$0xff]  }
  0xeb   :  { %4995 = vmatpush1.bf16.msra.mxu0 %v7616_v53  ;;  %5528 = vmatpush1.bf16.msra.mxu1 %v7619_v54  ;;  %v7711_v53 = vld [vmem:[%s11088_s1 + $0x928] ss:$16 sps:$4 sm:$0xff]   ;;  %v7716_v54 = vld [vmem:[%s11088_s1 + $0x944] ss:$16 sps:$4 sm:$0xff]  }
  0xec   :  { %4996 = vmatprep.subr.bf16.mxu0 %v7624_v55  ;;  %5529 = vmatprep.subr.bf16.mxu1 %v7627_v56  ;;  %v7719_v55 = vld [vmem:[%s11088_s1 + $0x94c] ss:$16 sps:$4 sm:$0xff]   ;;  %v7714_v56 = vld [vmem:[%s11088_s1 + $0x940] ss:$16 sps:$4 sm:$0xff]  }
  0xef   :  { %4997 = vmatpush1.bf16.msra.mxu0 %v7622_v57  ;;  %5530 = vmatpush1.bf16.msra.mxu1 %v7625_v58  ;;  %v7717_v57 = vld [vmem:[%s11088_s1 + $0x948] ss:$16 sps:$4 sm:$0xff]   ;;  %v7722_v58 = vld [vmem:[%s11088_s1 + $0x964] ss:$16 sps:$4 sm:$0xff]  }
  0xf0   :  { %4998 = vmatprep.subr.bf16.mxu0 %v7630_v59  ;;  %5531 = vmatprep.subr.bf16.mxu1 %v7633_v60  ;;  %v7725_v59 = vld [vmem:[%s11088_s1 + $0x96c] ss:$16 sps:$4 sm:$0xff]   ;;  %v7720_v60 = vld [vmem:[%s11088_s1 + $0x960] ss:$16 sps:$4 sm:$0xff]  }
  0xf3   :  { %4999 = vmatpush1.bf16.msra.mxu0 %v7628_v61  ;;  %5532 = vmatpush1.bf16.msra.mxu1 %v7631_v62  ;;  %v7723_v61 = vld [vmem:[%s11088_s1 + $0x968] ss:$16 sps:$4 sm:$0xff]   ;;  %v7728_v62 = vld [vmem:[%s11088_s1 + $0x984] ss:$16 sps:$4 sm:$0xff]  }
  0xf4   :  { %5000 = vmatprep.subr.bf16.mxu0 %v7636_v63  ;;  %5533 = vmatprep.subr.bf16.mxu1 %v7639_v0  ;;  %v7731_v63 = vld [vmem:[%s11088_s1 + $0x98c] ss:$16 sps:$4 sm:$0xff]   ;;  %v7726_v0 = vld [vmem:[%s11088_s1 + $0x980] ss:$16 sps:$4 sm:$0xff]  }
  0xf7   :  { %5001 = vmatpush1.bf16.msra.mxu0 %v7634_v1  ;;  %5534 = vmatpush1.bf16.msra.mxu1 %v7637_v2  ;;  %v7729_v1 = vld [vmem:[%s11088_s1 + $0x988] ss:$16 sps:$4 sm:$0xff]   ;;  %v7734_v2 = vld [vmem:[%s11088_s1 + $0x9a4] ss:$16 sps:$4 sm:$0xff]  }
  0xf8   :  { %5002 = vmatprep.subr.bf16.mxu0 %v7642_v3  ;;  %5535 = vmatprep.subr.bf16.mxu1 %v7645_v4  ;;  %v7737_v3 = vld [vmem:[%s11088_s1 + $0x9ac] ss:$16 sps:$4 sm:$0xff]   ;;  %v7732_v4 = vld [vmem:[%s11088_s1 + $0x9a0] ss:$16 sps:$4 sm:$0xff]  }
  0xfb   :  { %5003 = vmatpush1.bf16.msra.mxu0 %v7640_v5  ;;  %5536 = vmatpush1.bf16.msra.mxu1 %v7643_v6  ;;  %v7735_v5 = vld [vmem:[%s11088_s1 + $0x9a8] ss:$16 sps:$4 sm:$0xff]   ;;  %v7740_v6 = vld [vmem:[%s11088_s1 + $0x9c4] ss:$16 sps:$4 sm:$0xff]  }
  0xfc   :  { %5004 = vmatprep.subr.bf16.mxu0 %v7648_v7  ;;  %5537 = vmatprep.subr.bf16.mxu1 %v7651_v8  ;;  %v7743_v7 = vld [vmem:[%s11088_s1 + $0x9cc] ss:$16 sps:$4 sm:$0xff]   ;;  %v7738_v8 = vld [vmem:[%s11088_s1 + $0x9c0] ss:$16 sps:$4 sm:$0xff]  }
  0xff   :  { %5005 = vmatpush1.bf16.msra.mxu0 %v7646_v9  ;;  %5538 = vmatpush1.bf16.msra.mxu1 %v7649_v10  ;;  %v7741_v9 = vld [vmem:[%s11088_s1 + $0x9c8] ss:$16 sps:$4 sm:$0xff]   ;;  %v7746_v10 = vld [vmem:[%s11088_s1 + $0x9e4] ss:$16 sps:$4 sm:$0xff]  }
 0x100   :  { %5015 = vmatprep.subr.bf16.mxu0 %v7656_v12  ;;  %5548 = vmatprep.subr.bf16.mxu1 %v7659_v13  ;;  %v7749_v12 = vld [vmem:[%s11088_s1 + $0x9ec] ss:$16 sps:$4 sm:$0xff]   ;;  %v7744_v13 = vld [vmem:[%s11088_s1 + $0x9e0] ss:$16 sps:$4 sm:$0xff]  }
 0x102   :  { %5007 = vmatmul.mubr.bf16.vlgmr.msra.gmra.mrb[0].mxu0 %v6279_v11  ;;  %5540 = vmatmul.mubr.bf16.vlgmr.msra.gmra.mrb[0].mxu1 %v6279_v11  ;;  %v7754_v11 = vld [vmem:[%s11088_s1 + $0xa04] ss:$16 sps:$4 sm:$0xff]  }
 0x103   :  { %5016 = vmatpush1.bf16.msra.mxu0 %v7654_v15  ;;  %5549 = vmatpush1.bf16.msra.mxu1 %v7657_v17  ;;  %v7747_v15 = vld [vmem:[%s11088_s1 + $0x9e8] ss:$16 sps:$4 sm:$0xff]   ;;  %v7757_v17 = vld [vmem:[%s11088_s1 + $0xa0c] ss:$16 sps:$4 sm:$0xff]  }
 0x104   :  { %5017 = vmatprep.subr.bf16.mxu0 %v7662_v18  ;;  %5550 = vmatprep.subr.bf16.mxu1 %v7665_v14  ;;  %v9532_v18 = vld [vmem:[%s11089_s0 + $0x28] sm:$0xff]  ;;  %v6281_v14 = vcombine.low %v9336_v16, %v9336_v16 }
 0x105   :  { %5047 = vmatprep.mubr.bf16.mxu0 %v6282_v19  ;;  %5580 = vmatprep.mubr.bf16.mxu1 %v6282_v19  ;;  %v7752_v19 = vld [vmem:[%s11088_s1 + $0xa00] ss:$16 sps:$4 sm:$0xff]   ;;  %v7763_v16 = vld [vmem:[%s11088_s1 + $0xa2c] ss:$16 sps:$4 sm:$0xff]  }
 0x107   :  { %5018 = vmatpush1.bf16.msra.mxu0 %v7660_v20  ;;  %5551 = vmatpush1.bf16.msra.mxu1 %v7663_v21  ;;  %v7755_v20 = vld [vmem:[%s11088_s1 + $0xa08] ss:$16 sps:$4 sm:$0xff]   ;;  %v7760_v21 = vld [vmem:[%s11088_s1 + $0xa24] ss:$16 sps:$4 sm:$0xff]  }
 0x108   :  { %5019 = vmatprep.subr.bf16.mxu0 %v7668_v22  ;;  %5552 = vmatprep.subr.bf16.mxu1 %v7671_v23  ;;  %v6284_v22 = vcombine.high %v9532_v18, %v9532_v18  ;;  %v7758_v23 = vld [vmem:[%s11088_s1 + $0xa20] ss:$16 sps:$4 sm:$0xff]  }
 0x10b   :  { %5020 = vmatpush1.bf16.msra.mxu0 %v7666_v24  ;;  %5553 = vmatpush1.bf16.msra.mxu1 %v7669_v25  ;;  %v7761_v24 = vld [vmem:[%s11088_s1 + $0xa28] ss:$16 sps:$4 sm:$0xff]   ;;  %v7766_v25 = vld [vmem:[%s11088_s1 + $0xa44] ss:$16 sps:$4 sm:$0xff]  }
 0x10c   :  { %5021 = vmatprep.subr.bf16.mxu0 %v7674_v26  ;;  %5554 = vmatprep.subr.bf16.mxu1 %v7677_v27  ;;  %v7769_v26 = vld [vmem:[%s11088_s1 + $0xa4c] ss:$16 sps:$4 sm:$0xff]   ;;  %v7764_v27 = vld [vmem:[%s11088_s1 + $0xa40] ss:$16 sps:$4 sm:$0xff]  }
 0x10f   :  { %5022 = vmatpush1.bf16.msra.mxu0 %v7672_v28  ;;  %5555 = vmatpush1.bf16.msra.mxu1 %v7675_v29  ;;  %v7767_v28 = vld [vmem:[%s11088_s1 + $0xa48] ss:$16 sps:$4 sm:$0xff]   ;;  %v7772_v29 = vld [vmem:[%s11088_s1 + $0xa64] ss:$16 sps:$4 sm:$0xff]  }
 0x110   :  { %5023 = vmatprep.subr.bf16.mxu0 %v7680_v30  ;;  %5556 = vmatprep.subr.bf16.mxu1 %v7683_v31  ;;  %v7775_v30 = vld [vmem:[%s11088_s1 + $0xa6c] ss:$16 sps:$4 sm:$0xff]   ;;  %v7770_v31 = vld [vmem:[%s11088_s1 + $0xa60] ss:$16 sps:$4 sm:$0xff]  }
 0x113   :  { %5024 = vmatpush1.bf16.msra.mxu0 %v7678_v32  ;;  %5557 = vmatpush1.bf16.msra.mxu1 %v7681_v33  ;;  %v7773_v32 = vld [vmem:[%s11088_s1 + $0xa68] ss:$16 sps:$4 sm:$0xff]   ;;  %v7778_v33 = vld [vmem:[%s11088_s1 + $0xa84] ss:$16 sps:$4 sm:$0xff]  }
 0x114   :  { %5025 = vmatprep.subr.bf16.mxu0 %v7686_v34  ;;  %5558 = vmatprep.subr.bf16.mxu1 %v7689_v35  ;;  %v7781_v34 = vld [vmem:[%s11088_s1 + $0xa8c] ss:$16 sps:$4 sm:$0xff]   ;;  %v7776_v35 = vld [vmem:[%s11088_s1 + $0xa80] ss:$16 sps:$4 sm:$0xff]  }
 0x117   :  { %5026 = vmatpush1.bf16.msra.mxu0 %v7684_v36  ;;  %5559 = vmatpush1.bf16.msra.mxu1 %v7687_v37  ;;  %v7779_v36 = vld [vmem:[%s11088_s1 + $0xa88] ss:$16 sps:$4 sm:$0xff]   ;;  %v7784_v37 = vld [vmem:[%s11088_s1 + $0xaa4] ss:$16 sps:$4 sm:$0xff]  }
 0x118   :  { %5027 = vmatprep.subr.bf16.mxu0 %v7692_v38  ;;  %5560 = vmatprep.subr.bf16.mxu1 %v7695_v39  ;;  %v7787_v38 = vld [vmem:[%s11088_s1 + $0xaac] ss:$16 sps:$4 sm:$0xff]   ;;  %v7782_v39 = vld [vmem:[%s11088_s1 + $0xaa0] ss:$16 sps:$4 sm:$0xff]  }
 0x11b   :  { %5028 = vmatpush1.bf16.msra.mxu0 %v7690_v40  ;;  %5561 = vmatpush1.bf16.msra.mxu1 %v7693_v41  ;;  %v7785_v40 = vld [vmem:[%s11088_s1 + $0xaa8] ss:$16 sps:$4 sm:$0xff]   ;;  %v7790_v41 = vld [vmem:[%s11088_s1 + $0xac4] ss:$16 sps:$4 sm:$0xff]  }
 0x11c   :  { %5029 = vmatprep.subr.bf16.mxu0 %v7698_v42  ;;  %5562 = vmatprep.subr.bf16.mxu1 %v7701_v43  ;;  %v7793_v42 = vld [vmem:[%s11088_s1 + $0xacc] ss:$16 sps:$4 sm:$0xff]   ;;  %v7788_v43 = vld [vmem:[%s11088_s1 + $0xac0] ss:$16 sps:$4 sm:$0xff]  }
 0x11f   :  { %5030 = vmatpush1.bf16.msra.mxu0 %v7696_v44  ;;  %5563 = vmatpush1.bf16.msra.mxu1 %v7699_v45  ;;  %v7791_v44 = vld [vmem:[%s11088_s1 + $0xac8] ss:$16 sps:$4 sm:$0xff]   ;;  %v7796_v45 = vld [vmem:[%s11088_s1 + $0xae4] ss:$16 sps:$4 sm:$0xff]  }
 0x120   :  { %5031 = vmatprep.subr.bf16.mxu0 %v7704_v46  ;;  %5564 = vmatprep.subr.bf16.mxu1 %v7707_v47  ;;  %v7799_v46 = vld [vmem:[%s11088_s1 + $0xaec] ss:$16 sps:$4 sm:$0xff]   ;;  %v7794_v47 = vld [vmem:[%s11088_s1 + $0xae0] ss:$16 sps:$4 sm:$0xff]  }
 0x123   :  { %5032 = vmatpush1.bf16.msra.mxu0 %v7702_v48  ;;  %5565 = vmatpush1.bf16.msra.mxu1 %v7705_v49  ;;  %v7797_v48 = vld [vmem:[%s11088_s1 + $0xae8] ss:$16 sps:$4 sm:$0xff]   ;;  %v7802_v49 = vld [vmem:[%s11088_s1 + $0xb04] ss:$16 sps:$4 sm:$0xff]  }
 0x124   :  { %5033 = vmatprep.subr.bf16.mxu0 %v7710_v50  ;;  %5566 = vmatprep.subr.bf16.mxu1 %v7713_v51  ;;  %v7805_v50 = vld [vmem:[%s11088_s1 + $0xb0c] ss:$16 sps:$4 sm:$0xff]   ;;  %v7800_v51 = vld [vmem:[%s11088_s1 + $0xb00] ss:$16 sps:$4 sm:$0xff]  }
 0x127   :  { %5034 = vmatpush1.bf16.msra.mxu0 %v7708_v52  ;;  %5567 = vmatpush1.bf16.msra.mxu1 %v7711_v53  ;;  %v7803_v52 = vld [vmem:[%s11088_s1 + $0xb08] ss:$16 sps:$4 sm:$0xff]   ;;  %v7808_v53 = vld [vmem:[%s11088_s1 + $0xb24] ss:$16 sps:$4 sm:$0xff]  }
 0x128   :  { %5035 = vmatprep.subr.bf16.mxu0 %v7716_v54  ;;  %5568 = vmatprep.subr.bf16.mxu1 %v7719_v55  ;;  %v7811_v54 = vld [vmem:[%s11088_s1 + $0xb2c] ss:$16 sps:$4 sm:$0xff]   ;;  %v7806_v55 = vld [vmem:[%s11088_s1 + $0xb20] ss:$16 sps:$4 sm:$0xff]  }
 0x12b   :  { %5036 = vmatpush1.bf16.msra.mxu0 %v7714_v56  ;;  %5569 = vmatpush1.bf16.msra.mxu1 %v7717_v57  ;;  %v7809_v56 = vld [vmem:[%s11088_s1 + $0xb28] ss:$16 sps:$4 sm:$0xff]   ;;  %v7814_v57 = vld [vmem:[%s11088_s1 + $0xb44] ss:$16 sps:$4 sm:$0xff]  }
 0x12c   :  { %5037 = vmatprep.subr.bf16.mxu0 %v7722_v58  ;;  %5570 = vmatprep.subr.bf16.mxu1 %v7725_v59  ;;  %v7817_v58 = vld [vmem:[%s11088_s1 + $0xb4c] ss:$16 sps:$4 sm:$0xff]   ;;  %v7812_v59 = vld [vmem:[%s11088_s1 + $0xb40] ss:$16 sps:$4 sm:$0xff]  }
 0x12f   :  { %5038 = vmatpush1.bf16.msra.mxu0 %v7720_v60  ;;  %5571 = vmatpush1.bf16.msra.mxu1 %v7723_v61  ;;  %v7815_v60 = vld [vmem:[%s11088_s1 + $0xb48] ss:$16 sps:$4 sm:$0xff]   ;;  %v7820_v61 = vld [vmem:[%s11088_s1 + $0xb64] ss:$16 sps:$4 sm:$0xff]  }
 0x130   :  { %5039 = vmatprep.subr.bf16.mxu0 %v7728_v62  ;;  %5572 = vmatprep.subr.bf16.mxu1 %v7731_v63  ;;  %v7823_v62 = vld [vmem:[%s11088_s1 + $0xb6c] ss:$16 sps:$4 sm:$0xff]   ;;  %v7818_v63 = vld [vmem:[%s11088_s1 + $0xb60] ss:$16 sps:$4 sm:$0xff]  }
 0x133   :  { %5040 = vmatpush1.bf16.msra.mxu0 %v7726_v0  ;;  %5573 = vmatpush1.bf16.msra.mxu1 %v7729_v1  ;;  %v7821_v0 = vld [vmem:[%s11088_s1 + $0xb68] ss:$16 sps:$4 sm:$0xff]   ;;  %v7826_v1 = vld [vmem:[%s11088_s1 + $0xb84] ss:$16 sps:$4 sm:$0xff]  }
 0x134   :  { %5041 = vmatprep.subr.bf16.mxu0 %v7734_v2  ;;  %5574 = vmatprep.subr.bf16.mxu1 %v7737_v3  ;;  %v7829_v2 = vld [vmem:[%s11088_s1 + $0xb8c] ss:$16 sps:$4 sm:$0xff]   ;;  %v7824_v3 = vld [vmem:[%s11088_s1 + $0xb80] ss:$16 sps:$4 sm:$0xff]  }
 0x137   :  { %5042 = vmatpush1.bf16.msra.mxu0 %v7732_v4  ;;  %5575 = vmatpush1.bf16.msra.mxu1 %v7735_v5  ;;  %v7827_v4 = vld [vmem:[%s11088_s1 + $0xb88] ss:$16 sps:$4 sm:$0xff]   ;;  %v7832_v5 = vld [vmem:[%s11088_s1 + $0xba4] ss:$16 sps:$4 sm:$0xff]  }
 0x138   :  { %5043 = vmatprep.subr.bf16.mxu0 %v7740_v6  ;;  %5576 = vmatprep.subr.bf16.mxu1 %v7743_v7  ;;  %v7835_v6 = vld [vmem:[%s11088_s1 + $0xbac] ss:$16 sps:$4 sm:$0xff]   ;;  %v7830_v7 = vld [vmem:[%s11088_s1 + $0xba0] ss:$16 sps:$4 sm:$0xff]  }
 0x13b   :  { %5044 = vmatpush1.bf16.msra.mxu0 %v7738_v8  ;;  %5577 = vmatpush1.bf16.msra.mxu1 %v7741_v9  ;;  %v7833_v8 = vld [vmem:[%s11088_s1 + $0xba8] ss:$16 sps:$4 sm:$0xff]   ;;  %v7838_v9 = vld [vmem:[%s11088_s1 + $0xbc4] ss:$16 sps:$4 sm:$0xff]  }
 0x13c   :  { %5045 = vmatprep.subr.bf16.mxu0 %v7746_v10  ;;  %5578 = vmatprep.subr.bf16.mxu1 %v7749_v12  ;;  %v7841_v10 = vld [vmem:[%s11088_s1 + $0xbcc] ss:$16 sps:$4 sm:$0xff]   ;;  %v7836_v12 = vld [vmem:[%s11088_s1 + $0xbc0] ss:$16 sps:$4 sm:$0xff]  }
 0x13f   :  { %5046 = vmatpush1.bf16.msra.mxu0 %v7744_v13  ;;  %5579 = vmatpush1.bf16.msra.mxu1 %v7747_v15  ;;  %v7839_v13 = vld [vmem:[%s11088_s1 + $0xbc8] ss:$16 sps:$4 sm:$0xff]   ;;  %v7844_v15 = vld [vmem:[%s11088_s1 + $0xbe4] ss:$16 sps:$4 sm:$0xff]  }
 0x140   :  { %5056 = vmatprep.subr.bf16.mxu0 %v7754_v11  ;;  %5589 = vmatprep.subr.bf16.mxu1 %v7757_v17  ;;  %v7847_v11 = vld [vmem:[%s11088_s1 + $0xbec] ss:$16 sps:$4 sm:$0xff]   ;;  %v7842_v17 = vld [vmem:[%s11088_s1 + $0xbe0] ss:$16 sps:$4 sm:$0xff]  }
 0x142   :  { %5048 = vmatmul.mubr.bf16.vlgmr.msra.gmra.mrb[0].mxu0 %v6281_v14  ;;  %5581 = vmatmul.mubr.bf16.vlgmr.msra.gmra.mrb[0].mxu1 %v6281_v14  ;;  %v7845_v14 = vld [vmem:[%s11088_s1 + $0xbe8] ss:$16 sps:$4 sm:$0xff]  }
 0x143   :  { %5057 = vmatpush1.bf16.msra.mxu0 %v7752_v19  ;;  %5590 = vmatpush1.bf16.msra.mxu1 %v7755_v20  ;;  %v7852_v19 = vld [vmem:[%s11088_s1 + $0xc04] ss:$16 sps:$4 sm:$0xff]   ;;  %v7855_v20 = vld [vmem:[%s11088_s1 + $0xc0c] ss:$16 sps:$4 sm:$0xff]  }
 0x144   :  { %5058 = vmatprep.subr.bf16.mxu0 %v7760_v21  ;;  %5591 = vmatprep.subr.bf16.mxu1 %v7763_v16  ;;  %v9733_v21 = vld [vmem:[%s11089_s0 + $0x30] sm:$0xff]  ;;  %v6283_v16 = vcombine.low %v9532_v18, %v9532_v18  ;;  %v7861_v18 = vld [vmem:[%s11088_s1 + $0xc2c] ss:$16 sps:$4 sm:$0xff]  }
 0x145   :  { %5088 = vmatprep.mubr.bf16.mxu0 %v6284_v22  ;;  %5621 = vmatprep.mubr.bf16.mxu1 %v6284_v22  ;;  %v7850_v22 = vld [vmem:[%s11088_s1 + $0xc00] ss:$16 sps:$4 sm:$0xff]  }
 0x147   :  { %5059 = vmatpush1.bf16.msra.mxu0 %v7758_v23  ;;  %5592 = vmatpush1.bf16.msra.mxu1 %v7761_v24  ;;  %v7853_v23 = vld [vmem:[%s11088_s1 + $0xc08] ss:$16 sps:$4 sm:$0xff]   ;;  %v7858_v24 = vld [vmem:[%s11088_s1 + $0xc24] ss:$16 sps:$4 sm:$0xff]  }
 0x148   :  { %5060 = vmatprep.subr.bf16.mxu0 %v7766_v25  ;;  %5593 = vmatprep.subr.bf16.mxu1 %v7769_v26  ;;  %v6286_v25 = vcombine.high %v9733_v21, %v9733_v21  ;;  %v7856_v26 = vld [vmem:[%s11088_s1 + $0xc20] ss:$16 sps:$4 sm:$0xff]  }
 0x14b   :  { %5061 = vmatpush1.bf16.msra.mxu0 %v7764_v27  ;;  %5594 = vmatpush1.bf16.msra.mxu1 %v7767_v28  ;;  %v7859_v27 = vld [vmem:[%s11088_s1 + $0xc28] ss:$16 sps:$4 sm:$0xff]   ;;  %v7864_v28 = vld [vmem:[%s11088_s1 + $0xc44] ss:$16 sps:$4 sm:$0xff]  }
 0x14c   :  { %5062 = vmatprep.subr.bf16.mxu0 %v7772_v29  ;;  %5595 = vmatprep.subr.bf16.mxu1 %v7775_v30  ;;  %v7867_v29 = vld [vmem:[%s11088_s1 + $0xc4c] ss:$16 sps:$4 sm:$0xff]   ;;  %v7862_v30 = vld [vmem:[%s11088_s1 + $0xc40] ss:$16 sps:$4 sm:$0xff]  }
 0x14f   :  { %5063 = vmatpush1.bf16.msra.mxu0 %v7770_v31  ;;  %5596 = vmatpush1.bf16.msra.mxu1 %v7773_v32  ;;  %v7865_v31 = vld [vmem:[%s11088_s1 + $0xc48] ss:$16 sps:$4 sm:$0xff]   ;;  %v7870_v32 = vld [vmem:[%s11088_s1 + $0xc64] ss:$16 sps:$4 sm:$0xff]  }
 0x150   :  { %5064 = vmatprep.subr.bf16.mxu0 %v7778_v33  ;;  %5597 = vmatprep.subr.bf16.mxu1 %v7781_v34  ;;  %v7873_v33 = vld [vmem:[%s11088_s1 + $0xc6c] ss:$16 sps:$4 sm:$0xff]   ;;  %v7868_v34 = vld [vmem:[%s11088_s1 + $0xc60] ss:$16 sps:$4 sm:$0xff]  }
 0x153   :  { %5065 = vmatpush1.bf16.msra.mxu0 %v7776_v35  ;;  %5598 = vmatpush1.bf16.msra.mxu1 %v7779_v36  ;;  %v7871_v35 = vld [vmem:[%s11088_s1 + $0xc68] ss:$16 sps:$4 sm:$0xff]   ;;  %v7876_v36 = vld [vmem:[%s11088_s1 + $0xc84] ss:$16 sps:$4 sm:$0xff]  }
 0x154   :  { %5066 = vmatprep.subr.bf16.mxu0 %v7784_v37  ;;  %5599 = vmatprep.subr.bf16.mxu1 %v7787_v38  ;;  %v7879_v37 = vld [vmem:[%s11088_s1 + $0xc8c] ss:$16 sps:$4 sm:$0xff]   ;;  %v7874_v38 = vld [vmem:[%s11088_s1 + $0xc80] ss:$16 sps:$4 sm:$0xff]  }
 0x157   :  { %5067 = vmatpush1.bf16.msra.mxu0 %v7782_v39  ;;  %5600 = vmatpush1.bf16.msra.mxu1 %v7785_v40  ;;  %v7877_v39 = vld [vmem:[%s11088_s1 + $0xc88] ss:$16 sps:$4 sm:$0xff]   ;;  %v7882_v40 = vld [vmem:[%s11088_s1 + $0xca4] ss:$16 sps:$4 sm:$0xff]  }
 0x158   :  { %5068 = vmatprep.subr.bf16.mxu0 %v7790_v41  ;;  %5601 = vmatprep.subr.bf16.mxu1 %v7793_v42  ;;  %v7885_v41 = vld [vmem:[%s11088_s1 + $0xcac] ss:$16 sps:$4 sm:$0xff]   ;;  %v7880_v42 = vld [vmem:[%s11088_s1 + $0xca0] ss:$16 sps:$4 sm:$0xff]  }
 0x15b   :  { %5069 = vmatpush1.bf16.msra.mxu0 %v7788_v43  ;;  %5602 = vmatpush1.bf16.msra.mxu1 %v7791_v44  ;;  %v7883_v43 = vld [vmem:[%s11088_s1 + $0xca8] ss:$16 sps:$4 sm:$0xff]   ;;  %v7888_v44 = vld [vmem:[%s11088_s1 + $0xcc4] ss:$16 sps:$4 sm:$0xff]  }
 0x15c   :  { %5070 = vmatprep.subr.bf16.mxu0 %v7796_v45  ;;  %5603 = vmatprep.subr.bf16.mxu1 %v7799_v46  ;;  %v7891_v45 = vld [vmem:[%s11088_s1 + $0xccc] ss:$16 sps:$4 sm:$0xff]   ;;  %v7886_v46 = vld [vmem:[%s11088_s1 + $0xcc0] ss:$16 sps:$4 sm:$0xff]  }
 0x15f   :  { %5071 = vmatpush1.bf16.msra.mxu0 %v7794_v47  ;;  %5604 = vmatpush1.bf16.msra.mxu1 %v7797_v48  ;;  %v7889_v47 = vld [vmem:[%s11088_s1 + $0xcc8] ss:$16 sps:$4 sm:$0xff]   ;;  %v7894_v48 = vld [vmem:[%s11088_s1 + $0xce4] ss:$16 sps:$4 sm:$0xff]  }
 0x160   :  { %5072 = vmatprep.subr.bf16.mxu0 %v7802_v49  ;;  %5605 = vmatprep.subr.bf16.mxu1 %v7805_v50  ;;  %v7897_v49 = vld [vmem:[%s11088_s1 + $0xcec] ss:$16 sps:$4 sm:$0xff]   ;;  %v7892_v50 = vld [vmem:[%s11088_s1 + $0xce0] ss:$16 sps:$4 sm:$0xff]  }
 0x163   :  { %5073 = vmatpush1.bf16.msra.mxu0 %v7800_v51  ;;  %5606 = vmatpush1.bf16.msra.mxu1 %v7803_v52  ;;  %v7895_v51 = vld [vmem:[%s11088_s1 + $0xce8] ss:$16 sps:$4 sm:$0xff]   ;;  %v7900_v52 = vld [vmem:[%s11088_s1 + $0xd04] ss:$16 sps:$4 sm:$0xff]  }
 0x164   :  { %5074 = vmatprep.subr.bf16.mxu0 %v7808_v53  ;;  %5607 = vmatprep.subr.bf16.mxu1 %v7811_v54  ;;  %v7903_v53 = vld [vmem:[%s11088_s1 + $0xd0c] ss:$16 sps:$4 sm:$0xff]   ;;  %v7898_v54 = vld [vmem:[%s11088_s1 + $0xd00] ss:$16 sps:$4 sm:$0xff]  }
 0x167   :  { %5075 = vmatpush1.bf16.msra.mxu0 %v7806_v55  ;;  %5608 = vmatpush1.bf16.msra.mxu1 %v7809_v56  ;;  %v7901_v55 = vld [vmem:[%s11088_s1 + $0xd08] ss:$16 sps:$4 sm:$0xff]   ;;  %v7906_v56 = vld [vmem:[%s11088_s1 + $0xd24] ss:$16 sps:$4 sm:$0xff]  }
 0x168   :  { %5076 = vmatprep.subr.bf16.mxu0 %v7814_v57  ;;  %5609 = vmatprep.subr.bf16.mxu1 %v7817_v58  ;;  %v7909_v57 = vld [vmem:[%s11088_s1 + $0xd2c] ss:$16 sps:$4 sm:$0xff]   ;;  %v7904_v58 = vld [vmem:[%s11088_s1 + $0xd20] ss:$16 sps:$4 sm:$0xff]  }
 0x16b   :  { %5077 = vmatpush1.bf16.msra.mxu0 %v7812_v59  ;;  %5610 = vmatpush1.bf16.msra.mxu1 %v7815_v60  ;;  %v7907_v59 = vld [vmem:[%s11088_s1 + $0xd28] ss:$16 sps:$4 sm:$0xff]   ;;  %v7912_v60 = vld [vmem:[%s11088_s1 + $0xd44] ss:$16 sps:$4 sm:$0xff]  }
 0x16c   :  { %5078 = vmatprep.subr.bf16.mxu0 %v7820_v61  ;;  %5611 = vmatprep.subr.bf16.mxu1 %v7823_v62  ;;  %v7915_v61 = vld [vmem:[%s11088_s1 + $0xd4c] ss:$16 sps:$4 sm:$0xff]   ;;  %v7910_v62 = vld [vmem:[%s11088_s1 + $0xd40] ss:$16 sps:$4 sm:$0xff]  }
 0x16f   :  { %5079 = vmatpush1.bf16.msra.mxu0 %v7818_v63  ;;  %5612 = vmatpush1.bf16.msra.mxu1 %v7821_v0  ;;  %v7913_v63 = vld [vmem:[%s11088_s1 + $0xd48] ss:$16 sps:$4 sm:$0xff]   ;;  %v7918_v0 = vld [vmem:[%s11088_s1 + $0xd64] ss:$16 sps:$4 sm:$0xff]  }
 0x170   :  { %5080 = vmatprep.subr.bf16.mxu0 %v7826_v1  ;;  %5613 = vmatprep.subr.bf16.mxu1 %v7829_v2  ;;  %v7921_v1 = vld [vmem:[%s11088_s1 + $0xd6c] ss:$16 sps:$4 sm:$0xff]   ;;  %v7916_v2 = vld [vmem:[%s11088_s1 + $0xd60] ss:$16 sps:$4 sm:$0xff]  }
 0x173   :  { %5081 = vmatpush1.bf16.msra.mxu0 %v7824_v3  ;;  %5614 = vmatpush1.bf16.msra.mxu1 %v7827_v4  ;;  %v7919_v3 = vld [vmem:[%s11088_s1 + $0xd68] ss:$16 sps:$4 sm:$0xff]   ;;  %v7924_v4 = vld [vmem:[%s11088_s1 + $0xd84] ss:$16 sps:$4 sm:$0xff]  }
 0x174   :  { %5082 = vmatprep.subr.bf16.mxu0 %v7832_v5  ;;  %5615 = vmatprep.subr.bf16.mxu1 %v7835_v6  ;;  %v7927_v5 = vld [vmem:[%s11088_s1 + $0xd8c] ss:$16 sps:$4 sm:$0xff]   ;;  %v7922_v6 = vld [vmem:[%s11088_s1 + $0xd80] ss:$16 sps:$4 sm:$0xff]  }
 0x177   :  { %5083 = vmatpush1.bf16.msra.mxu0 %v7830_v7  ;;  %5616 = vmatpush1.bf16.msra.mxu1 %v7833_v8  ;;  %v7925_v7 = vld [vmem:[%s11088_s1 + $0xd88] ss:$16 sps:$4 sm:$0xff]   ;;  %v7930_v8 = vld [vmem:[%s11088_s1 + $0xda4] ss:$16 sps:$4 sm:$0xff]  }
 0x178   :  { %5084 = vmatprep.subr.bf16.mxu0 %v7838_v9  ;;  %5617 = vmatprep.subr.bf16.mxu1 %v7841_v10  ;;  %v7933_v9 = vld [vmem:[%s11088_s1 + $0xdac] ss:$16 sps:$4 sm:$0xff]   ;;  %v7928_v10 = vld [vmem:[%s11088_s1 + $0xda0] ss:$16 sps:$4 sm:$0xff]  }
 0x17b   :  { %5085 = vmatpush1.bf16.msra.mxu0 %v7836_v12  ;;  %5618 = vmatpush1.bf16.msra.mxu1 %v7839_v13  ;;  %v7931_v12 = vld [vmem:[%s11088_s1 + $0xda8] ss:$16 sps:$4 sm:$0xff]   ;;  %v7936_v13 = vld [vmem:[%s11088_s1 + $0xdc4] ss:$16 sps:$4 sm:$0xff]  }
 0x17c   :  { %5086 = vmatprep.subr.bf16.mxu0 %v7844_v15  ;;  %5619 = vmatprep.subr.bf16.mxu1 %v7847_v11  ;;  %v7939_v15 = vld [vmem:[%s11088_s1 + $0xdcc] ss:$16 sps:$4 sm:$0xff]   ;;  %v7934_v11 = vld [vmem:[%s11088_s1 + $0xdc0] ss:$16 sps:$4 sm:$0xff]  }
 0x17f   :  { %5087 = vmatpush1.bf16.msra.mxu0 %v7842_v17  ;;  %5620 = vmatpush1.bf16.msra.mxu1 %v7845_v14  ;;  %v7937_v17 = vld [vmem:[%s11088_s1 + $0xdc8] ss:$16 sps:$4 sm:$0xff]   ;;  %v7942_v14 = vld [vmem:[%s11088_s1 + $0xde4] ss:$16 sps:$4 sm:$0xff]  }
 0x180   :  { %5097 = vmatprep.subr.bf16.mxu0 %v7852_v19  ;;  %5630 = vmatprep.subr.bf16.mxu1 %v7855_v20  ;;  %v7945_v19 = vld [vmem:[%s11088_s1 + $0xdec] ss:$16 sps:$4 sm:$0xff]   ;;  %v7940_v20 = vld [vmem:[%s11088_s1 + $0xde0] ss:$16 sps:$4 sm:$0xff]  }
 0x182   :  { %5089 = vmatmul.mubr.bf16.vlgmr.msra.gmra.mrb[0].mxu0 %v6283_v16  ;;  %5622 = vmatmul.mubr.bf16.vlgmr.msra.gmra.mrb[0].mxu1 %v6283_v16  ;;  %v7943_v16 = vld [vmem:[%s11088_s1 + $0xde8] ss:$16 sps:$4 sm:$0xff]  }
 0x183   :  { %5098 = vmatpush1.bf16.msra.mxu0 %v7850_v22  ;;  %5631 = vmatpush1.bf16.msra.mxu1 %v7853_v23  ;;  %v7950_v22 = vld [vmem:[%s11088_s1 + $0xe04] ss:$16 sps:$4 sm:$0xff]   ;;  %v7953_v23 = vld [vmem:[%s11088_s1 + $0xe0c] ss:$16 sps:$4 sm:$0xff]  }
 0x184   :  { %5099 = vmatprep.subr.bf16.mxu0 %v7858_v24  ;;  %5632 = vmatprep.subr.bf16.mxu1 %v7861_v18  ;;  %v9934_v24 = vld [vmem:[%s11089_s0 + $0x38] sm:$0xff]  ;;  %v6285_v18 = vcombine.low %v9733_v21, %v9733_v21 }
 0x185   :  { %5129 = vmatprep.mubr.bf16.mxu0 %v6286_v25  ;;  %5662 = vmatprep.mubr.bf16.mxu1 %v6286_v25  ;;  %v7948_v25 = vld [vmem:[%s11088_s1 + $0xe00] ss:$16 sps:$4 sm:$0xff]   ;;  %v7959_v21 = vld [vmem:[%s11088_s1 + $0xe2c] ss:$16 sps:$4 sm:$0xff]  }
 0x187   :  { %5100 = vmatpush1.bf16.msra.mxu0 %v7856_v26  ;;  %5633 = vmatpush1.bf16.msra.mxu1 %v7859_v27  ;;  %v7951_v26 = vld [vmem:[%s11088_s1 + $0xe08] ss:$16 sps:$4 sm:$0xff]   ;;  %v7956_v27 = vld [vmem:[%s11088_s1 + $0xe24] ss:$16 sps:$4 sm:$0xff]  }
 0x188   :  { %5101 = vmatprep.subr.bf16.mxu0 %v7864_v28  ;;  %5634 = vmatprep.subr.bf16.mxu1 %v7867_v29  ;;  %v6288_v28 = vcombine.high %v9934_v24, %v9934_v24  ;;  %v7954_v29 = vld [vmem:[%s11088_s1 + $0xe20] ss:$16 sps:$4 sm:$0xff]  }
 0x18b   :  { %5102 = vmatpush1.bf16.msra.mxu0 %v7862_v30  ;;  %5635 = vmatpush1.bf16.msra.mxu1 %v7865_v31  ;;  %v7957_v30 = vld [vmem:[%s11088_s1 + $0xe28] ss:$16 sps:$4 sm:$0xff]   ;;  %v7962_v31 = vld [vmem:[%s11088_s1 + $0xe44] ss:$16 sps:$4 sm:$0xff]  }
 0x18c   :  { %5103 = vmatprep.subr.bf16.mxu0 %v7870_v32  ;;  %5636 = vmatprep.subr.bf16.mxu1 %v7873_v33  ;;  %v7965_v32 = vld [vmem:[%s11088_s1 + $0xe4c] ss:$16 sps:$4 sm:$0xff]   ;;  %v7960_v33 = vld [vmem:[%s11088_s1 + $0xe40] ss:$16 sps:$4 sm:$0xff]  }
 0x18f   :  { %5104 = vmatpush1.bf16.msra.mxu0 %v7868_v34  ;;  %5637 = vmatpush1.bf16.msra.mxu1 %v7871_v35  ;;  %v7963_v34 = vld [vmem:[%s11088_s1 + $0xe48] ss:$16 sps:$4 sm:$0xff]   ;;  %v7968_v35 = vld [vmem:[%s11088_s1 + $0xe64] ss:$16 sps:$4 sm:$0xff]  }
 0x190   :  { %5105 = vmatprep.subr.bf16.mxu0 %v7876_v36  ;;  %5638 = vmatprep.subr.bf16.mxu1 %v7879_v37  ;;  %v7971_v36 = vld [vmem:[%s11088_s1 + $0xe6c] ss:$16 sps:$4 sm:$0xff]   ;;  %v7966_v37 = vld [vmem:[%s11088_s1 + $0xe60] ss:$16 sps:$4 sm:$0xff]  }
 0x193   :  { %5106 = vmatpush1.bf16.msra.mxu0 %v7874_v38  ;;  %5639 = vmatpush1.bf16.msra.mxu1 %v7877_v39  ;;  %v7969_v38 = vld [vmem:[%s11088_s1 + $0xe68] ss:$16 sps:$4 sm:$0xff]   ;;  %v7974_v39 = vld [vmem:[%s11088_s1 + $0xe84] ss:$16 sps:$4 sm:$0xff]  }
 0x194   :  { %5107 = vmatprep.subr.bf16.mxu0 %v7882_v40  ;;  %5640 = vmatprep.subr.bf16.mxu1 %v7885_v41  ;;  %v7977_v40 = vld [vmem:[%s11088_s1 + $0xe8c] ss:$16 sps:$4 sm:$0xff]   ;;  %v7972_v41 = vld [vmem:[%s11088_s1 + $0xe80] ss:$16 sps:$4 sm:$0xff]  }
 0x197   :  { %5108 = vmatpush1.bf16.msra.mxu0 %v7880_v42  ;;  %5641 = vmatpush1.bf16.msra.mxu1 %v7883_v43  ;;  %v7975_v42 = vld [vmem:[%s11088_s1 + $0xe88] ss:$16 sps:$4 sm:$0xff]   ;;  %v7980_v43 = vld [vmem:[%s11088_s1 + $0xea4] ss:$16 sps:$4 sm:$0xff]  }
 0x198   :  { %5109 = vmatprep.subr.bf16.mxu0 %v7888_v44  ;;  %5642 = vmatprep.subr.bf16.mxu1 %v7891_v45  ;;  %v7983_v44 = vld [vmem:[%s11088_s1 + $0xeac] ss:$16 sps:$4 sm:$0xff]   ;;  %v7978_v45 = vld [vmem:[%s11088_s1 + $0xea0] ss:$16 sps:$4 sm:$0xff]  }
 0x19b   :  { %5110 = vmatpush1.bf16.msra.mxu0 %v7886_v46  ;;  %5643 = vmatpush1.bf16.msra.mxu1 %v7889_v47  ;;  %v7981_v46 = vld [vmem:[%s11088_s1 + $0xea8] ss:$16 sps:$4 sm:$0xff]   ;;  %v7986_v47 = vld [vmem:[%s11088_s1 + $0xec4] ss:$16 sps:$4 sm:$0xff]  }
 0x19c   :  { %5111 = vmatprep.subr.bf16.mxu0 %v7894_v48  ;;  %5644 = vmatprep.subr.bf16.mxu1 %v7897_v49  ;;  %v7989_v48 = vld [vmem:[%s11088_s1 + $0xecc] ss:$16 sps:$4 sm:$0xff]   ;;  %v7984_v49 = vld [vmem:[%s11088_s1 + $0xec0] ss:$16 sps:$4 sm:$0xff]  }
 0x19f   :  { %5112 = vmatpush1.bf16.msra.mxu0 %v7892_v50  ;;  %5645 = vmatpush1.bf16.msra.mxu1 %v7895_v51  ;;  %v7987_v50 = vld [vmem:[%s11088_s1 + $0xec8] ss:$16 sps:$4 sm:$0xff]   ;;  %v7992_v51 = vld [vmem:[%s11088_s1 + $0xee4] ss:$16 sps:$4 sm:$0xff]  }
 0x1a0   :  { %5113 = vmatprep.subr.bf16.mxu0 %v7900_v52  ;;  %5646 = vmatprep.subr.bf16.mxu1 %v7903_v53  ;;  %v7995_v52 = vld [vmem:[%s11088_s1 + $0xeec] ss:$16 sps:$4 sm:$0xff]   ;;  %v7990_v53 = vld [vmem:[%s11088_s1 + $0xee0] ss:$16 sps:$4 sm:$0xff]  }
 0x1a3   :  { %5114 = vmatpush1.bf16.msra.mxu0 %v7898_v54  ;;  %5647 = vmatpush1.bf16.msra.mxu1 %v7901_v55  ;;  %v7993_v54 = vld [vmem:[%s11088_s1 + $0xee8] ss:$16 sps:$4 sm:$0xff]   ;;  %v7998_v55 = vld [vmem:[%s11088_s1 + $0xf04] ss:$16 sps:$4 sm:$0xff]  }
 0x1a4   :  { %5115 = vmatprep.subr.bf16.mxu0 %v7906_v56  ;;  %5648 = vmatprep.subr.bf16.mxu1 %v7909_v57  ;;  %v8001_v56 = vld [vmem:[%s11088_s1 + $0xf0c] ss:$16 sps:$4 sm:$0xff]   ;;  %v7996_v57 = vld [vmem:[%s11088_s1 + $0xf00] ss:$16 sps:$4 sm:$0xff]  }
 0x1a7   :  { %5116 = vmatpush1.bf16.msra.mxu0 %v7904_v58  ;;  %5649 = vmatpush1.bf16.msra.mxu1 %v7907_v59  ;;  %v7999_v58 = vld [vmem:[%s11088_s1 + $0xf08] ss:$16 sps:$4 sm:$0xff]   ;;  %v8004_v59 = vld [vmem:[%s11088_s1 + $0xf24] ss:$16 sps:$4 sm:$0xff]  }
 0x1a8   :  { %5117 = vmatprep.subr.bf16.mxu0 %v7912_v60  ;;  %5650 = vmatprep.subr.bf16.mxu1 %v7915_v61  ;;  %v8007_v60 = vld [vmem:[%s11088_s1 + $0xf2c] ss:$16 sps:$4 sm:$0xff]   ;;  %v8002_v61 = vld [vmem:[%s11088_s1 + $0xf20] ss:$16 sps:$4 sm:$0xff]  }
 0x1ab   :  { %5118 = vmatpush1.bf16.msra.mxu0 %v7910_v62  ;;  %5651 = vmatpush1.bf16.msra.mxu1 %v7913_v63  ;;  %v8005_v62 = vld [vmem:[%s11088_s1 + $0xf28] ss:$16 sps:$4 sm:$0xff]   ;;  %v8010_v63 = vld [vmem:[%s11088_s1 + $0xf44] ss:$16 sps:$4 sm:$0xff]  }
 0x1ac   :  { %5119 = vmatprep.subr.bf16.mxu0 %v7918_v0  ;;  %5652 = vmatprep.subr.bf16.mxu1 %v7921_v1  ;;  %v8013_v0 = vld [vmem:[%s11088_s1 + $0xf4c] ss:$16 sps:$4 sm:$0xff]   ;;  %v8008_v1 = vld [vmem:[%s11088_s1 + $0xf40] ss:$16 sps:$4 sm:$0xff]  }
 0x1af   :  { %5120 = vmatpush1.bf16.msra.mxu0 %v7916_v2  ;;  %5653 = vmatpush1.bf16.msra.mxu1 %v7919_v3  ;;  %v8011_v2 = vld [vmem:[%s11088_s1 + $0xf48] ss:$16 sps:$4 sm:$0xff]   ;;  %v8016_v3 = vld [vmem:[%s11088_s1 + $0xf64] ss:$16 sps:$4 sm:$0xff]  }
 0x1b0   :  { %5121 = vmatprep.subr.bf16.mxu0 %v7924_v4  ;;  %5654 = vmatprep.subr.bf16.mxu1 %v7927_v5  ;;  %v8019_v4 = vld [vmem:[%s11088_s1 + $0xf6c] ss:$16 sps:$4 sm:$0xff]   ;;  %v8014_v5 = vld [vmem:[%s11088_s1 + $0xf60] ss:$16 sps:$4 sm:$0xff]  }
 0x1b3   :  { %5122 = vmatpush1.bf16.msra.mxu0 %v7922_v6  ;;  %5655 = vmatpush1.bf16.msra.mxu1 %v7925_v7  ;;  %v8017_v6 = vld [vmem:[%s11088_s1 + $0xf68] ss:$16 sps:$4 sm:$0xff]   ;;  %v8022_v7 = vld [vmem:[%s11088_s1 + $0xf84] ss:$16 sps:$4 sm:$0xff]  }
 0x1b4   :  { %5123 = vmatprep.subr.bf16.mxu0 %v7930_v8  ;;  %5656 = vmatprep.subr.bf16.mxu1 %v7933_v9  ;;  %v8025_v8 = vld [vmem:[%s11088_s1 + $0xf8c] ss:$16 sps:$4 sm:$0xff]   ;;  %v8020_v9 = vld [vmem:[%s11088_s1 + $0xf80] ss:$16 sps:$4 sm:$0xff]  }
 0x1b7   :  { %5124 = vmatpush1.bf16.msra.mxu0 %v7928_v10  ;;  %5657 = vmatpush1.bf16.msra.mxu1 %v7931_v12  ;;  %v8023_v10 = vld [vmem:[%s11088_s1 + $0xf88] ss:$16 sps:$4 sm:$0xff]   ;;  %v8028_v12 = vld [vmem:[%s11088_s1 + $0xfa4] ss:$16 sps:$4 sm:$0xff]  }
 0x1b8   :  { %5125 = vmatprep.subr.bf16.mxu0 %v7936_v13  ;;  %5658 = vmatprep.subr.bf16.mxu1 %v7939_v15  ;;  %v8031_v13 = vld [vmem:[%s11088_s1 + $0xfac] ss:$16 sps:$4 sm:$0xff]   ;;  %v8026_v15 = vld [vmem:[%s11088_s1 + $0xfa0] ss:$16 sps:$4 sm:$0xff]  }
 0x1bb   :  { %5126 = vmatpush1.bf16.msra.mxu0 %v7934_v11  ;;  %5659 = vmatpush1.bf16.msra.mxu1 %v7937_v17  ;;  %v8029_v11 = vld [vmem:[%s11088_s1 + $0xfa8] ss:$16 sps:$4 sm:$0xff]   ;;  %v8034_v17 = vld [vmem:[%s11088_s1 + $0xfc4] ss:$16 sps:$4 sm:$0xff]  }
 0x1bc   :  { %5127 = vmatprep.subr.bf16.mxu0 %v7942_v14  ;;  %5660 = vmatprep.subr.bf16.mxu1 %v7945_v19  ;;  %v8037_v14 = vld [vmem:[%s11088_s1 + $0xfcc] ss:$16 sps:$4 sm:$0xff]   ;;  %v8032_v19 = vld [vmem:[%s11088_s1 + $0xfc0] ss:$16 sps:$4 sm:$0xff]  }
 0x1bf   :  { %5128 = vmatpush1.bf16.msra.mxu0 %v7940_v20  ;;  %5661 = vmatpush1.bf16.msra.mxu1 %v7943_v16  ;;  %v8035_v20 = vld [vmem:[%s11088_s1 + $0xfc8] ss:$16 sps:$4 sm:$0xff]   ;;  %v8040_v16 = vld [vmem:[%s11088_s1 + $0xfe4] ss:$16 sps:$4 sm:$0xff]  }
 0x1c0   :  { %5138 = vmatprep.subr.bf16.mxu0 %v7950_v22  ;;  %5671 = vmatprep.subr.bf16.mxu1 %v7953_v23  ;;  %v8043_v22 = vld [vmem:[%s11088_s1 + $0xfec] ss:$16 sps:$4 sm:$0xff]   ;;  %v8038_v23 = vld [vmem:[%s11088_s1 + $0xfe0] ss:$16 sps:$4 sm:$0xff]  }
 0x1c2   :  { %5130 = vmatmul.mubr.bf16.vlgmr.msra.gmra.mrb[0].mxu0 %v6285_v18  ;;  %5663 = vmatmul.mubr.bf16.vlgmr.msra.gmra.mrb[0].mxu1 %v6285_v18  ;;  %v8041_v18 = vld [vmem:[%s11088_s1 + $0xfe8] ss:$16 sps:$4 sm:$0xff]  }
 0x1c3   :  { %5139 = vmatpush1.bf16.msra.mxu0 %v7948_v25  ;;  %5672 = vmatpush1.bf16.msra.mxu1 %v7951_v26  ;;  %v8048_v25 = vld [vmem:[%s11088_s1 + $0x1004] ss:$16 sps:$4 sm:$0xff]   ;;  %v8051_v26 = vld [vmem:[%s11088_s1 + $0x100c] ss:$16 sps:$4 sm:$0xff]  }
 0x1c4   :  { %5140 = vmatprep.subr.bf16.mxu0 %v7956_v27  ;;  %5673 = vmatprep.subr.bf16.mxu1 %v7959_v21  ;;  %v6287_v27 = vcombine.low %v9934_v24, %v9934_v24  ;;  %v10137_v21 = vld [vmem:[%s11089_s0 + $0x40] sm:$0xff] }
 0x1c5   :  { %5170 = vmatprep.mubr.bf16.mxu0 %v6288_v28  ;;  %5703 = vmatprep.mubr.bf16.mxu1 %v6288_v28  ;;  %v8046_v28 = vld [vmem:[%s11088_s1 + $0x1000] ss:$16 sps:$4 sm:$0xff]   ;;  %v8054_v24 = vld [vmem:[%s11088_s1 + $0x1024] ss:$16 sps:$4 sm:$0xff]  }
 0x1c7   :  { %5141 = vmatpush1.bf16.msra.mxu0 %v7954_v29  ;;  %5674 = vmatpush1.bf16.msra.mxu1 %v7957_v30  ;;  %v8049_v29 = vld [vmem:[%s11088_s1 + $0x1008] ss:$16 sps:$4 sm:$0xff]   ;;  %v8057_v30 = vld [vmem:[%s11088_s1 + $0x102c] ss:$16 sps:$4 sm:$0xff]  }
 0x1c8   :  { %5142 = vmatprep.subr.bf16.mxu0 %v7962_v31  ;;  %5675 = vmatprep.subr.bf16.mxu1 %v7965_v32  ;;  %v6290_v31 = vcombine.high %v10137_v21, %v10137_v21  ;;  %v8052_v32 = vld [vmem:[%s11088_s1 + $0x1020] ss:$16 sps:$4 sm:$0xff]  }
 0x1cb   :  { %5143 = vmatpush1.bf16.msra.mxu0 %v7960_v33  ;;  %5676 = vmatpush1.bf16.msra.mxu1 %v7963_v34  ;;  %v8055_v33 = vld [vmem:[%s11088_s1 + $0x1028] ss:$16 sps:$4 sm:$0xff]   ;;  %v8060_v34 = vld [vmem:[%s11088_s1 + $0x1044] ss:$16 sps:$4 sm:$0xff]  }
 0x1cc   :  { %5144 = vmatprep.subr.bf16.mxu0 %v7968_v35  ;;  %5677 = vmatprep.subr.bf16.mxu1 %v7971_v36  ;;  %v8063_v35 = vld [vmem:[%s11088_s1 + $0x104c] ss:$16 sps:$4 sm:$0xff]   ;;  %v8058_v36 = vld [vmem:[%s11088_s1 + $0x1040] ss:$16 sps:$4 sm:$0xff]  }
 0x1cf   :  { %5145 = vmatpush1.bf16.msra.mxu0 %v7966_v37  ;;  %5678 = vmatpush1.bf16.msra.mxu1 %v7969_v38  ;;  %v8061_v37 = vld [vmem:[%s11088_s1 + $0x1048] ss:$16 sps:$4 sm:$0xff]   ;;  %v8066_v38 = vld [vmem:[%s11088_s1 + $0x1064] ss:$16 sps:$4 sm:$0xff]  }
 0x1d0   :  { %5146 = vmatprep.subr.bf16.mxu0 %v7974_v39  ;;  %5679 = vmatprep.subr.bf16.mxu1 %v7977_v40  ;;  %v8069_v39 = vld [vmem:[%s11088_s1 + $0x106c] ss:$16 sps:$4 sm:$0xff]   ;;  %v8064_v40 = vld [vmem:[%s11088_s1 + $0x1060] ss:$16 sps:$4 sm:$0xff]  }
 0x1d3   :  { %5147 = vmatpush1.bf16.msra.mxu0 %v7972_v41  ;;  %5680 = vmatpush1.bf16.msra.mxu1 %v7975_v42  ;;  %v8067_v41 = vld [vmem:[%s11088_s1 + $0x1068] ss:$16 sps:$4 sm:$0xff]   ;;  %v8072_v42 = vld [vmem:[%s11088_s1 + $0x1084] ss:$16 sps:$4 sm:$0xff]  }
 0x1d4   :  { %5148 = vmatprep.subr.bf16.mxu0 %v7980_v43  ;;  %5681 = vmatprep.subr.bf16.mxu1 %v7983_v44  ;;  %v8075_v43 = vld [vmem:[%s11088_s1 + $0x108c] ss:$16 sps:$4 sm:$0xff]   ;;  %v8070_v44 = vld [vmem:[%s11088_s1 + $0x1080] ss:$16 sps:$4 sm:$0xff]  }
 0x1d7   :  { %5149 = vmatpush1.bf16.msra.mxu0 %v7978_v45  ;;  %5682 = vmatpush1.bf16.msra.mxu1 %v7981_v46  ;;  %v8073_v45 = vld [vmem:[%s11088_s1 + $0x1088] ss:$16 sps:$4 sm:$0xff]   ;;  %v8078_v46 = vld [vmem:[%s11088_s1 + $0x10a4] ss:$16 sps:$4 sm:$0xff]  }
 0x1d8   :  { %5150 = vmatprep.subr.bf16.mxu0 %v7986_v47  ;;  %5683 = vmatprep.subr.bf16.mxu1 %v7989_v48  ;;  %v8081_v47 = vld [vmem:[%s11088_s1 + $0x10ac] ss:$16 sps:$4 sm:$0xff]   ;;  %v8076_v48 = vld [vmem:[%s11088_s1 + $0x10a0] ss:$16 sps:$4 sm:$0xff]  }
 0x1db   :  { %5151 = vmatpush1.bf16.msra.mxu0 %v7984_v49  ;;  %5684 = vmatpush1.bf16.msra.mxu1 %v7987_v50  ;;  %v8079_v49 = vld [vmem:[%s11088_s1 + $0x10a8] ss:$16 sps:$4 sm:$0xff]   ;;  %v8084_v50 = vld [vmem:[%s11088_s1 + $0x10c4] ss:$16 sps:$4 sm:$0xff]  }
 0x1dc   :  { %5152 = vmatprep.subr.bf16.mxu0 %v7992_v51  ;;  %5685 = vmatprep.subr.bf16.mxu1 %v7995_v52  ;;  %v8087_v51 = vld [vmem:[%s11088_s1 + $0x10cc] ss:$16 sps:$4 sm:$0xff]   ;;  %v8082_v52 = vld [vmem:[%s11088_s1 + $0x10c0] ss:$16 sps:$4 sm:$0xff]  }
 0x1df   :  { %5153 = vmatpush1.bf16.msra.mxu0 %v7990_v53  ;;  %5686 = vmatpush1.bf16.msra.mxu1 %v7993_v54  ;;  %v8085_v53 = vld [vmem:[%s11088_s1 + $0x10c8] ss:$16 sps:$4 sm:$0xff]   ;;  %v8090_v54 = vld [vmem:[%s11088_s1 + $0x10e4] ss:$16 sps:$4 sm:$0xff]  }
 0x1e0   :  { %5154 = vmatprep.subr.bf16.mxu0 %v7998_v55  ;;  %5687 = vmatprep.subr.bf16.mxu1 %v8001_v56  ;;  %v8093_v55 = vld [vmem:[%s11088_s1 + $0x10ec] ss:$16 sps:$4 sm:$0xff]   ;;  %v8088_v56 = vld [vmem:[%s11088_s1 + $0x10e0] ss:$16 sps:$4 sm:$0xff]  }
 0x1e3   :  { %5155 = vmatpush1.bf16.msra.mxu0 %v7996_v57  ;;  %5688 = vmatpush1.bf16.msra.mxu1 %v7999_v58  ;;  %v8091_v57 = vld [vmem:[%s11088_s1 + $0x10e8] ss:$16 sps:$4 sm:$0xff]   ;;  %v8096_v58 = vld [vmem:[%s11088_s1 + $0x1104] ss:$16 sps:$4 sm:$0xff]  }
 0x1e4   :  { %5156 = vmatprep.subr.bf16.mxu0 %v8004_v59  ;;  %5689 = vmatprep.subr.bf16.mxu1 %v8007_v60  ;;  %v8099_v59 = vld [vmem:[%s11088_s1 + $0x110c] ss:$16 sps:$4 sm:$0xff]   ;;  %v8094_v60 = vld [vmem:[%s11088_s1 + $0x1100] ss:$16 sps:$4 sm:$0xff]  }
 0x1e7   :  { %5157 = vmatpush1.bf16.msra.mxu0 %v8002_v61  ;;  %5690 = vmatpush1.bf16.msra.mxu1 %v8005_v62  ;;  %v8097_v61 = vld [vmem:[%s11088_s1 + $0x1108] ss:$16 sps:$4 sm:$0xff]   ;;  %v8102_v62 = vld [vmem:[%s11088_s1 + $0x1124] ss:$16 sps:$4 sm:$0xff]  }
 0x1e8   :  { %5158 = vmatprep.subr.bf16.mxu0 %v8010_v63  ;;  %5691 = vmatprep.subr.bf16.mxu1 %v8013_v0  ;;  %v8105_v63 = vld [vmem:[%s11088_s1 + $0x112c] ss:$16 sps:$4 sm:$0xff]   ;;  %v8100_v0 = vld [vmem:[%s11088_s1 + $0x1120] ss:$16 sps:$4 sm:$0xff]  }
 0x1eb   :  { %5159 = vmatpush1.bf16.msra.mxu0 %v8008_v1  ;;  %5692 = vmatpush1.bf16.msra.mxu1 %v8011_v2  ;;  %v8103_v1 = vld [vmem:[%s11088_s1 + $0x1128] ss:$16 sps:$4 sm:$0xff]   ;;  %v8108_v2 = vld [vmem:[%s11088_s1 + $0x1144] ss:$16 sps:$4 sm:$0xff]  }
 0x1ec   :  { %5160 = vmatprep.subr.bf16.mxu0 %v8016_v3  ;;  %5693 = vmatprep.subr.bf16.mxu1 %v8019_v4  ;;  %v8111_v3 = vld [vmem:[%s11088_s1 + $0x114c] ss:$16 sps:$4 sm:$0xff]   ;;  %v8106_v4 = vld [vmem:[%s11088_s1 + $0x1140] ss:$16 sps:$4 sm:$0xff]  }
 0x1ef   :  { %5161 = vmatpush1.bf16.msra.mxu0 %v8014_v5  ;;  %5694 = vmatpush1.bf16.msra.mxu1 %v8017_v6  ;;  %v8109_v5 = vld [vmem:[%s11088_s1 + $0x1148] ss:$16 sps:$4 sm:$0xff]   ;;  %v8114_v6 = vld [vmem:[%s11088_s1 + $0x1164] ss:$16 sps:$4 sm:$0xff]  }
 0x1f0   :  { %5162 = vmatprep.subr.bf16.mxu0 %v8022_v7  ;;  %5695 = vmatprep.subr.bf16.mxu1 %v8025_v8  ;;  %v8117_v7 = vld [vmem:[%s11088_s1 + $0x116c] ss:$16 sps:$4 sm:$0xff]   ;;  %v8112_v8 = vld [vmem:[%s11088_s1 + $0x1160] ss:$16 sps:$4 sm:$0xff]  }
 0x1f3   :  { %5163 = vmatpush1.bf16.msra.mxu0 %v8020_v9  ;;  %5696 = vmatpush1.bf16.msra.mxu1 %v8023_v10  ;;  %v8115_v9 = vld [vmem:[%s11088_s1 + $0x1168] ss:$16 sps:$4 sm:$0xff]   ;;  %v8120_v10 = vld [vmem:[%s11088_s1 + $0x1184] ss:$16 sps:$4 sm:$0xff]  }
 0x1f4   :  { %5164 = vmatprep.subr.bf16.mxu0 %v8028_v12  ;;  %5697 = vmatprep.subr.bf16.mxu1 %v8031_v13  ;;  %v8123_v12 = vld [vmem:[%s11088_s1 + $0x118c] ss:$16 sps:$4 sm:$0xff]   ;;  %v8118_v13 = vld [vmem:[%s11088_s1 + $0x1180] ss:$16 sps:$4 sm:$0xff]  }
 0x1f7   :  { %5165 = vmatpush1.bf16.msra.mxu0 %v8026_v15  ;;  %5698 = vmatpush1.bf16.msra.mxu1 %v8029_v11  ;;  %v8121_v15 = vld [vmem:[%s11088_s1 + $0x1188] ss:$16 sps:$4 sm:$0xff]   ;;  %v8126_v11 = vld [vmem:[%s11088_s1 + $0x11a4] ss:$16 sps:$4 sm:$0xff]  }
 0x1f8   :  { %5166 = vmatprep.subr.bf16.mxu0 %v8034_v17  ;;  %5699 = vmatprep.subr.bf16.mxu1 %v8037_v14  ;;  %v8129_v17 = vld [vmem:[%s11088_s1 + $0x11ac] ss:$16 sps:$4 sm:$0xff]   ;;  %v8124_v14 = vld [vmem:[%s11088_s1 + $0x11a0] ss:$16 sps:$4 sm:$0xff]  }
 0x1fb   :  { %5167 = vmatpush1.bf16.msra.mxu0 %v8032_v19  ;;  %5700 = vmatpush1.bf16.msra.mxu1 %v8035_v20  ;;  %v8127_v19 = vld [vmem:[%s11088_s1 + $0x11a8] ss:$16 sps:$4 sm:$0xff]   ;;  %v8132_v20 = vld [vmem:[%s11088_s1 + $0x11c4] ss:$16 sps:$4 sm:$0xff]  }
 0x1fc   :  { %5168 = vmatprep.subr.bf16.mxu0 %v8040_v16  ;;  %5701 = vmatprep.subr.bf16.mxu1 %v8043_v22  ;;  %v8135_v16 = vld [vmem:[%s11088_s1 + $0x11cc] ss:$16 sps:$4 sm:$0xff]   ;;  %v8130_v22 = vld [vmem:[%s11088_s1 + $0x11c0] ss:$16 sps:$4 sm:$0xff]  }
 0x1ff   :  { %5169 = vmatpush1.bf16.msra.mxu0 %v8038_v23  ;;  %5702 = vmatpush1.bf16.msra.mxu1 %v8041_v18  ;;  %v8133_v23 = vld [vmem:[%s11088_s1 + $0x11c8] ss:$16 sps:$4 sm:$0xff]   ;;  %v8138_v18 = vld [vmem:[%s11088_s1 + $0x11e4] ss:$16 sps:$4 sm:$0xff]  }
 0x200   :  { %5179 = vmatprep.subr.bf16.mxu0 %v8048_v25  ;;  %5712 = vmatprep.subr.bf16.mxu1 %v8051_v26  ;;  %v8141_v25 = vld [vmem:[%s11088_s1 + $0x11ec] ss:$16 sps:$4 sm:$0xff]   ;;  %v8136_v26 = vld [vmem:[%s11088_s1 + $0x11e0] ss:$16 sps:$4 sm:$0xff]  }
 0x202   :  { %5171 = vmatmul.mubr.bf16.vlgmr.msra.gmra.mrb[0].mxu0 %v6287_v27  ;;  %5704 = vmatmul.mubr.bf16.vlgmr.msra.gmra.mrb[0].mxu1 %v6287_v27  ;;  %v8139_v27 = vld [vmem:[%s11088_s1 + $0x11e8] ss:$16 sps:$4 sm:$0xff]  }
 0x203   :  { %5180 = vmatpush1.bf16.msra.mxu0 %v8046_v28  ;;  %5713 = vmatpush1.bf16.msra.mxu1 %v8049_v29  ;;  %v8146_v28 = vld [vmem:[%s11088_s1 + $0x1204] ss:$16 sps:$4 sm:$0xff]   ;;  %v8149_v29 = vld [vmem:[%s11088_s1 + $0x120c] ss:$16 sps:$4 sm:$0xff]  }
 0x204   :  { %5181 = vmatprep.subr.bf16.mxu0 %v8054_v24  ;;  %5714 = vmatprep.subr.bf16.mxu1 %v8057_v30  ;;  %v6289_v24 = vcombine.low %v10137_v21, %v10137_v21  ;;  %v10338_v30 = vld [vmem:[%s11089_s0 + $0x48] sm:$0xff]  ;;  %v8152_v21 = vld [vmem:[%s11088_s1 + $0x1224] ss:$16 sps:$4 sm:$0xff]  }
 0x205   :  { %5211 = vmatprep.mubr.bf16.mxu0 %v6290_v31  ;;  %5744 = vmatprep.mubr.bf16.mxu1 %v6290_v31  ;;  %v8144_v31 = vld [vmem:[%s11088_s1 + $0x1200] ss:$16 sps:$4 sm:$0xff]  }
 0x207   :  { %5182 = vmatpush1.bf16.msra.mxu0 %v8052_v32  ;;  %5715 = vmatpush1.bf16.msra.mxu1 %v8055_v33  ;;  %v8147_v32 = vld [vmem:[%s11088_s1 + $0x1208] ss:$16 sps:$4 sm:$0xff]   ;;  %v8155_v33 = vld [vmem:[%s11088_s1 + $0x122c] ss:$16 sps:$4 sm:$0xff]  }
 0x208   :  { %5183 = vmatprep.subr.bf16.mxu0 %v8060_v34  ;;  %5716 = vmatprep.subr.bf16.mxu1 %v8063_v35  ;;  %v6292_v34 = vcombine.high %v10338_v30, %v10338_v30  ;;  %v8150_v35 = vld [vmem:[%s11088_s1 + $0x1220] ss:$16 sps:$4 sm:$0xff]  }
 0x20b   :  { %5184 = vmatpush1.bf16.msra.mxu0 %v8058_v36  ;;  %5717 = vmatpush1.bf16.msra.mxu1 %v8061_v37  ;;  %v8153_v36 = vld [vmem:[%s11088_s1 + $0x1228] ss:$16 sps:$4 sm:$0xff]   ;;  %v8158_v37 = vld [vmem:[%s11088_s1 + $0x1244] ss:$16 sps:$4 sm:$0xff]  }
 0x20c   :  { %5185 = vmatprep.subr.bf16.mxu0 %v8066_v38  ;;  %5718 = vmatprep.subr.bf16.mxu1 %v8069_v39  ;;  %v8161_v38 = vld [vmem:[%s11088_s1 + $0x124c] ss:$16 sps:$4 sm:$0xff]   ;;  %v8156_v39 = vld [vmem:[%s11088_s1 + $0x1240] ss:$16 sps:$4 sm:$0xff]  }
 0x20f   :  { %5186 = vmatpush1.bf16.msra.mxu0 %v8064_v40  ;;  %5719 = vmatpush1.bf16.msra.mxu1 %v8067_v41  ;;  %v8159_v40 = vld [vmem:[%s11088_s1 + $0x1248] ss:$16 sps:$4 sm:$0xff]   ;;  %v8164_v41 = vld [vmem:[%s11088_s1 + $0x1264] ss:$16 sps:$4 sm:$0xff]  }
 0x210   :  { %5187 = vmatprep.subr.bf16.mxu0 %v8072_v42  ;;  %5720 = vmatprep.subr.bf16.mxu1 %v8075_v43  ;;  %v8167_v42 = vld [vmem:[%s11088_s1 + $0x126c] ss:$16 sps:$4 sm:$0xff]   ;;  %v8162_v43 = vld [vmem:[%s11088_s1 + $0x1260] ss:$16 sps:$4 sm:$0xff]  }
 0x213   :  { %5188 = vmatpush1.bf16.msra.mxu0 %v8070_v44  ;;  %5721 = vmatpush1.bf16.msra.mxu1 %v8073_v45  ;;  %v8165_v44 = vld [vmem:[%s11088_s1 + $0x1268] ss:$16 sps:$4 sm:$0xff]   ;;  %v8170_v45 = vld [vmem:[%s11088_s1 + $0x1284] ss:$16 sps:$4 sm:$0xff]  }
 0x214   :  { %5189 = vmatprep.subr.bf16.mxu0 %v8078_v46  ;;  %5722 = vmatprep.subr.bf16.mxu1 %v8081_v47  ;;  %v8173_v46 = vld [vmem:[%s11088_s1 + $0x128c] ss:$16 sps:$4 sm:$0xff]   ;;  %v8168_v47 = vld [vmem:[%s11088_s1 + $0x1280] ss:$16 sps:$4 sm:$0xff]  }
 0x217   :  { %5190 = vmatpush1.bf16.msra.mxu0 %v8076_v48  ;;  %5723 = vmatpush1.bf16.msra.mxu1 %v8079_v49  ;;  %v8171_v48 = vld [vmem:[%s11088_s1 + $0x1288] ss:$16 sps:$4 sm:$0xff]   ;;  %v8176_v49 = vld [vmem:[%s11088_s1 + $0x12a4] ss:$16 sps:$4 sm:$0xff]  }
 0x218   :  { %5191 = vmatprep.subr.bf16.mxu0 %v8084_v50  ;;  %5724 = vmatprep.subr.bf16.mxu1 %v8087_v51  ;;  %v8179_v50 = vld [vmem:[%s11088_s1 + $0x12ac] ss:$16 sps:$4 sm:$0xff]   ;;  %v8174_v51 = vld [vmem:[%s11088_s1 + $0x12a0] ss:$16 sps:$4 sm:$0xff]  }
 0x21b   :  { %5192 = vmatpush1.bf16.msra.mxu0 %v8082_v52  ;;  %5725 = vmatpush1.bf16.msra.mxu1 %v8085_v53  ;;  %v8177_v52 = vld [vmem:[%s11088_s1 + $0x12a8] ss:$16 sps:$4 sm:$0xff]   ;;  %v8182_v53 = vld [vmem:[%s11088_s1 + $0x12c4] ss:$16 sps:$4 sm:$0xff]  }
 0x21c   :  { %5193 = vmatprep.subr.bf16.mxu0 %v8090_v54  ;;  %5726 = vmatprep.subr.bf16.mxu1 %v8093_v55  ;;  %v8185_v54 = vld [vmem:[%s11088_s1 + $0x12cc] ss:$16 sps:$4 sm:$0xff]   ;;  %v8180_v55 = vld [vmem:[%s11088_s1 + $0x12c0] ss:$16 sps:$4 sm:$0xff]  }
 0x21f   :  { %5194 = vmatpush1.bf16.msra.mxu0 %v8088_v56  ;;  %5727 = vmatpush1.bf16.msra.mxu1 %v8091_v57  ;;  %v8183_v56 = vld [vmem:[%s11088_s1 + $0x12c8] ss:$16 sps:$4 sm:$0xff]   ;;  %v8188_v57 = vld [vmem:[%s11088_s1 + $0x12e4] ss:$16 sps:$4 sm:$0xff]  }
 0x220   :  { %5195 = vmatprep.subr.bf16.mxu0 %v8096_v58  ;;  %5728 = vmatprep.subr.bf16.mxu1 %v8099_v59  ;;  %v8191_v58 = vld [vmem:[%s11088_s1 + $0x12ec] ss:$16 sps:$4 sm:$0xff]   ;;  %v8186_v59 = vld [vmem:[%s11088_s1 + $0x12e0] ss:$16 sps:$4 sm:$0xff]  }
 0x223   :  { %5196 = vmatpush1.bf16.msra.mxu0 %v8094_v60  ;;  %5729 = vmatpush1.bf16.msra.mxu1 %v8097_v61  ;;  %v8189_v60 = vld [vmem:[%s11088_s1 + $0x12e8] ss:$16 sps:$4 sm:$0xff]   ;;  %v8194_v61 = vld [vmem:[%s11088_s1 + $0x1304] ss:$16 sps:$4 sm:$0xff]  }
 0x224   :  { %5197 = vmatprep.subr.bf16.mxu0 %v8102_v62  ;;  %5730 = vmatprep.subr.bf16.mxu1 %v8105_v63  ;;  %v8197_v62 = vld [vmem:[%s11088_s1 + $0x130c] ss:$16 sps:$4 sm:$0xff]   ;;  %v8192_v63 = vld [vmem:[%s11088_s1 + $0x1300] ss:$16 sps:$4 sm:$0xff]  }
 0x227   :  { %5198 = vmatpush1.bf16.msra.mxu0 %v8100_v0  ;;  %5731 = vmatpush1.bf16.msra.mxu1 %v8103_v1  ;;  %v8195_v0 = vld [vmem:[%s11088_s1 + $0x1308] ss:$16 sps:$4 sm:$0xff]   ;;  %v8200_v1 = vld [vmem:[%s11088_s1 + $0x1324] ss:$16 sps:$4 sm:$0xff]  }
 0x228   :  { %5199 = vmatprep.subr.bf16.mxu0 %v8108_v2  ;;  %5732 = vmatprep.subr.bf16.mxu1 %v8111_v3  ;;  %v8203_v2 = vld [vmem:[%s11088_s1 + $0x132c] ss:$16 sps:$4 sm:$0xff]   ;;  %v8198_v3 = vld [vmem:[%s11088_s1 + $0x1320] ss:$16 sps:$4 sm:$0xff]  }
 0x22b   :  { %5200 = vmatpush1.bf16.msra.mxu0 %v8106_v4  ;;  %5733 = vmatpush1.bf16.msra.mxu1 %v8109_v5  ;;  %v8201_v4 = vld [vmem:[%s11088_s1 + $0x1328] ss:$16 sps:$4 sm:$0xff]   ;;  %v8206_v5 = vld [vmem:[%s11088_s1 + $0x1344] ss:$16 sps:$4 sm:$0xff]  }
 0x22c   :  { %5201 = vmatprep.subr.bf16.mxu0 %v8114_v6  ;;  %5734 = vmatprep.subr.bf16.mxu1 %v8117_v7  ;;  %v8209_v6 = vld [vmem:[%s11088_s1 + $0x134c] ss:$16 sps:$4 sm:$0xff]   ;;  %v8204_v7 = vld [vmem:[%s11088_s1 + $0x1340] ss:$16 sps:$4 sm:$0xff]  }
 0x22f   :  { %5202 = vmatpush1.bf16.msra.mxu0 %v8112_v8  ;;  %5735 = vmatpush1.bf16.msra.mxu1 %v8115_v9  ;;  %v8207_v8 = vld [vmem:[%s11088_s1 + $0x1348] ss:$16 sps:$4 sm:$0xff]   ;;  %v8212_v9 = vld [vmem:[%s11088_s1 + $0x1364] ss:$16 sps:$4 sm:$0xff]  }
 0x230   :  { %5203 = vmatprep.subr.bf16.mxu0 %v8120_v10  ;;  %5736 = vmatprep.subr.bf16.mxu1 %v8123_v12  ;;  %v8215_v10 = vld [vmem:[%s11088_s1 + $0x136c] ss:$16 sps:$4 sm:$0xff]   ;;  %v8210_v12 = vld [vmem:[%s11088_s1 + $0x1360] ss:$16 sps:$4 sm:$0xff]  }
 0x233   :  { %5204 = vmatpush1.bf16.msra.mxu0 %v8118_v13  ;;  %5737 = vmatpush1.bf16.msra.mxu1 %v8121_v15  ;;  %v8213_v13 = vld [vmem:[%s11088_s1 + $0x1368] ss:$16 sps:$4 sm:$0xff]   ;;  %v8218_v15 = vld [vmem:[%s11088_s1 + $0x1384] ss:$16 sps:$4 sm:$0xff]  }
 0x234   :  { %5205 = vmatprep.subr.bf16.mxu0 %v8126_v11  ;;  %5738 = vmatprep.subr.bf16.mxu1 %v8129_v17  ;;  %v8221_v11 = vld [vmem:[%s11088_s1 + $0x138c] ss:$16 sps:$4 sm:$0xff]   ;;  %v8216_v17 = vld [vmem:[%s11088_s1 + $0x1380] ss:$16 sps:$4 sm:$0xff]  }
 0x237   :  { %5206 = vmatpush1.bf16.msra.mxu0 %v8124_v14  ;;  %5739 = vmatpush1.bf16.msra.mxu1 %v8127_v19  ;;  %v8219_v14 = vld [vmem:[%s11088_s1 + $0x1388] ss:$16 sps:$4 sm:$0xff]   ;;  %v8224_v19 = vld [vmem:[%s11088_s1 + $0x13a4] ss:$16 sps:$4 sm:$0xff]  }
 0x238   :  { %5207 = vmatprep.subr.bf16.mxu0 %v8132_v20  ;;  %5740 = vmatprep.subr.bf16.mxu1 %v8135_v16  ;;  %v8227_v20 = vld [vmem:[%s11088_s1 + $0x13ac] ss:$16 sps:$4 sm:$0xff]   ;;  %v8222_v16 = vld [vmem:[%s11088_s1 + $0x13a0] ss:$16 sps:$4 sm:$0xff]  }
 0x23b   :  { %5208 = vmatpush1.bf16.msra.mxu0 %v8130_v22  ;;  %5741 = vmatpush1.bf16.msra.mxu1 %v8133_v23  ;;  %v8225_v22 = vld [vmem:[%s11088_s1 + $0x13a8] ss:$16 sps:$4 sm:$0xff]   ;;  %v8230_v23 = vld [vmem:[%s11088_s1 + $0x13c4] ss:$16 sps:$4 sm:$0xff]  }
 0x23c   :  { %5209 = vmatprep.subr.bf16.mxu0 %v8138_v18  ;;  %5742 = vmatprep.subr.bf16.mxu1 %v8141_v25  ;;  %v8233_v18 = vld [vmem:[%s11088_s1 + $0x13cc] ss:$16 sps:$4 sm:$0xff]   ;;  %v8228_v25 = vld [vmem:[%s11088_s1 + $0x13c0] ss:$16 sps:$4 sm:$0xff]  }
 0x23f   :  { %5210 = vmatpush1.bf16.msra.mxu0 %v8136_v26  ;;  %5743 = vmatpush1.bf16.msra.mxu1 %v8139_v27  ;;  %v8231_v26 = vld [vmem:[%s11088_s1 + $0x13c8] ss:$16 sps:$4 sm:$0xff]   ;;  %v8236_v27 = vld [vmem:[%s11088_s1 + $0x13e4] ss:$16 sps:$4 sm:$0xff]  }
 0x240   :  { %5220 = vmatprep.subr.bf16.mxu0 %v8146_v28  ;;  %5753 = vmatprep.subr.bf16.mxu1 %v8149_v29  ;;  %v8239_v28 = vld [vmem:[%s11088_s1 + $0x13ec] ss:$16 sps:$4 sm:$0xff]   ;;  %v8234_v29 = vld [vmem:[%s11088_s1 + $0x13e0] ss:$16 sps:$4 sm:$0xff]  }
 0x242   :  { %5212 = vmatmul.mubr.bf16.vlgmr.msra.gmra.mrb[0].mxu0 %v6289_v24  ;;  %5745 = vmatmul.mubr.bf16.vlgmr.msra.gmra.mrb[0].mxu1 %v6289_v24  ;;  %v8237_v24 = vld [vmem:[%s11088_s1 + $0x13e8] ss:$16 sps:$4 sm:$0xff]  }
 0x243   :  { %5221 = vmatpush1.bf16.msra.mxu0 %v8144_v31  ;;  %5754 = vmatpush1.bf16.msra.mxu1 %v8147_v32  ;;  %v8244_v31 = vld [vmem:[%s11088_s1 + $0x1404] ss:$16 sps:$4 sm:$0xff]   ;;  %v8247_v32 = vld [vmem:[%s11088_s1 + $0x140c] ss:$16 sps:$4 sm:$0xff]  }
 0x244   :  { %5222 = vmatprep.subr.bf16.mxu0 %v8152_v21  ;;  %5755 = vmatprep.subr.bf16.mxu1 %v8155_v33  ;;  %v6291_v21 = vcombine.low %v10338_v30, %v10338_v30  ;;  %v10539_v33 = vld [vmem:[%s11089_s0 + $0x50] sm:$0xff] }
 0x245   :  { %5252 = vmatprep.mubr.bf16.mxu0 %v6292_v34  ;;  %5785 = vmatprep.mubr.bf16.mxu1 %v6292_v34  ;;  %v8242_v34 = vld [vmem:[%s11088_s1 + $0x1400] ss:$16 sps:$4 sm:$0xff]   ;;  %v8250_v30 = vld [vmem:[%s11088_s1 + $0x1424] ss:$16 sps:$4 sm:$0xff]  }
 0x247   :  { %5223 = vmatpush1.bf16.msra.mxu0 %v8150_v35  ;;  %5756 = vmatpush1.bf16.msra.mxu1 %v8153_v36  ;;  %v8245_v35 = vld [vmem:[%s11088_s1 + $0x1408] ss:$16 sps:$4 sm:$0xff]   ;;  %v8253_v36 = vld [vmem:[%s11088_s1 + $0x142c] ss:$16 sps:$4 sm:$0xff]  }
 0x248   :  { %5224 = vmatprep.subr.bf16.mxu0 %v8158_v37  ;;  %5757 = vmatprep.subr.bf16.mxu1 %v8161_v38  ;;  %v6294_v37 = vcombine.high %v10539_v33, %v10539_v33  ;;  %v8248_v38 = vld [vmem:[%s11088_s1 + $0x1420] ss:$16 sps:$4 sm:$0xff]  }
 0x24b   :  { %5225 = vmatpush1.bf16.msra.mxu0 %v8156_v39  ;;  %5758 = vmatpush1.bf16.msra.mxu1 %v8159_v40  ;;  %v8251_v39 = vld [vmem:[%s11088_s1 + $0x1428] ss:$16 sps:$4 sm:$0xff]   ;;  %v8256_v40 = vld [vmem:[%s11088_s1 + $0x1444] ss:$16 sps:$4 sm:$0xff]  }
 0x24c   :  { %5226 = vmatprep.subr.bf16.mxu0 %v8164_v41  ;;  %5759 = vmatprep.subr.bf16.mxu1 %v8167_v42  ;;  %v8259_v41 = vld [vmem:[%s11088_s1 + $0x144c] ss:$16 sps:$4 sm:$0xff]   ;;  %v8254_v42 = vld [vmem:[%s11088_s1 + $0x1440] ss:$16 sps:$4 sm:$0xff]  }
 0x24f   :  { %5227 = vmatpush1.bf16.msra.mxu0 %v8162_v43  ;;  %5760 = vmatpush1.bf16.msra.mxu1 %v8165_v44  ;;  %v8257_v43 = vld [vmem:[%s11088_s1 + $0x1448] ss:$16 sps:$4 sm:$0xff]   ;;  %v8262_v44 = vld [vmem:[%s11088_s1 + $0x1464] ss:$16 sps:$4 sm:$0xff]  }
 0x250   :  { %5228 = vmatprep.subr.bf16.mxu0 %v8170_v45  ;;  %5761 = vmatprep.subr.bf16.mxu1 %v8173_v46  ;;  %v8265_v45 = vld [vmem:[%s11088_s1 + $0x146c] ss:$16 sps:$4 sm:$0xff]   ;;  %v8260_v46 = vld [vmem:[%s11088_s1 + $0x1460] ss:$16 sps:$4 sm:$0xff]  }
 0x253   :  { %5229 = vmatpush1.bf16.msra.mxu0 %v8168_v47  ;;  %5762 = vmatpush1.bf16.msra.mxu1 %v8171_v48  ;;  %v8263_v47 = vld [vmem:[%s11088_s1 + $0x1468] ss:$16 sps:$4 sm:$0xff]   ;;  %v8268_v48 = vld [vmem:[%s11088_s1 + $0x1484] ss:$16 sps:$4 sm:$0xff]  }
 0x254   :  { %5230 = vmatprep.subr.bf16.mxu0 %v8176_v49  ;;  %5763 = vmatprep.subr.bf16.mxu1 %v8179_v50  ;;  %v8271_v49 = vld [vmem:[%s11088_s1 + $0x148c] ss:$16 sps:$4 sm:$0xff]   ;;  %v8266_v50 = vld [vmem:[%s11088_s1 + $0x1480] ss:$16 sps:$4 sm:$0xff]  }
 0x257   :  { %5231 = vmatpush1.bf16.msra.mxu0 %v8174_v51  ;;  %5764 = vmatpush1.bf16.msra.mxu1 %v8177_v52  ;;  %v8269_v51 = vld [vmem:[%s11088_s1 + $0x1488] ss:$16 sps:$4 sm:$0xff]   ;;  %v8274_v52 = vld [vmem:[%s11088_s1 + $0x14a4] ss:$16 sps:$4 sm:$0xff]  }
 0x258   :  { %5232 = vmatprep.subr.bf16.mxu0 %v8182_v53  ;;  %5765 = vmatprep.subr.bf16.mxu1 %v8185_v54  ;;  %v8277_v53 = vld [vmem:[%s11088_s1 + $0x14ac] ss:$16 sps:$4 sm:$0xff]   ;;  %v8272_v54 = vld [vmem:[%s11088_s1 + $0x14a0] ss:$16 sps:$4 sm:$0xff]  }
 0x25b   :  { %5233 = vmatpush1.bf16.msra.mxu0 %v8180_v55  ;;  %5766 = vmatpush1.bf16.msra.mxu1 %v8183_v56  ;;  %v8275_v55 = vld [vmem:[%s11088_s1 + $0x14a8] ss:$16 sps:$4 sm:$0xff]   ;;  %v8280_v56 = vld [vmem:[%s11088_s1 + $0x14c4] ss:$16 sps:$4 sm:$0xff]  }
 0x25c   :  { %5234 = vmatprep.subr.bf16.mxu0 %v8188_v57  ;;  %5767 = vmatprep.subr.bf16.mxu1 %v8191_v58  ;;  %v8283_v57 = vld [vmem:[%s11088_s1 + $0x14cc] ss:$16 sps:$4 sm:$0xff]   ;;  %v8278_v58 = vld [vmem:[%s11088_s1 + $0x14c0] ss:$16 sps:$4 sm:$0xff]  }
 0x25f   :  { %5235 = vmatpush1.bf16.msra.mxu0 %v8186_v59  ;;  %5768 = vmatpush1.bf16.msra.mxu1 %v8189_v60  ;;  %v8281_v59 = vld [vmem:[%s11088_s1 + $0x14c8] ss:$16 sps:$4 sm:$0xff]   ;;  %v8286_v60 = vld [vmem:[%s11088_s1 + $0x14e4] ss:$16 sps:$4 sm:$0xff]  }
 0x260   :  { %5236 = vmatprep.subr.bf16.mxu0 %v8194_v61  ;;  %5769 = vmatprep.subr.bf16.mxu1 %v8197_v62  ;;  %v8289_v61 = vld [vmem:[%s11088_s1 + $0x14ec] ss:$16 sps:$4 sm:$0xff]   ;;  %v8284_v62 = vld [vmem:[%s11088_s1 + $0x14e0] ss:$16 sps:$4 sm:$0xff]  }
 0x263   :  { %5237 = vmatpush1.bf16.msra.mxu0 %v8192_v63  ;;  %5770 = vmatpush1.bf16.msra.mxu1 %v8195_v0  ;;  %v8287_v63 = vld [vmem:[%s11088_s1 + $0x14e8] ss:$16 sps:$4 sm:$0xff]   ;;  %v8292_v0 = vld [vmem:[%s11088_s1 + $0x1504] ss:$16 sps:$4 sm:$0xff]  }
 0x264   :  { %5238 = vmatprep.subr.bf16.mxu0 %v8200_v1  ;;  %5771 = vmatprep.subr.bf16.mxu1 %v8203_v2  ;;  %v8295_v1 = vld [vmem:[%s11088_s1 + $0x150c] ss:$16 sps:$4 sm:$0xff]   ;;  %v8290_v2 = vld [vmem:[%s11088_s1 + $0x1500] ss:$16 sps:$4 sm:$0xff]  }
 0x267   :  { %5239 = vmatpush1.bf16.msra.mxu0 %v8198_v3  ;;  %5772 = vmatpush1.bf16.msra.mxu1 %v8201_v4  ;;  %v8293_v3 = vld [vmem:[%s11088_s1 + $0x1508] ss:$16 sps:$4 sm:$0xff]   ;;  %v8298_v4 = vld [vmem:[%s11088_s1 + $0x1524] ss:$16 sps:$4 sm:$0xff]  }
 0x268   :  { %5240 = vmatprep.subr.bf16.mxu0 %v8206_v5  ;;  %5773 = vmatprep.subr.bf16.mxu1 %v8209_v6  ;;  %v8301_v5 = vld [vmem:[%s11088_s1 + $0x152c] ss:$16 sps:$4 sm:$0xff]   ;;  %v8296_v6 = vld [vmem:[%s11088_s1 + $0x1520] ss:$16 sps:$4 sm:$0xff]  }
 0x26b   :  { %5241 = vmatpush1.bf16.msra.mxu0 %v8204_v7  ;;  %5774 = vmatpush1.bf16.msra.mxu1 %v8207_v8  ;;  %v8299_v7 = vld [vmem:[%s11088_s1 + $0x1528] ss:$16 sps:$4 sm:$0xff]   ;;  %v8304_v8 = vld [vmem:[%s11088_s1 + $0x1544] ss:$16 sps:$4 sm:$0xff]  }
 0x26c   :  { %5242 = vmatprep.subr.bf16.mxu0 %v8212_v9  ;;  %5775 = vmatprep.subr.bf16.mxu1 %v8215_v10  ;;  %v8307_v9 = vld [vmem:[%s11088_s1 + $0x154c] ss:$16 sps:$4 sm:$0xff]   ;;  %v8302_v10 = vld [vmem:[%s11088_s1 + $0x1540] ss:$16 sps:$4 sm:$0xff]  }
 0x26f   :  { %5243 = vmatpush1.bf16.msra.mxu0 %v8210_v12  ;;  %5776 = vmatpush1.bf16.msra.mxu1 %v8213_v13  ;;  %v8305_v12 = vld [vmem:[%s11088_s1 + $0x1548] ss:$16 sps:$4 sm:$0xff]   ;;  %v8310_v13 = vld [vmem:[%s11088_s1 + $0x1564] ss:$16 sps:$4 sm:$0xff]  }
 0x270   :  { %5244 = vmatprep.subr.bf16.mxu0 %v8218_v15  ;;  %5777 = vmatprep.subr.bf16.mxu1 %v8221_v11  ;;  %v8313_v15 = vld [vmem:[%s11088_s1 + $0x156c] ss:$16 sps:$4 sm:$0xff]   ;;  %v8308_v11 = vld [vmem:[%s11088_s1 + $0x1560] ss:$16 sps:$4 sm:$0xff]  }
 0x273   :  { %5245 = vmatpush1.bf16.msra.mxu0 %v8216_v17  ;;  %5778 = vmatpush1.bf16.msra.mxu1 %v8219_v14  ;;  %v8311_v17 = vld [vmem:[%s11088_s1 + $0x1568] ss:$16 sps:$4 sm:$0xff]   ;;  %v8316_v14 = vld [vmem:[%s11088_s1 + $0x1584] ss:$16 sps:$4 sm:$0xff]  }
 0x274   :  { %5246 = vmatprep.subr.bf16.mxu0 %v8224_v19  ;;  %5779 = vmatprep.subr.bf16.mxu1 %v8227_v20  ;;  %v8319_v19 = vld [vmem:[%s11088_s1 + $0x158c] ss:$16 sps:$4 sm:$0xff]   ;;  %v8314_v20 = vld [vmem:[%s11088_s1 + $0x1580] ss:$16 sps:$4 sm:$0xff]  }
 0x277   :  { %5247 = vmatpush1.bf16.msra.mxu0 %v8222_v16  ;;  %5780 = vmatpush1.bf16.msra.mxu1 %v8225_v22  ;;  %v8317_v16 = vld [vmem:[%s11088_s1 + $0x1588] ss:$16 sps:$4 sm:$0xff]   ;;  %v8322_v22 = vld [vmem:[%s11088_s1 + $0x15a4] ss:$16 sps:$4 sm:$0xff]  }
 0x278   :  { %5248 = vmatprep.subr.bf16.mxu0 %v8230_v23  ;;  %5781 = vmatprep.subr.bf16.mxu1 %v8233_v18  ;;  %v8325_v23 = vld [vmem:[%s11088_s1 + $0x15ac] ss:$16 sps:$4 sm:$0xff]   ;;  %v8320_v18 = vld [vmem:[%s11088_s1 + $0x15a0] ss:$16 sps:$4 sm:$0xff]  }
 0x27b   :  { %5249 = vmatpush1.bf16.msra.mxu0 %v8228_v25  ;;  %5782 = vmatpush1.bf16.msra.mxu1 %v8231_v26  ;;  %v8323_v25 = vld [vmem:[%s11088_s1 + $0x15a8] ss:$16 sps:$4 sm:$0xff]   ;;  %v8328_v26 = vld [vmem:[%s11088_s1 + $0x15c4] ss:$16 sps:$4 sm:$0xff]  }
 0x27c   :  { %5250 = vmatprep.subr.bf16.mxu0 %v8236_v27  ;;  %5783 = vmatprep.subr.bf16.mxu1 %v8239_v28  ;;  %v8331_v27 = vld [vmem:[%s11088_s1 + $0x15cc] ss:$16 sps:$4 sm:$0xff]   ;;  %v8326_v28 = vld [vmem:[%s11088_s1 + $0x15c0] ss:$16 sps:$4 sm:$0xff]  }
 0x27f   :  { %5251 = vmatpush1.bf16.msra.mxu0 %v8234_v29  ;;  %5784 = vmatpush1.bf16.msra.mxu1 %v8237_v24  ;;  %v8329_v29 = vld [vmem:[%s11088_s1 + $0x15c8] ss:$16 sps:$4 sm:$0xff]   ;;  %v8334_v24 = vld [vmem:[%s11088_s1 + $0x15e4] ss:$16 sps:$4 sm:$0xff]  }
 0x280   :  { %5261 = vmatprep.subr.bf16.mxu0 %v8244_v31  ;;  %5794 = vmatprep.subr.bf16.mxu1 %v8247_v32  ;;  %v8337_v31 = vld [vmem:[%s11088_s1 + $0x15ec] ss:$16 sps:$4 sm:$0xff]   ;;  %v8332_v32 = vld [vmem:[%s11088_s1 + $0x15e0] ss:$16 sps:$4 sm:$0xff]  }
 0x282   :  { %5253 = vmatmul.mubr.bf16.vlgmr.msra.gmra.mrb[0].mxu0 %v6291_v21  ;;  %5786 = vmatmul.mubr.bf16.vlgmr.msra.gmra.mrb[0].mxu1 %v6291_v21  ;;  %v8335_v21 = vld [vmem:[%s11088_s1 + $0x15e8] ss:$16 sps:$4 sm:$0xff]  }
 0x283   :  { %5262 = vmatpush1.bf16.msra.mxu0 %v8242_v34  ;;  %5795 = vmatpush1.bf16.msra.mxu1 %v8245_v35  ;;  %v8342_v34 = vld [vmem:[%s11088_s1 + $0x1604] ss:$16 sps:$4 sm:$0xff]   ;;  %v8345_v35 = vld [vmem:[%s11088_s1 + $0x160c] ss:$16 sps:$4 sm:$0xff]  }
 0x284   :  { %5263 = vmatprep.subr.bf16.mxu0 %v8250_v30  ;;  %5796 = vmatprep.subr.bf16.mxu1 %v8253_v36  ;;  %v6293_v30 = vcombine.low %v10539_v33, %v10539_v33  ;;  %v10740_v36 = vld [vmem:[%s11089_s0 + $0x58] sm:$0xff]  ;;  %v8348_v33 = vld [vmem:[%s11088_s1 + $0x1624] ss:$16 sps:$4 sm:$0xff]  }
 0x285   :  { %5293 = vmatprep.mubr.bf16.mxu0 %v6294_v37  ;;  %5826 = vmatprep.mubr.bf16.mxu1 %v6294_v37  ;;  %v8340_v37 = vld [vmem:[%s11088_s1 + $0x1600] ss:$16 sps:$4 sm:$0xff]  }
 0x287   :  { %5264 = vmatpush1.bf16.msra.mxu0 %v8248_v38  ;;  %5797 = vmatpush1.bf16.msra.mxu1 %v8251_v39  ;;  %v8343_v38 = vld [vmem:[%s11088_s1 + $0x1608] ss:$16 sps:$4 sm:$0xff]   ;;  %v8351_v39 = vld [vmem:[%s11088_s1 + $0x162c] ss:$16 sps:$4 sm:$0xff]  }
 0x288   :  { %5265 = vmatprep.subr.bf16.mxu0 %v8256_v40  ;;  %5798 = vmatprep.subr.bf16.mxu1 %v8259_v41  ;;  %v6296_v40 = vcombine.high %v10740_v36, %v10740_v36  ;;  %v8346_v41 = vld [vmem:[%s11088_s1 + $0x1620] ss:$16 sps:$4 sm:$0xff]  }
 0x28b   :  { %5266 = vmatpush1.bf16.msra.mxu0 %v8254_v42  ;;  %5799 = vmatpush1.bf16.msra.mxu1 %v8257_v43  ;;  %v8349_v42 = vld [vmem:[%s11088_s1 + $0x1628] ss:$16 sps:$4 sm:$0xff]   ;;  %v8354_v43 = vld [vmem:[%s11088_s1 + $0x1644] ss:$16 sps:$4 sm:$0xff]  }
 0x28c   :  { %5267 = vmatprep.subr.bf16.mxu0 %v8262_v44  ;;  %5800 = vmatprep.subr.bf16.mxu1 %v8265_v45  ;;  %v8357_v44 = vld [vmem:[%s11088_s1 + $0x164c] ss:$16 sps:$4 sm:$0xff]   ;;  %v8352_v45 = vld [vmem:[%s11088_s1 + $0x1640] ss:$16 sps:$4 sm:$0xff]  }
 0x28f   :  { %5268 = vmatpush1.bf16.msra.mxu0 %v8260_v46  ;;  %5801 = vmatpush1.bf16.msra.mxu1 %v8263_v47  ;;  %v8355_v46 = vld [vmem:[%s11088_s1 + $0x1648] ss:$16 sps:$4 sm:$0xff]   ;;  %v8360_v47 = vld [vmem:[%s11088_s1 + $0x1664] ss:$16 sps:$4 sm:$0xff]  }
 0x290   :  { %5269 = vmatprep.subr.bf16.mxu0 %v8268_v48  ;;  %5802 = vmatprep.subr.bf16.mxu1 %v8271_v49  ;;  %v8363_v48 = vld [vmem:[%s11088_s1 + $0x166c] ss:$16 sps:$4 sm:$0xff]   ;;  %v8358_v49 = vld [vmem:[%s11088_s1 + $0x1660] ss:$16 sps:$4 sm:$0xff]  }
 0x293   :  { %5270 = vmatpush1.bf16.msra.mxu0 %v8266_v50  ;;  %5803 = vmatpush1.bf16.msra.mxu1 %v8269_v51  ;;  %v8361_v50 = vld [vmem:[%s11088_s1 + $0x1668] ss:$16 sps:$4 sm:$0xff]   ;;  %v8366_v51 = vld [vmem:[%s11088_s1 + $0x1684] ss:$16 sps:$4 sm:$0xff]  }
 0x294   :  { %5271 = vmatprep.subr.bf16.mxu0 %v8274_v52  ;;  %5804 = vmatprep.subr.bf16.mxu1 %v8277_v53  ;;  %v8369_v52 = vld [vmem:[%s11088_s1 + $0x168c] ss:$16 sps:$4 sm:$0xff]   ;;  %v8364_v53 = vld [vmem:[%s11088_s1 + $0x1680] ss:$16 sps:$4 sm:$0xff]  }
 0x297   :  { %5272 = vmatpush1.bf16.msra.mxu0 %v8272_v54  ;;  %5805 = vmatpush1.bf16.msra.mxu1 %v8275_v55  ;;  %v8367_v54 = vld [vmem:[%s11088_s1 + $0x1688] ss:$16 sps:$4 sm:$0xff]   ;;  %v8372_v55 = vld [vmem:[%s11088_s1 + $0x16a4] ss:$16 sps:$4 sm:$0xff]  }
 0x298   :  { %5273 = vmatprep.subr.bf16.mxu0 %v8280_v56  ;;  %5806 = vmatprep.subr.bf16.mxu1 %v8283_v57  ;;  %v8375_v56 = vld [vmem:[%s11088_s1 + $0x16ac] ss:$16 sps:$4 sm:$0xff]   ;;  %v8370_v57 = vld [vmem:[%s11088_s1 + $0x16a0] ss:$16 sps:$4 sm:$0xff]  }
 0x29b   :  { %5274 = vmatpush1.bf16.msra.mxu0 %v8278_v58  ;;  %5807 = vmatpush1.bf16.msra.mxu1 %v8281_v59  ;;  %v8373_v58 = vld [vmem:[%s11088_s1 + $0x16a8] ss:$16 sps:$4 sm:$0xff]   ;;  %v8378_v59 = vld [vmem:[%s11088_s1 + $0x16c4] ss:$16 sps:$4 sm:$0xff]  }
 0x29c   :  { %5275 = vmatprep.subr.bf16.mxu0 %v8286_v60  ;;  %5808 = vmatprep.subr.bf16.mxu1 %v8289_v61  ;;  %v8381_v60 = vld [vmem:[%s11088_s1 + $0x16cc] ss:$16 sps:$4 sm:$0xff]   ;;  %v8376_v61 = vld [vmem:[%s11088_s1 + $0x16c0] ss:$16 sps:$4 sm:$0xff]  }
 0x29f   :  { %5276 = vmatpush1.bf16.msra.mxu0 %v8284_v62  ;;  %5809 = vmatpush1.bf16.msra.mxu1 %v8287_v63  ;;  %v8379_v62 = vld [vmem:[%s11088_s1 + $0x16c8] ss:$16 sps:$4 sm:$0xff]   ;;  %v8384_v63 = vld [vmem:[%s11088_s1 + $0x16e4] ss:$16 sps:$4 sm:$0xff]  }
 0x2a0   :  { %5277 = vmatprep.subr.bf16.mxu0 %v8292_v0  ;;  %5810 = vmatprep.subr.bf16.mxu1 %v8295_v1  ;;  %v8387_v0 = vld [vmem:[%s11088_s1 + $0x16ec] ss:$16 sps:$4 sm:$0xff]   ;;  %v8382_v1 = vld [vmem:[%s11088_s1 + $0x16e0] ss:$16 sps:$4 sm:$0xff]  }
 0x2a3   :  { %5278 = vmatpush1.bf16.msra.mxu0 %v8290_v2  ;;  %5811 = vmatpush1.bf16.msra.mxu1 %v8293_v3  ;;  %v8385_v2 = vld [vmem:[%s11088_s1 + $0x16e8] ss:$16 sps:$4 sm:$0xff]   ;;  %v8390_v3 = vld [vmem:[%s11088_s1 + $0x1704] ss:$16 sps:$4 sm:$0xff]  }
 0x2a4   :  { %5279 = vmatprep.subr.bf16.mxu0 %v8298_v4  ;;  %5812 = vmatprep.subr.bf16.mxu1 %v8301_v5  ;;  %v8393_v4 = vld [vmem:[%s11088_s1 + $0x170c] ss:$16 sps:$4 sm:$0xff]   ;;  %v8388_v5 = vld [vmem:[%s11088_s1 + $0x1700] ss:$16 sps:$4 sm:$0xff]  }
 0x2a7   :  { %5280 = vmatpush1.bf16.msra.mxu0 %v8296_v6  ;;  %5813 = vmatpush1.bf16.msra.mxu1 %v8299_v7  ;;  %v8391_v6 = vld [vmem:[%s11088_s1 + $0x1708] ss:$16 sps:$4 sm:$0xff]   ;;  %v8396_v7 = vld [vmem:[%s11088_s1 + $0x1724] ss:$16 sps:$4 sm:$0xff]  }
 0x2a8   :  { %5281 = vmatprep.subr.bf16.mxu0 %v8304_v8  ;;  %5814 = vmatprep.subr.bf16.mxu1 %v8307_v9  ;;  %v8399_v8 = vld [vmem:[%s11088_s1 + $0x172c] ss:$16 sps:$4 sm:$0xff]   ;;  %v8394_v9 = vld [vmem:[%s11088_s1 + $0x1720] ss:$16 sps:$4 sm:$0xff]  }
 0x2ab   :  { %5282 = vmatpush1.bf16.msra.mxu0 %v8302_v10  ;;  %5815 = vmatpush1.bf16.msra.mxu1 %v8305_v12  ;;  %v8397_v10 = vld [vmem:[%s11088_s1 + $0x1728] ss:$16 sps:$4 sm:$0xff]   ;;  %v8402_v12 = vld [vmem:[%s11088_s1 + $0x1744] ss:$16 sps:$4 sm:$0xff]  }
 0x2ac   :  { %5283 = vmatprep.subr.bf16.mxu0 %v8310_v13  ;;  %5816 = vmatprep.subr.bf16.mxu1 %v8313_v15  ;;  %v8405_v13 = vld [vmem:[%s11088_s1 + $0x174c] ss:$16 sps:$4 sm:$0xff]   ;;  %v8400_v15 = vld [vmem:[%s11088_s1 + $0x1740] ss:$16 sps:$4 sm:$0xff]  }
 0x2af   :  { %5284 = vmatpush1.bf16.msra.mxu0 %v8308_v11  ;;  %5817 = vmatpush1.bf16.msra.mxu1 %v8311_v17  ;;  %v8403_v11 = vld [vmem:[%s11088_s1 + $0x1748] ss:$16 sps:$4 sm:$0xff]   ;;  %v8408_v17 = vld [vmem:[%s11088_s1 + $0x1764] ss:$16 sps:$4 sm:$0xff]  }
 0x2b0   :  { %5285 = vmatprep.subr.bf16.mxu0 %v8316_v14  ;;  %5818 = vmatprep.subr.bf16.mxu1 %v8319_v19  ;;  %v8411_v14 = vld [vmem:[%s11088_s1 + $0x176c] ss:$16 sps:$4 sm:$0xff]   ;;  %v8406_v19 = vld [vmem:[%s11088_s1 + $0x1760] ss:$16 sps:$4 sm:$0xff]  }
 0x2b3   :  { %5286 = vmatpush1.bf16.msra.mxu0 %v8314_v20  ;;  %5819 = vmatpush1.bf16.msra.mxu1 %v8317_v16  ;;  %v8409_v20 = vld [vmem:[%s11088_s1 + $0x1768] ss:$16 sps:$4 sm:$0xff]   ;;  %v8414_v16 = vld [vmem:[%s11088_s1 + $0x1784] ss:$16 sps:$4 sm:$0xff]  }
 0x2b4   :  { %5287 = vmatprep.subr.bf16.mxu0 %v8322_v22  ;;  %5820 = vmatprep.subr.bf16.mxu1 %v8325_v23  ;;  %v8417_v22 = vld [vmem:[%s11088_s1 + $0x178c] ss:$16 sps:$4 sm:$0xff]   ;;  %v8412_v23 = vld [vmem:[%s11088_s1 + $0x1780] ss:$16 sps:$4 sm:$0xff]  }
 0x2b7   :  { %5288 = vmatpush1.bf16.msra.mxu0 %v8320_v18  ;;  %5821 = vmatpush1.bf16.msra.mxu1 %v8323_v25  ;;  %v8415_v18 = vld [vmem:[%s11088_s1 + $0x1788] ss:$16 sps:$4 sm:$0xff]   ;;  %v8420_v25 = vld [vmem:[%s11088_s1 + $0x17a4] ss:$16 sps:$4 sm:$0xff]  }
 0x2b8   :  { %5289 = vmatprep.subr.bf16.mxu0 %v8328_v26  ;;  %5822 = vmatprep.subr.bf16.mxu1 %v8331_v27  ;;  %v8423_v26 = vld [vmem:[%s11088_s1 + $0x17ac] ss:$16 sps:$4 sm:$0xff]   ;;  %v8418_v27 = vld [vmem:[%s11088_s1 + $0x17a0] ss:$16 sps:$4 sm:$0xff]  }
 0x2bb   :  { %5290 = vmatpush1.bf16.msra.mxu0 %v8326_v28  ;;  %5823 = vmatpush1.bf16.msra.mxu1 %v8329_v29  ;;  %v8421_v28 = vld [vmem:[%s11088_s1 + $0x17a8] ss:$16 sps:$4 sm:$0xff]   ;;  %v8426_v29 = vld [vmem:[%s11088_s1 + $0x17c4] ss:$16 sps:$4 sm:$0xff]  }
 0x2bc   :  { %5291 = vmatprep.subr.bf16.mxu0 %v8334_v24  ;;  %5824 = vmatprep.subr.bf16.mxu1 %v8337_v31  ;;  %v8429_v24 = vld [vmem:[%s11088_s1 + $0x17cc] ss:$16 sps:$4 sm:$0xff]   ;;  %v8424_v31 = vld [vmem:[%s11088_s1 + $0x17c0] ss:$16 sps:$4 sm:$0xff]  }
 0x2bf   :  { %5292 = vmatpush1.bf16.msra.mxu0 %v8332_v32  ;;  %5825 = vmatpush1.bf16.msra.mxu1 %v8335_v21  ;;  %v8427_v32 = vld [vmem:[%s11088_s1 + $0x17c8] ss:$16 sps:$4 sm:$0xff]   ;;  %v8432_v21 = vld [vmem:[%s11088_s1 + $0x17e4] ss:$16 sps:$4 sm:$0xff]  }
 0x2c0   :  { %5302 = vmatprep.subr.bf16.mxu0 %v8342_v34  ;;  %5835 = vmatprep.subr.bf16.mxu1 %v8345_v35  ;;  %v8435_v34 = vld [vmem:[%s11088_s1 + $0x17ec] ss:$16 sps:$4 sm:$0xff]   ;;  %v8430_v35 = vld [vmem:[%s11088_s1 + $0x17e0] ss:$16 sps:$4 sm:$0xff]  }
 0x2c2   :  { %5294 = vmatmul.mubr.bf16.vlgmr.msra.gmra.mrb[0].mxu0 %v6293_v30  ;;  %5827 = vmatmul.mubr.bf16.vlgmr.msra.gmra.mrb[0].mxu1 %v6293_v30  ;;  %v8433_v30 = vld [vmem:[%s11088_s1 + $0x17e8] ss:$16 sps:$4 sm:$0xff]  }
 0x2c3   :  { %5303 = vmatpush1.bf16.msra.mxu0 %v8340_v37  ;;  %5836 = vmatpush1.bf16.msra.mxu1 %v8343_v38  ;;  %v8440_v37 = vld [vmem:[%s11088_s1 + $0x1804] ss:$16 sps:$4 sm:$0xff]   ;;  %v8443_v38 = vld [vmem:[%s11088_s1 + $0x180c] ss:$16 sps:$4 sm:$0xff]  }
 0x2c4   :  { %5304 = vmatprep.subr.bf16.mxu0 %v8348_v33  ;;  %5837 = vmatprep.subr.bf16.mxu1 %v8351_v39  ;;  %v6295_v33 = vcombine.low %v10740_v36, %v10740_v36  ;;  %v8438_v39 = vld [vmem:[%s11088_s1 + $0x1800] ss:$16 sps:$4 sm:$0xff]   ;;  %v8449_v36 = vld [vmem:[%s11088_s1 + $0x182c] ss:$16 sps:$4 sm:$0xff]  }
 0x2c5   :  { %5334 = vmatprep.mubr.bf16.mxu0 %v6296_v40  ;;  %5867 = vmatprep.mubr.bf16.mxu1 %v6296_v40  ;;  %v8441_v40 = vld [vmem:[%s11088_s1 + $0x1808] ss:$16 sps:$4 sm:$0xff]  }
 0x2c7   :  { %5305 = vmatpush1.bf16.msra.mxu0 %v8346_v41  ;;  %5838 = vmatpush1.bf16.msra.mxu1 %v8349_v42  ;;  %v8446_v41 = vld [vmem:[%s11088_s1 + $0x1824] ss:$16 sps:$4 sm:$0xff]   ;;  %v8444_v42 = vld [vmem:[%s11088_s1 + $0x1820] ss:$16 sps:$4 sm:$0xff]  }
 0x2c8   :  { %5306 = vmatprep.subr.bf16.mxu0 %v8354_v43  ;;  %5839 = vmatprep.subr.bf16.mxu1 %v8357_v44  ;;  %v8447_v43 = vld [vmem:[%s11088_s1 + $0x1828] ss:$16 sps:$4 sm:$0xff]   ;;  %v8452_v44 = vld [vmem:[%s11088_s1 + $0x1844] ss:$16 sps:$4 sm:$0xff]  }
 0x2cb   :  { %5307 = vmatpush1.bf16.msra.mxu0 %v8352_v45  ;;  %5840 = vmatpush1.bf16.msra.mxu1 %v8355_v46  ;;  %v8455_v45 = vld [vmem:[%s11088_s1 + $0x184c] ss:$16 sps:$4 sm:$0xff]   ;;  %v8495_v46 = vmov 0  }
 0x2cc   :  { %5308 = vmatprep.subr.bf16.mxu0 %v8360_v47  ;;  %5841 = vmatprep.subr.bf16.mxu1 %v8363_v48  ;;  %v8450_v47 = vld [vmem:[%s11088_s1 + $0x1840] ss:$16 sps:$4 sm:$0xff]   ;;  %v8453_v48 = vld [vmem:[%s11088_s1 + $0x1848] ss:$16 sps:$4 sm:$0xff]  }
 0x2cf   :  { %5309 = vmatpush1.bf16.msra.mxu0 %v8358_v49  ;;  %5842 = vmatpush1.bf16.msra.mxu1 %v8361_v50  ;;  %v8458_v49 = vld [vmem:[%s11088_s1 + $0x1864] ss:$16 sps:$4 sm:$0xff]   ;;  %v8461_v50 = vld [vmem:[%s11088_s1 + $0x186c] ss:$16 sps:$4 sm:$0xff]  }
 0x2d0   :  { %5310 = vmatprep.subr.bf16.mxu0 %v8366_v51  ;;  %5843 = vmatprep.subr.bf16.mxu1 %v8369_v52  ;;  %v8456_v51 = vld [vmem:[%s11088_s1 + $0x1860] ss:$16 sps:$4 sm:$0xff]   ;;  %v8459_v52 = vld [vmem:[%s11088_s1 + $0x1868] ss:$16 sps:$4 sm:$0xff]  }
 0x2d3   :  { %5311 = vmatpush1.bf16.msra.mxu0 %v8364_v53  ;;  %5844 = vmatpush1.bf16.msra.mxu1 %v8367_v54  ;;  %v8463_v53 = vld [vmem:[%s11090_s3 + $0x40] sm:$0xff]  }
 0x2d4   :  { %5312 = vmatprep.subr.bf16.mxu0 %v8372_v55  ;;  %5845 = vmatprep.subr.bf16.mxu1 %v8375_v56  ;;  %v8464_v54 = vld [vmem:[%s11090_s3 + $0xc0] sm:$0xff]  }
 0x2d5   :  { %v8462_v55 = vld [vmem:[%s11089_s0 + $0x60] ss:$0 sps:$4 sm:$0xff]  }
 0x2d6   :  { %v8465_v56 = vld [vmem:[%s11090_s3] sm:$0xff]  }
 0x2d7   :  { %5313 = vmatpush1.bf16.msra.mxu0 %v8370_v57  ;;  %5846 = vmatpush1.bf16.msra.mxu1 %v8373_v58  ;;  %v8466_v57 = vld [vmem:[%s11090_s3 + $0x80] sm:$0xff]   ;;  %v8467_v58 = vld [vmem:[%s11090_s3 + $0x48] sm:$0xff]  }
 0x2d8   :  { %5314 = vmatprep.subr.bf16.mxu0 %v8378_v59  ;;  %5847 = vmatprep.subr.bf16.mxu1 %v8381_v60  ;;  %v8468_v59 = vld [vmem:[%s11090_s3 + $0xc8] sm:$0xff]  }
 0x2d9   :  { %v8469_v60 = vld [vmem:[%s11090_s3 + $0x8] sm:$0xff]  }
 0x2db   :  { %5315 = vmatpush1.bf16.msra.mxu0 %v8376_v61  ;;  %5848 = vmatpush1.bf16.msra.mxu1 %v8379_v62  ;;  %v8470_v61 = vld [vmem:[%s11090_s3 + $0x88] sm:$0xff]   ;;  %v8471_v62 = vld [vmem:[%s11090_s3 + $0x50] sm:$0xff]  }
 0x2dc   :  { %5316 = vmatprep.subr.bf16.mxu0 %v8384_v63  ;;  %5849 = vmatprep.subr.bf16.mxu1 %v8387_v0  ;;  %v8472_v63 = vld [vmem:[%s11090_s3 + $0xd0] sm:$0xff]  }
 0x2dd   :  { %v8473_v0 = vld [vmem:[%s11090_s3 + $0x10] sm:$0xff]  }
 0x2df   :  { %5317 = vmatpush1.bf16.msra.mxu0 %v8382_v1  ;;  %5850 = vmatpush1.bf16.msra.mxu1 %v8385_v2  ;;  %v8474_v1 = vld [vmem:[%s11090_s3 + $0x90] sm:$0xff]   ;;  %v8475_v2 = vld [vmem:[%s11090_s3 + $0x58] sm:$0xff]  }
 0x2e0   :  { %5318 = vmatprep.subr.bf16.mxu0 %v8390_v3  ;;  %5851 = vmatprep.subr.bf16.mxu1 %v8393_v4  ;;  %v8476_v3 = vld [vmem:[%s11090_s3 + $0xd8] sm:$0xff]  }
 0x2e1   :  { %v8477_v4 = vld [vmem:[%s11090_s3 + $0x18] sm:$0xff]  }
 0x2e3   :  { %5319 = vmatpush1.bf16.msra.mxu0 %v8388_v5  ;;  %5852 = vmatpush1.bf16.msra.mxu1 %v8391_v6  ;;  %v8478_v5 = vld [vmem:[%s11090_s3 + $0x98] sm:$0xff]   ;;  %v8479_v6 = vld [vmem:[%s11090_s3 + $0x60] sm:$0xff]  }
 0x2e4   :  { %5320 = vmatprep.subr.bf16.mxu0 %v8396_v7  ;;  %5853 = vmatprep.subr.bf16.mxu1 %v8399_v8  ;;  %v8480_v7 = vld [vmem:[%s11090_s3 + $0xe0] sm:$0xff]  }
 0x2e5   :  { %v8481_v8 = vld [vmem:[%s11090_s3 + $0x20] sm:$0xff]  }
 0x2e7   :  { %5321 = vmatpush1.bf16.msra.mxu0 %v8394_v9  ;;  %5854 = vmatpush1.bf16.msra.mxu1 %v8397_v10  ;;  %v8482_v9 = vld [vmem:[%s11090_s3 + $0xa0] sm:$0xff]   ;;  %v8483_v10 = vld [vmem:[%s11090_s3 + $0x68] sm:$0xff]  }
 0x2e8   :  { %5322 = vmatprep.subr.bf16.mxu0 %v8402_v12  ;;  %5855 = vmatprep.subr.bf16.mxu1 %v8405_v13  ;;  %v8484_v12 = vld [vmem:[%s11090_s3 + $0xe8] sm:$0xff]  }
 0x2e9   :  { %v8485_v13 = vld [vmem:[%s11090_s3 + $0x28] sm:$0xff]  }
 0x2eb   :  { %5323 = vmatpush1.bf16.msra.mxu0 %v8400_v15  ;;  %5856 = vmatpush1.bf16.msra.mxu1 %v8403_v11  ;;  %v8486_v15 = vld [vmem:[%s11090_s3 + $0xa8] sm:$0xff]   ;;  %v8487_v11 = vld [vmem:[%s11090_s3 + $0x70] sm:$0xff]  }
 0x2ec   :  { %5324 = vmatprep.subr.bf16.mxu0 %v8408_v17  ;;  %5857 = vmatprep.subr.bf16.mxu1 %v8411_v14  ;;  %v8488_v17 = vld [vmem:[%s11090_s3 + $0xf0] sm:$0xff]  }
 0x2ed   :  { %v8489_v14 = vld [vmem:[%s11090_s3 + $0x30] sm:$0xff]  }
 0x2ef   :  { %5325 = vmatpush1.bf16.msra.mxu0 %v8406_v19  ;;  %5858 = vmatpush1.bf16.msra.mxu1 %v8409_v20  ;;  %v8490_v19 = vld [vmem:[%s11090_s3 + $0xb0] sm:$0xff]   ;;  %v8491_v20 = vld [vmem:[%s11090_s3 + $0x78] sm:$0xff]  }
 0x2f0   :  { %5326 = vmatprep.subr.bf16.mxu0 %v8414_v16  ;;  %5859 = vmatprep.subr.bf16.mxu1 %v8417_v22  ;;  %v8492_v16 = vld [vmem:[%s11090_s3 + $0xf8] sm:$0xff]  }
 0x2f1   :  { %v8493_v22 = vld [vmem:[%s11090_s3 + $0x38] sm:$0xff]  }
 0x2f3   :  { %5327 = vmatpush1.bf16.msra.mxu0 %v8412_v23  ;;  %5860 = vmatpush1.bf16.msra.mxu1 %v8415_v18  ;;  %v8494_v23 = vld [vmem:[%s11090_s3 + $0xb8] sm:$0xff]   ;;  %v820_v18 = vlaneseq }
 0x2f4   :  { %5328 = vmatprep.subr.bf16.mxu0 %v8420_v25  ;;  %5861 = vmatprep.subr.bf16.mxu1 %v8423_v26 }
 0x2f5   :  { %v821_v25 = vshrl.u32 %v820_v18, 7 }
 0x2f7   :  { %5329 = vmatpush1.bf16.msra.mxu0 %v8418_v27  ;;  %5862 = vmatpush1.bf16.msra.mxu1 %v8421_v28  ;;  %v822_v26 = vsub.s32 0, %v821_v25  ;;  %v830_v27 = vsub.s32 2, %v821_v25  ;;  %v818_v28 = vld [vmem:[%s11091_s2] sm:$0xf] }
 0x2f8   :  { %5330 = vmatprep.subr.bf16.mxu0 %v8426_v29  ;;  %5863 = vmatprep.subr.bf16.mxu1 %v8429_v24  ;;  %v826_v29 = vsub.s32 1, %v821_v25  ;;  %v834_v24 = vsub.s32 3, %v821_v25 }
 0x2fb   :  { %5331 = vmatpush1.bf16.msra.mxu0 %v8424_v31  ;;  %5864 = vmatpush1.bf16.msra.mxu1 %v8427_v32  ;;  %v823_v31 = vrot.slane %v818_v28, %v822_v26  ;;  %v831_v32 = vrot.slane %v818_v28, %v830_v27 }
 0x2fc   :  { %5332 = vmatprep.subr.bf16.mxu0 %v8432_v21  ;;  %5865 = vmatprep.subr.bf16.mxu1 %v8435_v34  ;;  %v827_v21 = vrot.slane %v818_v28, %v826_v29  ;;  %v835_v34 = vrot.slane %v818_v28, %v834_v24 }
 0x2ff   :  { %5333 = vmatpush1.bf16.msra.mxu0 %v8430_v35  ;;  %5866 = vmatpush1.bf16.msra.mxu1 %v8433_v30 }
 0x300   :  { %5343 = vmatprep.subr.bf16.mxu0 %v8440_v37  ;;  %5876 = vmatprep.subr.bf16.mxu1 %v8443_v38 }
 0x302   :  { %5335 = vmatmul.mubr.bf16.vlgmr.msra.gmra.mrb[0].mxu0 %v6295_v33  ;;  %5868 = vmatmul.mubr.bf16.vlgmr.msra.gmra.mrb[0].mxu1 %v6295_v33 }
 0x303   :  { %5344 = vmatpush1.bf16.msra.mxu0 %v8438_v39  ;;  %5877 = vmatpush1.bf16.msra.mxu1 %v8441_v40 }
 0x304   :  { %5345 = vmatprep.subr.bf16.mxu0 %v8446_v41  ;;  %5878 = vmatprep.subr.bf16.mxu1 %v8449_v36 }
 0x305   :  { %5375 = vmatprep.mubr.bf16.mxu0 %v8495_v46  ;;  %5908 = vmatprep.mubr.bf16.mxu1 %v8495_v46 }
 0x307   :  { %5346 = vmatpush1.bf16.msra.mxu0 %v8444_v42  ;;  %5879 = vmatpush1.bf16.msra.mxu1 %v8447_v43 }
 0x308   :  { %5347 = vmatprep.subr.bf16.mxu0 %v8452_v44  ;;  %5880 = vmatprep.subr.bf16.mxu1 %v8455_v45 }
 0x30b   :  { %5348 = vmatpush1.bf16.msra.mxu0 %v8450_v47  ;;  %5881 = vmatpush1.bf16.msra.mxu1 %v8453_v48 }
 0x30c   :  { %5349 = vmatprep.subr.bf16.mxu0 %v8458_v49  ;;  %5882 = vmatprep.subr.bf16.mxu1 %v8461_v50 }
 0x30f   :  { %5350 = vmatpush1.bf16.msra.mxu0 %v8456_v51  ;;  %5883 = vmatpush1.bf16.msra.mxu1 %v8459_v52 }
 0x310   :  { %7117 = vmatprep.subr.bf16.mxu0 %v8463_v53  ;;  %7139 = vmatprep.subr.bf16.mxu1 %v8464_v54 }
 0x312   :  { %7082 = vmatmul.mubr.msk.bf16.vlgmr.msra.gmra.mrb[0].mxu0 %vm4847_vm0, %v8462_v55  ;;  %7083 = vmatmul.mubr.msk.bf16.vlgmr.msra.gmra.mrb[0].mxu1 %vm4847_vm0, %v8462_v55  ;;  %v7084_v55 = vld [vmem:[%s11092_s4] ss:$0 sm:$0xff] }
 0x313   :  { %7118 = vmatpush3.bf16.msra.mxu0 %v8465_v56  ;;  %7140 = vmatpush3.bf16.msra.mxu1 %v8466_v57 }
 0x314   :  { %7119 = vmatprep.subr.bf16.mxu0 %v8467_v58  ;;  %7141 = vmatprep.subr.bf16.mxu1 %v8468_v59 }
 0x317   :  { %7120 = vmatpush3.bf16.msra.mxu0 %v8469_v60  ;;  %7142 = vmatpush3.bf16.msra.mxu1 %v8470_v61 }
 0x318   :  { %7121 = vmatprep.subr.bf16.mxu0 %v8471_v62  ;;  %7143 = vmatprep.subr.bf16.mxu1 %v8472_v63 }
 0x31b   :  { %7122 = vmatpush3.bf16.msra.mxu0 %v8473_v0  ;;  %7144 = vmatpush3.bf16.msra.mxu1 %v8474_v1 }
 0x31c   :  { %7123 = vmatprep.subr.bf16.mxu0 %v8475_v2  ;;  %7145 = vmatprep.subr.bf16.mxu1 %v8476_v3 }
 0x31f   :  { %7124 = vmatpush3.bf16.msra.mxu0 %v8477_v4  ;;  %7146 = vmatpush3.bf16.msra.mxu1 %v8478_v5 }
 0x320   :  { %7125 = vmatprep.subr.bf16.mxu0 %v8479_v6  ;;  %7147 = vmatprep.subr.bf16.mxu1 %v8480_v7 }
 0x323   :  { %7126 = vmatpush3.bf16.msra.mxu0 %v8481_v8  ;;  %7148 = vmatpush3.bf16.msra.mxu1 %v8482_v9 }
 0x324   :  { %7127 = vmatprep.subr.bf16.mxu0 %v8483_v10  ;;  %7149 = vmatprep.subr.bf16.mxu1 %v8484_v12 }
 0x327   :  { %7128 = vmatpush3.bf16.msra.mxu0 %v8485_v13  ;;  %7150 = vmatpush3.bf16.msra.mxu1 %v8486_v15 }
 0x328   :  { %7129 = vmatprep.subr.bf16.mxu0 %v8487_v11  ;;  %7151 = vmatprep.subr.bf16.mxu1 %v8488_v17 }
 0x32b   :  { %7130 = vmatpush3.bf16.msra.mxu0 %v8489_v14  ;;  %7152 = vmatpush3.bf16.msra.mxu1 %v8490_v19 }
 0x32c   :  { %7131 = vmatprep.subr.bf16.mxu0 %v8491_v20  ;;  %7153 = vmatprep.subr.bf16.mxu1 %v8492_v16 }
 0x32f   :  { %7132 = vmatpush3.bf16.msra.mxu0 %v8493_v22  ;;  %7154 = vmatpush3.bf16.msra.mxu1 %v8494_v23 }
 0x3e5   :  { %v5377_v35 = vpop.f32.mrb[0].mxu0  ;;  %v5910_v30 = vpop.f32.mrb[0].mxu1 }
 0x3e6   :  { %v7161_v37 = vadd.f32 %v5377_v35, %v823_v31  ;;  %v7163_v38 = vadd.f32 %v5910_v30, %v831_v32  ;;  %v5379_v33 = vpop.f32.mrb[1].mxu0  ;;  %v5912_v39 = vpop.f32.mrb[1].mxu1 }
 0x3e7   :  { %v7162_v40 = vadd.f32 %v5379_v33, %v827_v21  ;;  %v7164_v41 = vadd.f32 %v5912_v39, %v835_v34  ;;  %v5381_v36 = vpop.f32.mrb[2].mxu0  ;;  %v5914_v42 = vpop.f32.mrb[2].mxu1 }
 0x3e8   :  { %v5917_v43 = vmax.f32 %v7161_v37, 0.0  ;;  %v5919_v44 = vmax.f32 %v7163_v38, 0.0  ;;  %v5382_v45 = vpop.f32.mrb[3].mxu0  ;;  %v5915_v46 = vpop.f32.mrb[3].mxu1 }
 0x3e9   :  { %v5918_v47 = vmax.f32 %v7162_v40, 0.0  ;;  %v5920_v48 = vmax.f32 %v7164_v41, 0.0 }
 0x3ea   :  { %v5921_v51 = vpack.c.bf16 %v5917_v43, %v5917_v43  ;;  %v5923_v52 = vpack.c.bf16 %v5919_v44, %v5919_v44 }
 0x3eb   :  { %v5922_v49 = vpack.c.bf16 %v5918_v47, %v5918_v47  ;;  %v5924_v50 = vpack.c.bf16 %v5920_v48, %v5920_v48 }
 0x3ed   :  { %6220 = vmatprep.mubr.bf16.mxu0 %v5922_v49  ;;  %6260 = vmatprep.mubr.bf16.mxu1 %v5924_v50 }
 0x3ee   :  { %6221 = vmatmul.mubr.bf16.vlgmr.msra.gmra.mrb[4].mxu0 %v5921_v51  ;;  %6261 = vmatmul.mubr.bf16.vlgmr.msra.gmra.mrb[4].mxu1 %v5923_v52 }
 0x4c1   :  { %v7133_v53 = vpop.f32.mrb[4].mxu0  ;;  %v7155_v54 = vpop.f32.mrb[4].mxu1 }
 0x4c2   :  { %v7134_v56 = vpop.f32.mrb[5].mxu0  ;;  %v7156_v57 = vpop.f32.mrb[5].mxu1 }
 0x4c3   :  { %v7135_v58 = vadd.f32 %v7134_v56, %v7133_v53  ;;  %v7157_v59 = vadd.f32 %v7156_v57, %v7155_v54  ;;  %v7136_v60 = vpop.f32.mrb[6].mxu0  ;;  %v7158_v61 = vpop.f32.mrb[6].mxu1 }
 0x4c4   :  { %v7137_v62 = vpop.f32.mrb[7].mxu0  ;;  %v7159_v63 = vpop.f32.mrb[7].mxu1 }
 0x4c5   :  { %v6223_v0 = vadd.f32 %v7135_v58, %v7084_v55 }
 0x4c7   :  { %v6263_v1 = vadd.f32 %v7157_v59, %v6223_v0 }
 0x4c9   :  { %6268 = vst [vmem:[%s11093_s5] sm:$0xff] %v6263_v1 }

</bundles_post_ra>
